<compile_context>
chip_gen: v5e
topology: v5e:2x2
jax: 0.10.0
libtpu: 0.0.40
codegen_flags: <defaults>
</compile_context>

<pallas_src>
import functools

import jax
import jax.numpy as jnp
from jax.experimental import pallas as pl
from jax.experimental.pallas import tpu as pltpu

VMEM = pl.BlockSpec(memory_space=pltpu.MemorySpace.VMEM)
SMEM = pl.BlockSpec(memory_space=pltpu.MemorySpace.SMEM)


def _segment_mean_matrix(n_tokens, d_model):
    """Block-diagonal [N, N] matrix M with M[i,j] = 1/d_model iff i,j in the
    same token segment.  y @ M broadcasts each segment's mean to all of its
    lanes, so per-token LayerNorm stays lane-dense (no (rows, 32) reshape)."""
    n = n_tokens * d_model
    seg = jnp.arange(n) // d_model
    return (seg[:, None] == seg[None, :]).astype(jnp.float32) / float(d_model)


# ----------------------------- Pallas kernels ------------------------------


def _imageproj_kernel(x_ref, w_ref, b_ref, seg_ref, g_ref, bt_ref, o_ref, *, eps):
    """Fused: [B, d_clip] @ W + b  ->  per-token LayerNorm.  Output [B, T*D]."""
    y = jnp.dot(x_ref[...], w_ref[...], preferred_element_type=jnp.float32)
    y = y + b_ref[...]
    mean = jnp.dot(y, seg_ref[...], preferred_element_type=jnp.float32)
    c = y - mean
    var = jnp.dot(c * c, seg_ref[...], preferred_element_type=jnp.float32)
    o_ref[...] = (c * jax.lax.rsqrt(var + eps) * g_ref[...] + bt_ref[...]).astype(
        o_ref.dtype)


def _audioproj_kernel(x_ref, w1_ref, b1_ref, w2_ref, b2_ref, w3_ref, b3_ref,
                      seg_ref, g_ref, bt_ref, o_ref, *, eps):
    """Fused 3-layer MLP (ReLU) + per-token LayerNorm; activations stay in VMEM."""
    h = jnp.dot(x_ref[...], w1_ref[...], preferred_element_type=jnp.float32)
    h = jnp.maximum(h + b1_ref[...], 0.0)
    h = jnp.dot(h, w2_ref[...], preferred_element_type=jnp.float32)
    h = jnp.maximum(h + b2_ref[...], 0.0)
    y = jnp.dot(h, w3_ref[...], preferred_element_type=jnp.float32) + b3_ref[...]
    mean = jnp.dot(y, seg_ref[...], preferred_element_type=jnp.float32)
    c = y - mean
    var = jnp.dot(c * c, seg_ref[...], preferred_element_type=jnp.float32)
    o_ref[...] = (c * jax.lax.rsqrt(var + eps) * g_ref[...] + bt_ref[...]).astype(
        o_ref.dtype)


def _conv3x3_relu_kernel(x_ref, w_ref, b_ref, o_ref, xp_ref, *, cin, cout):
    """3x3 / stride 1 / SAME conv + ReLU on NCHW, entirely on the VPU.

    Weights (cout*cin*9 scalars) and bias live in SMEM and are broadcast into
    multiply-adds.  SAME padding is done in-kernel: zero a (B, Cin, H+2, W+2)
    VMEM scratch and store the interior, then read 9 shifted views.
    """
    B, _, Hp, Wp = xp_ref.shape
    H, W = Hp - 2, Wp - 2

    xp_ref[...] = jnp.zeros_like(xp_ref)
    xp_ref[:, :, 1:H + 1, 1:W + 1] = x_ref[...]

    # Hoist the Cin*9 shifted patches once; reused for every output channel.
    patches = [[[xp_ref[:, i, ky:ky + H, kx:kx + W] for kx in range(3)]
                for ky in range(3)] for i in range(cin)]

    for o in range(cout):
        acc = jnp.zeros((B, H, W), jnp.float32)
        for i in range(cin):
            for ky in range(3):
                for kx in range(3):
                    w = w_ref[((o * cin + i) * 3 + ky) * 3 + kx]
                    acc = acc + w * patches[i][ky][kx]
        o_ref[:, o, :, :] = jnp.maximum(acc + b_ref[o], 0.0)


# --------------------------- Submodule proxies ------------------------------


class ImageProjProxy:
    """ImageProjModel core op: CLIP embedding [B, D_clip] -> [B, T, D] tokens."""

    def __init__(self, key, d_clip=32, tokens=4, d_model=32, eps=1e-5):
        self.tokens, self.d_model, self.eps = tokens, d_model, eps
        n_out = tokens * d_model
        self.w = 0.02 * jax.random.normal(key, (d_clip, n_out), jnp.float32)
        # Parameter reshapes / tiling hoisted here (done once, not per call).
        self.b = jnp.zeros((1, n_out), jnp.float32)
        gamma = jnp.ones((d_model,), jnp.float32)
        beta = jnp.zeros((d_model,), jnp.float32)
        self.gamma_t = jnp.tile(gamma, tokens).reshape(1, n_out)
        self.beta_t = jnp.tile(beta, tokens).reshape(1, n_out)
        self.seg = _segment_mean_matrix(tokens, d_model)

    def __call__(self, clip_emb):
        B = clip_emb.shape[0]
        n_out = self.tokens * self.d_model
        y = pl.pallas_call(
            functools.partial(_imageproj_kernel, eps=self.eps),
            out_shape=jax.ShapeDtypeStruct((B, n_out), jnp.float32),
            in_specs=[VMEM] * 6,
            out_specs=VMEM,
        )(clip_emb, self.w, self.b, self.seg, self.gamma_t, self.beta_t)
        return y.reshape(B, self.tokens, self.d_model)   # free reshape, no transpose


class AudioProjProxy:
    """AudioProjModel core op: audio feats [B, S, A] -> [B, S, T, D] tokens."""

    def __init__(self, key, a_in=48, hidden=64, tokens=2, d_model=32, eps=1e-5):
        k1, k2, k3 = jax.random.split(key, 3)
        self.tokens, self.d_model, self.eps = tokens, d_model, eps
        n_out = tokens * d_model
        self.w1 = 0.02 * jax.random.normal(k1, (a_in, hidden), jnp.float32)
        self.b1 = jnp.zeros((1, hidden), jnp.float32)
        self.w2 = 0.02 * jax.random.normal(k2, (hidden, hidden), jnp.float32)
        self.b2 = jnp.zeros((1, hidden), jnp.float32)
        self.w3 = 0.02 * jax.random.normal(k3, (hidden, n_out), jnp.float32)
        self.b3 = jnp.zeros((1, n_out), jnp.float32)
        gamma = jnp.ones((d_model,), jnp.float32)
        beta = jnp.zeros((d_model,), jnp.float32)
        self.gamma_t = jnp.tile(gamma, tokens).reshape(1, n_out)
        self.beta_t = jnp.tile(beta, tokens).reshape(1, n_out)
        self.seg = _segment_mean_matrix(tokens, d_model)

    def __call__(self, audio_emb):
        B, S, A = audio_emb.shape
        n_out = self.tokens * self.d_model
        x = audio_emb.reshape(B * S, A)                   # free reshape
        y = pl.pallas_call(
            functools.partial(_audioproj_kernel, eps=self.eps),
            out_shape=jax.ShapeDtypeStruct((B * S, n_out), jnp.float32),
            in_specs=[VMEM] * 10,
            out_specs=VMEM,
        )(x, self.w1, self.b1, self.w2, self.b2, self.w3, self.b3,
          self.seg, self.gamma_t, self.beta_t)
        return y.reshape(B, S, self.tokens, self.d_model)  # free reshape


class FaceLocatorProxy:
    """FaceLocator core op: face-region mask (NCHW) -> conditioning features."""

    def __init__(self, key, c_in=3, c_out=4):
        self.c_in, self.c_out = c_in, c_out
        self.w_oihw = 0.02 * jax.random.normal(key, (c_out, c_in, 3, 3), jnp.float32)
        self.w_flat = self.w_oihw.reshape(-1)   # flattened once for SMEM scalar reads
        self.b = jnp.zeros((c_out,), jnp.float32)

    def __call__(self, mask_nchw):
        B, C, H, W = mask_nchw.shape
        return pl.pallas_call(
            functools.partial(_conv3x3_relu_kernel, cin=self.c_in, cout=self.c_out),
            out_shape=jax.ShapeDtypeStruct((B, self.c_out, H, W), jnp.float32),
            in_specs=[VMEM, SMEM, SMEM],
            out_specs=VMEM,
            scratch_shapes=[pltpu.VMEM((B, C, H + 2, W + 2), jnp.float32)],
        )(mask_nchw, self.w_flat, self.b)


# --------------------------------- Net --------------------------------------


class Net:
    """JAX/Pallas mirror of the PyTorch Net container module."""

    def __init__(self, reference_unet, denoising_unet, face_locator, imageproj, audioproj):
        self.reference_unet = reference_unet
        self.denoising_unet = denoising_unet
        self.face_locator = face_locator
        self.imageproj = imageproj
        self.audioproj = audioproj

    def forward(self):
        """Empty function, exactly matching the PyTorch module's empty forward()."""
        return None

    def get_modules(self):
        return {
            "reference_unet": self.reference_unet,
            "denoising_unet": self.denoising_unet,
            "face_locator": self.face_locator,
            "imageproj": self.imageproj,
            "audioproj": self.audioproj,
        }


# --------------------------------- main --------------------------------------


if __name__ == "__main__":
    key = jax.random.PRNGKey(0)
    k_img, k_aud, k_face, k_x1, k_x2, k_x3 = jax.random.split(key, 6)

    # TODO(synk): UNet2DConditionModel / UNet3DConditionModel not translated.
    net = Net(
        reference_unet=None,
        denoising_unet=None,
        face_locator=FaceLocatorProxy(k_face, c_in=3, c_out=4),
        imageproj=ImageProjProxy(k_img, d_clip=32, tokens=4, d_model=32),
        audioproj=AudioProjProxy(k_aud, a_in=48, hidden=64, tokens=2, d_model=32),
    )

    # The module's forward() is empty -> returns None, exactly like PyTorch.
    assert net.forward() is None

    mods = net.get_modules()
    face_mask = jax.random.uniform(k_x1, (2, 3, 16, 16), jnp.float32)   # NCHW
    clip_emb = jax.random.normal(k_x2, (2, 32), jnp.float32)
    audio_emb = jax.random.normal(k_x3, (2, 8, 48), jnp.float32)

    face_feat = mods["face_locator"](face_mask)       # (2, 4, 16, 16) NCHW
    img_tokens = mods["imageproj"](clip_emb)          # (2, 4, 32)
    audio_tokens = mods["audioproj"](audio_emb)       # (2, 8, 2, 32)
    jax.block_until_ready((face_feat, img_tokens, audio_tokens))

    assert face_feat.shape == (2, 4, 16, 16)
    assert img_tokens.shape == (2, 4, 32)
    assert audio_tokens.shape == (2, 8, 2, 32)

    # ------- numerical sanity checks against plain-JAX references -------
    ip = mods["imageproj"]
    y = clip_emb @ ip.w + ip.b
    y3 = y.reshape(2, ip.tokens, ip.d_model)
    m = y3.mean(-1, keepdims=True)
    v = ((y3 - m) ** 2).mean(-1, keepdims=True)
    img_ref = ((y3 - m) * jax.lax.rsqrt(v + ip.eps)).reshape(2, ip.tokens, ip.d_model)
    assert jnp.allclose(img_tokens, img_ref, atol=1e-4, rtol=1e-4)

    ap = mods["audioproj"]
    x = audio_emb.reshape(-1, 48)
    h = jnp.maximum(x @ ap.w1 + ap.b1, 0.0)
    h = jnp.maximum(h @ ap.w2 + ap.b2, 0.0)
    y = h @ ap.w3 + ap.b3
    y3 = y.reshape(-1, ap.tokens, ap.d_model)
    m = y3.mean(-1, keepdims=True)
    v = ((y3 - m) ** 2).mean(-1, keepdims=True)
    aud_ref = ((y3 - m) * jax.lax.rsqrt(v + ap.eps)).reshape(2, 8, ap.tokens, ap.d_model)
    assert jnp.allclose(audio_tokens, aud_ref, atol=1e-4, rtol=1e-4)

    fl = mods["face_locator"]
    conv_ref = jax.lax.conv_general_dilated(
        face_mask, fl.w_oihw, (1, 1), "SAME",
        dimension_numbers=("NCHW", "OIHW", "NCHW"))
    conv_ref = jnp.maximum(conv_ref + fl.b.reshape(1, -1, 1, 1), 0.0)
    assert jnp.allclose(face_feat, conv_ref, atol=1e-4, rtol=1e-4)

    print("KERNEL_OK")
</pallas_src>

<mosaic_0001>
module attributes {stable_mosaic.version = 11 : i64} {
  func.func @_conv3x3_relu_kernel(%arg0: memref<2x3x16x16xf32, #tpu.memory_space<vmem>>, %arg1: memref<108xf32, #tpu.memory_space<smem>>, %arg2: memref<4xf32, #tpu.memory_space<smem>>, %arg3: memref<2x4x16x16xf32, #tpu.memory_space<vmem>>, %arg4: memref<2x3x18x18xf32, #tpu.memory_space<vmem>>) attributes {dimension_semantics = [], scalar_prefetch = 0 : i64, scratch_operands = 1 : i64, tpu.core_type = #tpu.core_type<tc>} {
    %cst = arith.constant 0.000000e+00 : f32
    %0 = vector.broadcast %cst : f32 to vector<2x3x18x18xf32>
    %c0 = arith.constant 0 : index
    %c0_0 = arith.constant 0 : index
    %c0_1 = arith.constant 0 : index
    %c0_2 = arith.constant 0 : index
    %1 = vector.load %arg4[%c0, %c0_0, %c0_1, %c0_2] : memref<2x3x18x18xf32, #tpu.memory_space<vmem>>, vector<2x3x18x18xf32>
    tpu.vector_store %arg4[%c0, %c0_0, %c0_1, %c0_2], %0 {strides = array<i32>} : memref<2x3x18x18xf32, #tpu.memory_space<vmem>>, vector<2x3x18x18xf32>,
    %c0_3 = arith.constant 0 : index
    %c0_4 = arith.constant 0 : index
    %c0_5 = arith.constant 0 : index
    %c0_6 = arith.constant 0 : index
    %2 = vector.load %arg0[%c0_3, %c0_4, %c0_5, %c0_6] : memref<2x3x16x16xf32, #tpu.memory_space<vmem>>, vector<2x3x16x16xf32>
    %c0_7 = arith.constant 0 : index
    %c0_8 = arith.constant 0 : index
    %c1 = arith.constant 1 : index
    %c1_9 = arith.constant 1 : index
    %3 = vector.load %arg4[%c0_7, %c0_8, %c1, %c1_9] : memref<2x3x18x18xf32, #tpu.memory_space<vmem>>, vector<2x3x16x16xf32>
    tpu.vector_store %arg4[%c0_7, %c0_8, %c1, %c1_9], %2 {strides = array<i32>} : memref<2x3x18x18xf32, #tpu.memory_space<vmem>>, vector<2x3x16x16xf32>,
    %c0_10 = arith.constant 0 : index
    %c0_11 = arith.constant 0 : index
    %c0_12 = arith.constant 0 : index
    %c0_13 = arith.constant 0 : index
    %4 = vector.load %arg4[%c0_10, %c0_11, %c0_12, %c0_13] : memref<2x3x18x18xf32, #tpu.memory_space<vmem>>, vector<2x1x16x16xf32>
    %5 = vector.shape_cast %4 : vector<2x1x16x16xf32> to vector<2x16x16xf32>
    %c0_14 = arith.constant 0 : index
    %c0_15 = arith.constant 0 : index
    %c0_16 = arith.constant 0 : index
    %c1_17 = arith.constant 1 : index
    %6 = vector.load %arg4[%c0_14, %c0_15, %c0_16, %c1_17] : memref<2x3x18x18xf32, #tpu.memory_space<vmem>>, vector<2x1x16x16xf32>
    %7 = vector.shape_cast %6 : vector<2x1x16x16xf32> to vector<2x16x16xf32>
    %c0_18 = arith.constant 0 : index
    %c0_19 = arith.constant 0 : index
    %c0_20 = arith.constant 0 : index
    %c2 = arith.constant 2 : index
    %8 = vector.load %arg4[%c0_18, %c0_19, %c0_20, %c2] : memref<2x3x18x18xf32, #tpu.memory_space<vmem>>, vector<2x1x16x16xf32>
    %9 = vector.shape_cast %8 : vector<2x1x16x16xf32> to vector<2x16x16xf32>
    %c0_21 = arith.constant 0 : index
    %c0_22 = arith.constant 0 : index
    %c1_23 = arith.constant 1 : index
    %c0_24 = arith.constant 0 : index
    %10 = vector.load %arg4[%c0_21, %c0_22, %c1_23, %c0_24] : memref<2x3x18x18xf32, #tpu.memory_space<vmem>>, vector<2x1x16x16xf32>
    %11 = vector.shape_cast %10 : vector<2x1x16x16xf32> to vector<2x16x16xf32>
    %c0_25 = arith.constant 0 : index
    %c0_26 = arith.constant 0 : index
    %c1_27 = arith.constant 1 : index
    %c1_28 = arith.constant 1 : index
    %12 = vector.load %arg4[%c0_25, %c0_26, %c1_27, %c1_28] : memref<2x3x18x18xf32, #tpu.memory_space<vmem>>, vector<2x1x16x16xf32>
    %13 = vector.shape_cast %12 : vector<2x1x16x16xf32> to vector<2x16x16xf32>
    %c0_29 = arith.constant 0 : index
    %c0_30 = arith.constant 0 : index
    %c1_31 = arith.constant 1 : index
    %c2_32 = arith.constant 2 : index
    %14 = vector.load %arg4[%c0_29, %c0_30, %c1_31, %c2_32] : memref<2x3x18x18xf32, #tpu.memory_space<vmem>>, vector<2x1x16x16xf32>
    %15 = vector.shape_cast %14 : vector<2x1x16x16xf32> to vector<2x16x16xf32>
    %c0_33 = arith.constant 0 : index
    %c0_34 = arith.constant 0 : index
    %c2_35 = arith.constant 2 : index
    %c0_36 = arith.constant 0 : index
    %16 = vector.load %arg4[%c0_33, %c0_34, %c2_35, %c0_36] : memref<2x3x18x18xf32, #tpu.memory_space<vmem>>, vector<2x1x16x16xf32>
    %17 = vector.shape_cast %16 : vector<2x1x16x16xf32> to vector<2x16x16xf32>
    %c0_37 = arith.constant 0 : index
    %c0_38 = arith.constant 0 : index
    %c2_39 = arith.constant 2 : index
    %c1_40 = arith.constant 1 : index
    %18 = vector.load %arg4[%c0_37, %c0_38, %c2_39, %c1_40] : memref<2x3x18x18xf32, #tpu.memory_space<vmem>>, vector<2x1x16x16xf32>
    %19 = vector.shape_cast %18 : vector<2x1x16x16xf32> to vector<2x16x16xf32>
    %c0_41 = arith.constant 0 : index
    %c0_42 = arith.constant 0 : index
    %c2_43 = arith.constant 2 : index
    %c2_44 = arith.constant 2 : index
    %20 = vector.load %arg4[%c0_41, %c0_42, %c2_43, %c2_44] : memref<2x3x18x18xf32, #tpu.memory_space<vmem>>, vector<2x1x16x16xf32>
    %21 = vector.shape_cast %20 : vector<2x1x16x16xf32> to vector<2x16x16xf32>
    %c0_45 = arith.constant 0 : index
    %c1_46 = arith.constant 1 : index
    %c0_47 = arith.constant 0 : index
    %c0_48 = arith.constant 0 : index
    %22 = vector.load %arg4[%c0_45, %c1_46, %c0_47, %c0_48] : memref<2x3x18x18xf32, #tpu.memory_space<vmem>>, vector<2x1x16x16xf32>
    %23 = vector.shape_cast %22 : vector<2x1x16x16xf32> to vector<2x16x16xf32>
    %c0_49 = arith.constant 0 : index
    %c1_50 = arith.constant 1 : index
    %c0_51 = arith.constant 0 : index
    %c1_52 = arith.constant 1 : index
    %24 = vector.load %arg4[%c0_49, %c1_50, %c0_51, %c1_52] : memref<2x3x18x18xf32, #tpu.memory_space<vmem>>, vector<2x1x16x16xf32>
    %25 = vector.shape_cast %24 : vector<2x1x16x16xf32> to vector<2x16x16xf32>
    %c0_53 = arith.constant 0 : index
    %c1_54 = arith.constant 1 : index
    %c0_55 = arith.constant 0 : index
    %c2_56 = arith.constant 2 : index
    %26 = vector.load %arg4[%c0_53, %c1_54, %c0_55, %c2_56] : memref<2x3x18x18xf32, #tpu.memory_space<vmem>>, vector<2x1x16x16xf32>
    %27 = vector.shape_cast %26 : vector<2x1x16x16xf32> to vector<2x16x16xf32>
    %c0_57 = arith.constant 0 : index
    %c1_58 = arith.constant 1 : index
    %c1_59 = arith.constant 1 : index
    %c0_60 = arith.constant 0 : index
    %28 = vector.load %arg4[%c0_57, %c1_58, %c1_59, %c0_60] : memref<2x3x18x18xf32, #tpu.memory_space<vmem>>, vector<2x1x16x16xf32>
    %29 = vector.shape_cast %28 : vector<2x1x16x16xf32> to vector<2x16x16xf32>
    %c0_61 = arith.constant 0 : index
    %c1_62 = arith.constant 1 : index
    %c1_63 = arith.constant 1 : index
    %c1_64 = arith.constant 1 : index
    %30 = vector.load %arg4[%c0_61, %c1_62, %c1_63, %c1_64] : memref<2x3x18x18xf32, #tpu.memory_space<vmem>>, vector<2x1x16x16xf32>
    %31 = vector.shape_cast %30 : vector<2x1x16x16xf32> to vector<2x16x16xf32>
    %c0_65 = arith.constant 0 : index
    %c1_66 = arith.constant 1 : index
    %c1_67 = arith.constant 1 : index
    %c2_68 = arith.constant 2 : index
    %32 = vector.load %arg4[%c0_65, %c1_66, %c1_67, %c2_68] : memref<2x3x18x18xf32, #tpu.memory_space<vmem>>, vector<2x1x16x16xf32>
    %33 = vector.shape_cast %32 : vector<2x1x16x16xf32> to vector<2x16x16xf32>
    %c0_69 = arith.constant 0 : index
    %c1_70 = arith.constant 1 : index
    %c2_71 = arith.constant 2 : index
    %c0_72 = arith.constant 0 : index
    %34 = vector.load %arg4[%c0_69, %c1_70, %c2_71, %c0_72] : memref<2x3x18x18xf32, #tpu.memory_space<vmem>>, vector<2x1x16x16xf32>
    %35 = vector.shape_cast %34 : vector<2x1x16x16xf32> to vector<2x16x16xf32>
    %c0_73 = arith.constant 0 : index
    %c1_74 = arith.constant 1 : index
    %c2_75 = arith.constant 2 : index
    %c1_76 = arith.constant 1 : index
    %36 = vector.load %arg4[%c0_73, %c1_74, %c2_75, %c1_76] : memref<2x3x18x18xf32, #tpu.memory_space<vmem>>, vector<2x1x16x16xf32>
    %37 = vector.shape_cast %36 : vector<2x1x16x16xf32> to vector<2x16x16xf32>
    %c0_77 = arith.constant 0 : index
    %c1_78 = arith.constant 1 : index
    %c2_79 = arith.constant 2 : index
    %c2_80 = arith.constant 2 : index
    %38 = vector.load %arg4[%c0_77, %c1_78, %c2_79, %c2_80] : memref<2x3x18x18xf32, #tpu.memory_space<vmem>>, vector<2x1x16x16xf32>
    %39 = vector.shape_cast %38 : vector<2x1x16x16xf32> to vector<2x16x16xf32>
    %c0_81 = arith.constant 0 : index
    %c2_82 = arith.constant 2 : index
    %c0_83 = arith.constant 0 : index
    %c0_84 = arith.constant 0 : index
    %40 = vector.load %arg4[%c0_81, %c2_82, %c0_83, %c0_84] : memref<2x3x18x18xf32, #tpu.memory_space<vmem>>, vector<2x1x16x16xf32>
    %41 = vector.shape_cast %40 : vector<2x1x16x16xf32> to vector<2x16x16xf32>
    %c0_85 = arith.constant 0 : index
    %c2_86 = arith.constant 2 : index
    %c0_87 = arith.constant 0 : index
    %c1_88 = arith.constant 1 : index
    %42 = vector.load %arg4[%c0_85, %c2_86, %c0_87, %c1_88] : memref<2x3x18x18xf32, #tpu.memory_space<vmem>>, vector<2x1x16x16xf32>
    %43 = vector.shape_cast %42 : vector<2x1x16x16xf32> to vector<2x16x16xf32>
    %c0_89 = arith.constant 0 : index
    %c2_90 = arith.constant 2 : index
    %c0_91 = arith.constant 0 : index
    %c2_92 = arith.constant 2 : index
    %44 = vector.load %arg4[%c0_89, %c2_90, %c0_91, %c2_92] : memref<2x3x18x18xf32, #tpu.memory_space<vmem>>, vector<2x1x16x16xf32>
    %45 = vector.shape_cast %44 : vector<2x1x16x16xf32> to vector<2x16x16xf32>
    %c0_93 = arith.constant 0 : index
    %c2_94 = arith.constant 2 : index
    %c1_95 = arith.constant 1 : index
    %c0_96 = arith.constant 0 : index
    %46 = vector.load %arg4[%c0_93, %c2_94, %c1_95, %c0_96] : memref<2x3x18x18xf32, #tpu.memory_space<vmem>>, vector<2x1x16x16xf32>
    %47 = vector.shape_cast %46 : vector<2x1x16x16xf32> to vector<2x16x16xf32>
    %c0_97 = arith.constant 0 : index
    %c2_98 = arith.constant 2 : index
    %c1_99 = arith.constant 1 : index
    %c1_100 = arith.constant 1 : index
    %48 = vector.load %arg4[%c0_97, %c2_98, %c1_99, %c1_100] : memref<2x3x18x18xf32, #tpu.memory_space<vmem>>, vector<2x1x16x16xf32>
    %49 = vector.shape_cast %48 : vector<2x1x16x16xf32> to vector<2x16x16xf32>
    %c0_101 = arith.constant 0 : index
    %c2_102 = arith.constant 2 : index
    %c1_103 = arith.constant 1 : index
    %c2_104 = arith.constant 2 : index
    %50 = vector.load %arg4[%c0_101, %c2_102, %c1_103, %c2_104] : memref<2x3x18x18xf32, #tpu.memory_space<vmem>>, vector<2x1x16x16xf32>
    %51 = vector.shape_cast %50 : vector<2x1x16x16xf32> to vector<2x16x16xf32>
    %c0_105 = arith.constant 0 : index
    %c2_106 = arith.constant 2 : index
    %c2_107 = arith.constant 2 : index
    %c0_108 = arith.constant 0 : index
    %52 = vector.load %arg4[%c0_105, %c2_106, %c2_107, %c0_108] : memref<2x3x18x18xf32, #tpu.memory_space<vmem>>, vector<2x1x16x16xf32>
    %53 = vector.shape_cast %52 : vector<2x1x16x16xf32> to vector<2x16x16xf32>
    %c0_109 = arith.constant 0 : index
    %c2_110 = arith.constant 2 : index
    %c2_111 = arith.constant 2 : index
    %c1_112 = arith.constant 1 : index
    %54 = vector.load %arg4[%c0_109, %c2_110, %c2_111, %c1_112] : memref<2x3x18x18xf32, #tpu.memory_space<vmem>>, vector<2x1x16x16xf32>
    %55 = vector.shape_cast %54 : vector<2x1x16x16xf32> to vector<2x16x16xf32>
    %c0_113 = arith.constant 0 : index
    %c2_114 = arith.constant 2 : index
    %c2_115 = arith.constant 2 : index
    %c2_116 = arith.constant 2 : index
    %56 = vector.load %arg4[%c0_113, %c2_114, %c2_115, %c2_116] : memref<2x3x18x18xf32, #tpu.memory_space<vmem>>, vector<2x1x16x16xf32>
    %57 = vector.shape_cast %56 : vector<2x1x16x16xf32> to vector<2x16x16xf32>
    %cst_117 = arith.constant 0.000000e+00 : f32
    %58 = vector.broadcast %cst_117 : f32 to vector<2x16x16xf32>
    %c0_118 = arith.constant 0 : index
    %59 = memref.load %arg1[%c0_118] : memref<108xf32, #tpu.memory_space<smem>>
    %60 = vector.broadcast %59 : f32 to vector<2x16x16xf32>
    %61 = arith.mulf %60, %5 : vector<2x16x16xf32>
    %62 = arith.addf %58, %61 : vector<2x16x16xf32>
    %c1_119 = arith.constant 1 : index
    %63 = memref.load %arg1[%c1_119] : memref<108xf32, #tpu.memory_space<smem>>
    %64 = vector.broadcast %63 : f32 to vector<2x16x16xf32>
    %65 = arith.mulf %64, %7 : vector<2x16x16xf32>
    %66 = arith.addf %62, %65 : vector<2x16x16xf32>
    %c2_120 = arith.constant 2 : index
    %67 = memref.load %arg1[%c2_120] : memref<108xf32, #tpu.memory_space<smem>>
    %68 = vector.broadcast %67 : f32 to vector<2x16x16xf32>
    %69 = arith.mulf %68, %9 : vector<2x16x16xf32>
    %70 = arith.addf %66, %69 : vector<2x16x16xf32>
    %c3 = arith.constant 3 : index
    %71 = memref.load %arg1[%c3] : memref<108xf32, #tpu.memory_space<smem>>
    %72 = vector.broadcast %71 : f32 to vector<2x16x16xf32>
    %73 = arith.mulf %72, %11 : vector<2x16x16xf32>
    %74 = arith.addf %70, %73 : vector<2x16x16xf32>
    %c4 = arith.constant 4 : index
    %75 = memref.load %arg1[%c4] : memref<108xf32, #tpu.memory_space<smem>>
    %76 = vector.broadcast %75 : f32 to vector<2x16x16xf32>
    %77 = arith.mulf %76, %13 : vector<2x16x16xf32>
    %78 = arith.addf %74, %77 : vector<2x16x16xf32>
    %c5 = arith.constant 5 : index
    %79 = memref.load %arg1[%c5] : memref<108xf32, #tpu.memory_space<smem>>
    %80 = vector.broadcast %79 : f32 to vector<2x16x16xf32>
    %81 = arith.mulf %80, %15 : vector<2x16x16xf32>
    %82 = arith.addf %78, %81 : vector<2x16x16xf32>
    %c6 = arith.constant 6 : index
    %83 = memref.load %arg1[%c6] : memref<108xf32, #tpu.memory_space<smem>>
    %84 = vector.broadcast %83 : f32 to vector<2x16x16xf32>
    %85 = arith.mulf %84, %17 : vector<2x16x16xf32>
    %86 = arith.addf %82, %85 : vector<2x16x16xf32>
    %c7 = arith.constant 7 : index
    %87 = memref.load %arg1[%c7] : memref<108xf32, #tpu.memory_space<smem>>
    %88 = vector.broadcast %87 : f32 to vector<2x16x16xf32>
    %89 = arith.mulf %88, %19 : vector<2x16x16xf32>
    %90 = arith.addf %86, %89 : vector<2x16x16xf32>
    %c8 = arith.constant 8 : index
    %91 = memref.load %arg1[%c8] : memref<108xf32, #tpu.memory_space<smem>>
    %92 = vector.broadcast %91 : f32 to vector<2x16x16xf32>
    %93 = arith.mulf %92, %21 : vector<2x16x16xf32>
    %94 = arith.addf %90, %93 : vector<2x16x16xf32>
    %c9 = arith.constant 9 : index
    %95 = memref.load %arg1[%c9] : memref<108xf32, #tpu.memory_space<smem>>
    %96 = vector.broadcast %95 : f32 to vector<2x16x16xf32>
    %97 = arith.mulf %96, %23 : vector<2x16x16xf32>
    %98 = arith.addf %94, %97 : vector<2x16x16xf32>
    %c10 = arith.constant 10 : index
    %99 = memref.load %arg1[%c10] : memref<108xf32, #tpu.memory_space<smem>>
    %100 = vector.broadcast %99 : f32 to vector<2x16x16xf32>
    %101 = arith.mulf %100, %25 : vector<2x16x16xf32>
    %102 = arith.addf %98, %101 : vector<2x16x16xf32>
    %c11 = arith.constant 11 : index
    %103 = memref.load %arg1[%c11] : memref<108xf32, #tpu.memory_space<smem>>
    %104 = vector.broadcast %103 : f32 to vector<2x16x16xf32>
    %105 = arith.mulf %104, %27 : vector<2x16x16xf32>
    %106 = arith.addf %102, %105 : vector<2x16x16xf32>
    %c12 = arith.constant 12 : index
    %107 = memref.load %arg1[%c12] : memref<108xf32, #tpu.memory_space<smem>>
    %108 = vector.broadcast %107 : f32 to vector<2x16x16xf32>
    %109 = arith.mulf %108, %29 : vector<2x16x16xf32>
    %110 = arith.addf %106, %109 : vector<2x16x16xf32>
    %c13 = arith.constant 13 : index
    %111 = memref.load %arg1[%c13] : memref<108xf32, #tpu.memory_space<smem>>
    %112 = vector.broadcast %111 : f32 to vector<2x16x16xf32>
    %113 = arith.mulf %112, %31 : vector<2x16x16xf32>
    %114 = arith.addf %110, %113 : vector<2x16x16xf32>
    %c14 = arith.constant 14 : index
    %115 = memref.load %arg1[%c14] : memref<108xf32, #tpu.memory_space<smem>>
    %116 = vector.broadcast %115 : f32 to vector<2x16x16xf32>
    %117 = arith.mulf %116, %33 : vector<2x16x16xf32>
    %118 = arith.addf %114, %117 : vector<2x16x16xf32>
    %c15 = arith.constant 15 : index
    %119 = memref.load %arg1[%c15] : memref<108xf32, #tpu.memory_space<smem>>
    %120 = vector.broadcast %119 : f32 to vector<2x16x16xf32>
    %121 = arith.mulf %120, %35 : vector<2x16x16xf32>
    %122 = arith.addf %118, %121 : vector<2x16x16xf32>
    %c16 = arith.constant 16 : index
    %123 = memref.load %arg1[%c16] : memref<108xf32, #tpu.memory_space<smem>>
    %124 = vector.broadcast %123 : f32 to vector<2x16x16xf32>
    %125 = arith.mulf %124, %37 : vector<2x16x16xf32>
    %126 = arith.addf %122, %125 : vector<2x16x16xf32>
    %c17 = arith.constant 17 : index
    %127 = memref.load %arg1[%c17] : memref<108xf32, #tpu.memory_space<smem>>
    %128 = vector.broadcast %127 : f32 to vector<2x16x16xf32>
    %129 = arith.mulf %128, %39 : vector<2x16x16xf32>
    %130 = arith.addf %126, %129 : vector<2x16x16xf32>
    %c18 = arith.constant 18 : index
    %131 = memref.load %arg1[%c18] : memref<108xf32, #tpu.memory_space<smem>>
    %132 = vector.broadcast %131 : f32 to vector<2x16x16xf32>
    %133 = arith.mulf %132, %41 : vector<2x16x16xf32>
    %134 = arith.addf %130, %133 : vector<2x16x16xf32>
    %c19 = arith.constant 19 : index
    %135 = memref.load %arg1[%c19] : memref<108xf32, #tpu.memory_space<smem>>
    %136 = vector.broadcast %135 : f32 to vector<2x16x16xf32>
    %137 = arith.mulf %136, %43 : vector<2x16x16xf32>
    %138 = arith.addf %134, %137 : vector<2x16x16xf32>
    %c20 = arith.constant 20 : index
    %139 = memref.load %arg1[%c20] : memref<108xf32, #tpu.memory_space<smem>>
    %140 = vector.broadcast %139 : f32 to vector<2x16x16xf32>
    %141 = arith.mulf %140, %45 : vector<2x16x16xf32>
    %142 = arith.addf %138, %141 : vector<2x16x16xf32>
    %c21 = arith.constant 21 : index
    %143 = memref.load %arg1[%c21] : memref<108xf32, #tpu.memory_space<smem>>
    %144 = vector.broadcast %143 : f32 to vector<2x16x16xf32>
    %145 = arith.mulf %144, %47 : vector<2x16x16xf32>
    %146 = arith.addf %142, %145 : vector<2x16x16xf32>
    %c22 = arith.constant 22 : index
    %147 = memref.load %arg1[%c22] : memref<108xf32, #tpu.memory_space<smem>>
    %148 = vector.broadcast %147 : f32 to vector<2x16x16xf32>
    %149 = arith.mulf %148, %49 : vector<2x16x16xf32>
    %150 = arith.addf %146, %149 : vector<2x16x16xf32>
    %c23 = arith.constant 23 : index
    %151 = memref.load %arg1[%c23] : memref<108xf32, #tpu.memory_space<smem>>
    %152 = vector.broadcast %151 : f32 to vector<2x16x16xf32>
    %153 = arith.mulf %152, %51 : vector<2x16x16xf32>
    %154 = arith.addf %150, %153 : vector<2x16x16xf32>
    %c24 = arith.constant 24 : index
    %155 = memref.load %arg1[%c24] : memref<108xf32, #tpu.memory_space<smem>>
    %156 = vector.broadcast %155 : f32 to vector<2x16x16xf32>
    %157 = arith.mulf %156, %53 : vector<2x16x16xf32>
    %158 = arith.addf %154, %157 : vector<2x16x16xf32>
    %c25 = arith.constant 25 : index
    %159 = memref.load %arg1[%c25] : memref<108xf32, #tpu.memory_space<smem>>
    %160 = vector.broadcast %159 : f32 to vector<2x16x16xf32>
    %161 = arith.mulf %160, %55 : vector<2x16x16xf32>
    %162 = arith.addf %158, %161 : vector<2x16x16xf32>
    %c26 = arith.constant 26 : index
    %163 = memref.load %arg1[%c26] : memref<108xf32, #tpu.memory_space<smem>>
    %164 = vector.broadcast %163 : f32 to vector<2x16x16xf32>
    %165 = arith.mulf %164, %57 : vector<2x16x16xf32>
    %166 = arith.addf %162, %165 : vector<2x16x16xf32>
    %c0_121 = arith.constant 0 : index
    %167 = memref.load %arg2[%c0_121] : memref<4xf32, #tpu.memory_space<smem>>
    %168 = vector.broadcast %167 : f32 to vector<2x16x16xf32>
    %169 = arith.addf %166, %168 : vector<2x16x16xf32>
    %cst_122 = arith.constant 0.000000e+00 : f32
    %170 = vector.broadcast %cst_122 : f32 to vector<2x16x16xf32>
    %171 = arith.maximumf %169, %170 : vector<2x16x16xf32>
    %c0_123 = arith.constant 0 : index
    %c0_124 = arith.constant 0 : index
    %c0_125 = arith.constant 0 : index
    %c0_126 = arith.constant 0 : index
    %172 = vector.load %arg3[%c0_123, %c0_124, %c0_125, %c0_126] : memref<2x4x16x16xf32, #tpu.memory_space<vmem>>, vector<2x1x16x16xf32>
    %173 = vector.shape_cast %172 : vector<2x1x16x16xf32> to vector<2x16x16xf32>
    %174 = vector.shape_cast %171 : vector<2x16x16xf32> to vector<2x1x16x16xf32>
    tpu.vector_store %arg3[%c0_123, %c0_124, %c0_125, %c0_126], %174 {strides = array<i32>} : memref<2x4x16x16xf32, #tpu.memory_space<vmem>>, vector<2x1x16x16xf32>,
    %cst_127 = arith.constant 0.000000e+00 : f32
    %175 = vector.broadcast %cst_127 : f32 to vector<2x16x16xf32>
    %c27 = arith.constant 27 : index
    %176 = memref.load %arg1[%c27] : memref<108xf32, #tpu.memory_space<smem>>
    %177 = vector.broadcast %176 : f32 to vector<2x16x16xf32>
    %178 = arith.mulf %177, %5 : vector<2x16x16xf32>
    %179 = arith.addf %175, %178 : vector<2x16x16xf32>
    %c28 = arith.constant 28 : index
    %180 = memref.load %arg1[%c28] : memref<108xf32, #tpu.memory_space<smem>>
    %181 = vector.broadcast %180 : f32 to vector<2x16x16xf32>
    %182 = arith.mulf %181, %7 : vector<2x16x16xf32>
    %183 = arith.addf %179, %182 : vector<2x16x16xf32>
    %c29 = arith.constant 29 : index
    %184 = memref.load %arg1[%c29] : memref<108xf32, #tpu.memory_space<smem>>
    %185 = vector.broadcast %184 : f32 to vector<2x16x16xf32>
    %186 = arith.mulf %185, %9 : vector<2x16x16xf32>
    %187 = arith.addf %183, %186 : vector<2x16x16xf32>
    %c30 = arith.constant 30 : index
    %188 = memref.load %arg1[%c30] : memref<108xf32, #tpu.memory_space<smem>>
    %189 = vector.broadcast %188 : f32 to vector<2x16x16xf32>
    %190 = arith.mulf %189, %11 : vector<2x16x16xf32>
    %191 = arith.addf %187, %190 : vector<2x16x16xf32>
    %c31 = arith.constant 31 : index
    %192 = memref.load %arg1[%c31] : memref<108xf32, #tpu.memory_space<smem>>
    %193 = vector.broadcast %192 : f32 to vector<2x16x16xf32>
    %194 = arith.mulf %193, %13 : vector<2x16x16xf32>
    %195 = arith.addf %191, %194 : vector<2x16x16xf32>
    %c32 = arith.constant 32 : index
    %196 = memref.load %arg1[%c32] : memref<108xf32, #tpu.memory_space<smem>>
    %197 = vector.broadcast %196 : f32 to vector<2x16x16xf32>
    %198 = arith.mulf %197, %15 : vector<2x16x16xf32>
    %199 = arith.addf %195, %198 : vector<2x16x16xf32>
    %c33 = arith.constant 33 : index
    %200 = memref.load %arg1[%c33] : memref<108xf32, #tpu.memory_space<smem>>
    %201 = vector.broadcast %200 : f32 to vector<2x16x16xf32>
    %202 = arith.mulf %201, %17 : vector<2x16x16xf32>
    %203 = arith.addf %199, %202 : vector<2x16x16xf32>
    %c34 = arith.constant 34 : index
    %204 = memref.load %arg1[%c34] : memref<108xf32, #tpu.memory_space<smem>>
    %205 = vector.broadcast %204 : f32 to vector<2x16x16xf32>
    %206 = arith.mulf %205, %19 : vector<2x16x16xf32>
    %207 = arith.addf %203, %206 : vector<2x16x16xf32>
    %c35 = arith.constant 35 : index
    %208 = memref.load %arg1[%c35] : memref<108xf32, #tpu.memory_space<smem>>
    %209 = vector.broadcast %208 : f32 to vector<2x16x16xf32>
    %210 = arith.mulf %209, %21 : vector<2x16x16xf32>
    %211 = arith.addf %207, %210 : vector<2x16x16xf32>
    %c36 = arith.constant 36 : index
    %212 = memref.load %arg1[%c36] : memref<108xf32, #tpu.memory_space<smem>>
    %213 = vector.broadcast %212 : f32 to vector<2x16x16xf32>
    %214 = arith.mulf %213, %23 : vector<2x16x16xf32>
    %215 = arith.addf %211, %214 : vector<2x16x16xf32>
    %c37 = arith.constant 37 : index
    %216 = memref.load %arg1[%c37] : memref<108xf32, #tpu.memory_space<smem>>
    %217 = vector.broadcast %216 : f32 to vector<2x16x16xf32>
    %218 = arith.mulf %217, %25 : vector<2x16x16xf32>
    %219 = arith.addf %215, %218 : vector<2x16x16xf32>
    %c38 = arith.constant 38 : index
    %220 = memref.load %arg1[%c38] : memref<108xf32, #tpu.memory_space<smem>>
    %221 = vector.broadcast %220 : f32 to vector<2x16x16xf32>
    %222 = arith.mulf %221, %27 : vector<2x16x16xf32>
    %223 = arith.addf %219, %222 : vector<2x16x16xf32>
    %c39 = arith.constant 39 : index
    %224 = memref.load %arg1[%c39] : memref<108xf32, #tpu.memory_space<smem>>
    %225 = vector.broadcast %224 : f32 to vector<2x16x16xf32>
    %226 = arith.mulf %225, %29 : vector<2x16x16xf32>
    %227 = arith.addf %223, %226 : vector<2x16x16xf32>
    %c40 = arith.constant 40 : index
    %228 = memref.load %arg1[%c40] : memref<108xf32, #tpu.memory_space<smem>>
    %229 = vector.broadcast %228 : f32 to vector<2x16x16xf32>
    %230 = arith.mulf %229, %31 : vector<2x16x16xf32>
    %231 = arith.addf %227, %230 : vector<2x16x16xf32>
    %c41 = arith.constant 41 : index
    %232 = memref.load %arg1[%c41] : memref<108xf32, #tpu.memory_space<smem>>
    %233 = vector.broadcast %232 : f32 to vector<2x16x16xf32>
    %234 = arith.mulf %233, %33 : vector<2x16x16xf32>
    %235 = arith.addf %231, %234 : vector<2x16x16xf32>
    %c42 = arith.constant 42 : index
    %236 = memref.load %arg1[%c42] : memref<108xf32, #tpu.memory_space<smem>>
    %237 = vector.broadcast %236 : f32 to vector<2x16x16xf32>
    %238 = arith.mulf %237, %35 : vector<2x16x16xf32>
    %239 = arith.addf %235, %238 : vector<2x16x16xf32>
    %c43 = arith.constant 43 : index
    %240 = memref.load %arg1[%c43] : memref<108xf32, #tpu.memory_space<smem>>
    %241 = vector.broadcast %240 : f32 to vector<2x16x16xf32>
    %242 = arith.mulf %241, %37 : vector<2x16x16xf32>
    %243 = arith.addf %239, %242 : vector<2x16x16xf32>
    %c44 = arith.constant 44 : index
    %244 = memref.load %arg1[%c44] : memref<108xf32, #tpu.memory_space<smem>>
    %245 = vector.broadcast %244 : f32 to vector<2x16x16xf32>
    %246 = arith.mulf %245, %39 : vector<2x16x16xf32>
    %247 = arith.addf %243, %246 : vector<2x16x16xf32>
    %c45 = arith.constant 45 : index
    %248 = memref.load %arg1[%c45] : memref<108xf32, #tpu.memory_space<smem>>
    %249 = vector.broadcast %248 : f32 to vector<2x16x16xf32>
    %250 = arith.mulf %249, %41 : vector<2x16x16xf32>
    %251 = arith.addf %247, %250 : vector<2x16x16xf32>
    %c46 = arith.constant 46 : index
    %252 = memref.load %arg1[%c46] : memref<108xf32, #tpu.memory_space<smem>>
    %253 = vector.broadcast %252 : f32 to vector<2x16x16xf32>
    %254 = arith.mulf %253, %43 : vector<2x16x16xf32>
    %255 = arith.addf %251, %254 : vector<2x16x16xf32>
    %c47 = arith.constant 47 : index
    %256 = memref.load %arg1[%c47] : memref<108xf32, #tpu.memory_space<smem>>
    %257 = vector.broadcast %256 : f32 to vector<2x16x16xf32>
    %258 = arith.mulf %257, %45 : vector<2x16x16xf32>
    %259 = arith.addf %255, %258 : vector<2x16x16xf32>
    %c48 = arith.constant 48 : index
    %260 = memref.load %arg1[%c48] : memref<108xf32, #tpu.memory_space<smem>>
    %261 = vector.broadcast %260 : f32 to vector<2x16x16xf32>
    %262 = arith.mulf %261, %47 : vector<2x16x16xf32>
    %263 = arith.addf %259, %262 : vector<2x16x16xf32>
    %c49 = arith.constant 49 : index
    %264 = memref.load %arg1[%c49] : memref<108xf32, #tpu.memory_space<smem>>
    %265 = vector.broadcast %264 : f32 to vector<2x16x16xf32>
    %266 = arith.mulf %265, %49 : vector<2x16x16xf32>
    %267 = arith.addf %263, %266 : vector<2x16x16xf32>
    %c50 = arith.constant 50 : index
    %268 = memref.load %arg1[%c50] : memref<108xf32, #tpu.memory_space<smem>>
    %269 = vector.broadcast %268 : f32 to vector<2x16x16xf32>
    %270 = arith.mulf %269, %51 : vector<2x16x16xf32>
    %271 = arith.addf %267, %270 : vector<2x16x16xf32>
    %c51 = arith.constant 51 : index
    %272 = memref.load %arg1[%c51] : memref<108xf32, #tpu.memory_space<smem>>
    %273 = vector.broadcast %272 : f32 to vector<2x16x16xf32>
    %274 = arith.mulf %273, %53 : vector<2x16x16xf32>
    %275 = arith.addf %271, %274 : vector<2x16x16xf32>
    %c52 = arith.constant 52 : index
    %276 = memref.load %arg1[%c52] : memref<108xf32, #tpu.memory_space<smem>>
    %277 = vector.broadcast %276 : f32 to vector<2x16x16xf32>
    %278 = arith.mulf %277, %55 : vector<2x16x16xf32>
    %279 = arith.addf %275, %278 : vector<2x16x16xf32>
    %c53 = arith.constant 53 : index
    %280 = memref.load %arg1[%c53] : memref<108xf32, #tpu.memory_space<smem>>
    %281 = vector.broadcast %280 : f32 to vector<2x16x16xf32>
    %282 = arith.mulf %281, %57 : vector<2x16x16xf32>
    %283 = arith.addf %279, %282 : vector<2x16x16xf32>
    %c1_128 = arith.constant 1 : index
    %284 = memref.load %arg2[%c1_128] : memref<4xf32, #tpu.memory_space<smem>>
    %285 = vector.broadcast %284 : f32 to vector<2x16x16xf32>
    %286 = arith.addf %283, %285 : vector<2x16x16xf32>
    %cst_129 = arith.constant 0.000000e+00 : f32
    %287 = vector.broadcast %cst_129 : f32 to vector<2x16x16xf32>
    %288 = arith.maximumf %286, %287 : vector<2x16x16xf32>
    %c0_130 = arith.constant 0 : index
    %c1_131 = arith.constant 1 : index
    %c0_132 = arith.constant 0 : index
    %c0_133 = arith.constant 0 : index
    %289 = vector.load %arg3[%c0_130, %c1_131, %c0_132, %c0_133] : memref<2x4x16x16xf32, #tpu.memory_space<vmem>>, vector<2x1x16x16xf32>
    %290 = vector.shape_cast %289 : vector<2x1x16x16xf32> to vector<2x16x16xf32>
    %291 = vector.shape_cast %288 : vector<2x16x16xf32> to vector<2x1x16x16xf32>
    tpu.vector_store %arg3[%c0_130, %c1_131, %c0_132, %c0_133], %291 {strides = array<i32>} : memref<2x4x16x16xf32, #tpu.memory_space<vmem>>, vector<2x1x16x16xf32>,
    %cst_134 = arith.constant 0.000000e+00 : f32
    %292 = vector.broadcast %cst_134 : f32 to vector<2x16x16xf32>
    %c54 = arith.constant 54 : index
    %293 = memref.load %arg1[%c54] : memref<108xf32, #tpu.memory_space<smem>>
    %294 = vector.broadcast %293 : f32 to vector<2x16x16xf32>
    %295 = arith.mulf %294, %5 : vector<2x16x16xf32>
    %296 = arith.addf %292, %295 : vector<2x16x16xf32>
    %c55 = arith.constant 55 : index
    %297 = memref.load %arg1[%c55] : memref<108xf32, #tpu.memory_space<smem>>
    %298 = vector.broadcast %297 : f32 to vector<2x16x16xf32>
    %299 = arith.mulf %298, %7 : vector<2x16x16xf32>
    %300 = arith.addf %296, %299 : vector<2x16x16xf32>
    %c56 = arith.constant 56 : index
    %301 = memref.load %arg1[%c56] : memref<108xf32, #tpu.memory_space<smem>>
    %302 = vector.broadcast %301 : f32 to vector<2x16x16xf32>
    %303 = arith.mulf %302, %9 : vector<2x16x16xf32>
    %304 = arith.addf %300, %303 : vector<2x16x16xf32>
    %c57 = arith.constant 57 : index
    %305 = memref.load %arg1[%c57] : memref<108xf32, #tpu.memory_space<smem>>
    %306 = vector.broadcast %305 : f32 to vector<2x16x16xf32>
    %307 = arith.mulf %306, %11 : vector<2x16x16xf32>
    %308 = arith.addf %304, %307 : vector<2x16x16xf32>
    %c58 = arith.constant 58 : index
    %309 = memref.load %arg1[%c58] : memref<108xf32, #tpu.memory_space<smem>>
    %310 = vector.broadcast %309 : f32 to vector<2x16x16xf32>
    %311 = arith.mulf %310, %13 : vector<2x16x16xf32>
    %312 = arith.addf %308, %311 : vector<2x16x16xf32>
    %c59 = arith.constant 59 : index
    %313 = memref.load %arg1[%c59] : memref<108xf32, #tpu.memory_space<smem>>
    %314 = vector.broadcast %313 : f32 to vector<2x16x16xf32>
    %315 = arith.mulf %314, %15 : vector<2x16x16xf32>
    %316 = arith.addf %312, %315 : vector<2x16x16xf32>
    %c60 = arith.constant 60 : index
    %317 = memref.load %arg1[%c60] : memref<108xf32, #tpu.memory_space<smem>>
    %318 = vector.broadcast %317 : f32 to vector<2x16x16xf32>
    %319 = arith.mulf %318, %17 : vector<2x16x16xf32>
    %320 = arith.addf %316, %319 : vector<2x16x16xf32>
    %c61 = arith.constant 61 : index
    %321 = memref.load %arg1[%c61] : memref<108xf32, #tpu.memory_space<smem>>
    %322 = vector.broadcast %321 : f32 to vector<2x16x16xf32>
    %323 = arith.mulf %322, %19 : vector<2x16x16xf32>
    %324 = arith.addf %320, %323 : vector<2x16x16xf32>
    %c62 = arith.constant 62 : index
    %325 = memref.load %arg1[%c62] : memref<108xf32, #tpu.memory_space<smem>>
    %326 = vector.broadcast %325 : f32 to vector<2x16x16xf32>
    %327 = arith.mulf %326, %21 : vector<2x16x16xf32>
    %328 = arith.addf %324, %327 : vector<2x16x16xf32>
    %c63 = arith.constant 63 : index
    %329 = memref.load %arg1[%c63] : memref<108xf32, #tpu.memory_space<smem>>
    %330 = vector.broadcast %329 : f32 to vector<2x16x16xf32>
    %331 = arith.mulf %330, %23 : vector<2x16x16xf32>
    %332 = arith.addf %328, %331 : vector<2x16x16xf32>
    %c64 = arith.constant 64 : index
    %333 = memref.load %arg1[%c64] : memref<108xf32, #tpu.memory_space<smem>>
    %334 = vector.broadcast %333 : f32 to vector<2x16x16xf32>
    %335 = arith.mulf %334, %25 : vector<2x16x16xf32>
    %336 = arith.addf %332, %335 : vector<2x16x16xf32>
    %c65 = arith.constant 65 : index
    %337 = memref.load %arg1[%c65] : memref<108xf32, #tpu.memory_space<smem>>
    %338 = vector.broadcast %337 : f32 to vector<2x16x16xf32>
    %339 = arith.mulf %338, %27 : vector<2x16x16xf32>
    %340 = arith.addf %336, %339 : vector<2x16x16xf32>
    %c66 = arith.constant 66 : index
    %341 = memref.load %arg1[%c66] : memref<108xf32, #tpu.memory_space<smem>>
    %342 = vector.broadcast %341 : f32 to vector<2x16x16xf32>
    %343 = arith.mulf %342, %29 : vector<2x16x16xf32>
    %344 = arith.addf %340, %343 : vector<2x16x16xf32>
    %c67 = arith.constant 67 : index
    %345 = memref.load %arg1[%c67] : memref<108xf32, #tpu.memory_space<smem>>
    %346 = vector.broadcast %345 : f32 to vector<2x16x16xf32>
    %347 = arith.mulf %346, %31 : vector<2x16x16xf32>
    %348 = arith.addf %344, %347 : vector<2x16x16xf32>
    %c68 = arith.constant 68 : index
    %349 = memref.load %arg1[%c68] : memref<108xf32, #tpu.memory_space<smem>>
    %350 = vector.broadcast %349 : f32 to vector<2x16x16xf32>
    %351 = arith.mulf %350, %33 : vector<2x16x16xf32>
    %352 = arith.addf %348, %351 : vector<2x16x16xf32>
    %c69 = arith.constant 69 : index
    %353 = memref.load %arg1[%c69] : memref<108xf32, #tpu.memory_space<smem>>
    %354 = vector.broadcast %353 : f32 to vector<2x16x16xf32>
    %355 = arith.mulf %354, %35 : vector<2x16x16xf32>
    %356 = arith.addf %352, %355 : vector<2x16x16xf32>
    %c70 = arith.constant 70 : index
    %357 = memref.load %arg1[%c70] : memref<108xf32, #tpu.memory_space<smem>>
    %358 = vector.broadcast %357 : f32 to vector<2x16x16xf32>
    %359 = arith.mulf %358, %37 : vector<2x16x16xf32>
    %360 = arith.addf %356, %359 : vector<2x16x16xf32>
    %c71 = arith.constant 71 : index
    %361 = memref.load %arg1[%c71] : memref<108xf32, #tpu.memory_space<smem>>
    %362 = vector.broadcast %361 : f32 to vector<2x16x16xf32>
    %363 = arith.mulf %362, %39 : vector<2x16x16xf32>
    %364 = arith.addf %360, %363 : vector<2x16x16xf32>
    %c72 = arith.constant 72 : index
    %365 = memref.load %arg1[%c72] : memref<108xf32, #tpu.memory_space<smem>>
    %366 = vector.broadcast %365 : f32 to vector<2x16x16xf32>
    %367 = arith.mulf %366, %41 : vector<2x16x16xf32>
    %368 = arith.addf %364, %367 : vector<2x16x16xf32>
    %c73 = arith.constant 73 : index
    %369 = memref.load %arg1[%c73] : memref<108xf32, #tpu.memory_space<smem>>
    %370 = vector.broadcast %369 : f32 to vector<2x16x16xf32>
    %371 = arith.mulf %370, %43 : vector<2x16x16xf32>
    %372 = arith.addf %368, %371 : vector<2x16x16xf32>
    %c74 = arith.constant 74 : index
    %373 = memref.load %arg1[%c74] : memref<108xf32, #tpu.memory_space<smem>>
    %374 = vector.broadcast %373 : f32 to vector<2x16x16xf32>
    %375 = arith.mulf %374, %45 : vector<2x16x16xf32>
    %376 = arith.addf %372, %375 : vector<2x16x16xf32>
    %c75 = arith.constant 75 : index
    %377 = memref.load %arg1[%c75] : memref<108xf32, #tpu.memory_space<smem>>
    %378 = vector.broadcast %377 : f32 to vector<2x16x16xf32>
    %379 = arith.mulf %378, %47 : vector<2x16x16xf32>
    %380 = arith.addf %376, %379 : vector<2x16x16xf32>
    %c76 = arith.constant 76 : index
    %381 = memref.load %arg1[%c76] : memref<108xf32, #tpu.memory_space<smem>>
    %382 = vector.broadcast %381 : f32 to vector<2x16x16xf32>
    %383 = arith.mulf %382, %49 : vector<2x16x16xf32>
    %384 = arith.addf %380, %383 : vector<2x16x16xf32>
    %c77 = arith.constant 77 : index
    %385 = memref.load %arg1[%c77] : memref<108xf32, #tpu.memory_space<smem>>
    %386 = vector.broadcast %385 : f32 to vector<2x16x16xf32>
    %387 = arith.mulf %386, %51 : vector<2x16x16xf32>
    %388 = arith.addf %384, %387 : vector<2x16x16xf32>
    %c78 = arith.constant 78 : index
    %389 = memref.load %arg1[%c78] : memref<108xf32, #tpu.memory_space<smem>>
    %390 = vector.broadcast %389 : f32 to vector<2x16x16xf32>
    %391 = arith.mulf %390, %53 : vector<2x16x16xf32>
    %392 = arith.addf %388, %391 : vector<2x16x16xf32>
    %c79 = arith.constant 79 : index
    %393 = memref.load %arg1[%c79] : memref<108xf32, #tpu.memory_space<smem>>
    %394 = vector.broadcast %393 : f32 to vector<2x16x16xf32>
    %395 = arith.mulf %394, %55 : vector<2x16x16xf32>
    %396 = arith.addf %392, %395 : vector<2x16x16xf32>
    %c80 = arith.constant 80 : index
    %397 = memref.load %arg1[%c80] : memref<108xf32, #tpu.memory_space<smem>>
    %398 = vector.broadcast %397 : f32 to vector<2x16x16xf32>
    %399 = arith.mulf %398, %57 : vector<2x16x16xf32>
    %400 = arith.addf %396, %399 : vector<2x16x16xf32>
    %c2_135 = arith.constant 2 : index
    %401 = memref.load %arg2[%c2_135] : memref<4xf32, #tpu.memory_space<smem>>
    %402 = vector.broadcast %401 : f32 to vector<2x16x16xf32>
    %403 = arith.addf %400, %402 : vector<2x16x16xf32>
    %cst_136 = arith.constant 0.000000e+00 : f32
    %404 = vector.broadcast %cst_136 : f32 to vector<2x16x16xf32>
    %405 = arith.maximumf %403, %404 : vector<2x16x16xf32>
    %c0_137 = arith.constant 0 : index
    %c2_138 = arith.constant 2 : index
    %c0_139 = arith.constant 0 : index
    %c0_140 = arith.constant 0 : index
    %406 = vector.load %arg3[%c0_137, %c2_138, %c0_139, %c0_140] : memref<2x4x16x16xf32, #tpu.memory_space<vmem>>, vector<2x1x16x16xf32>
    %407 = vector.shape_cast %406 : vector<2x1x16x16xf32> to vector<2x16x16xf32>
    %408 = vector.shape_cast %405 : vector<2x16x16xf32> to vector<2x1x16x16xf32>
    tpu.vector_store %arg3[%c0_137, %c2_138, %c0_139, %c0_140], %408 {strides = array<i32>} : memref<2x4x16x16xf32, #tpu.memory_space<vmem>>, vector<2x1x16x16xf32>,
    %cst_141 = arith.constant 0.000000e+00 : f32
    %409 = vector.broadcast %cst_141 : f32 to vector<2x16x16xf32>
    %c81 = arith.constant 81 : index
    %410 = memref.load %arg1[%c81] : memref<108xf32, #tpu.memory_space<smem>>
    %411 = vector.broadcast %410 : f32 to vector<2x16x16xf32>
    %412 = arith.mulf %411, %5 : vector<2x16x16xf32>
    %413 = arith.addf %409, %412 : vector<2x16x16xf32>
    %c82 = arith.constant 82 : index
    %414 = memref.load %arg1[%c82] : memref<108xf32, #tpu.memory_space<smem>>
    %415 = vector.broadcast %414 : f32 to vector<2x16x16xf32>
    %416 = arith.mulf %415, %7 : vector<2x16x16xf32>
    %417 = arith.addf %413, %416 : vector<2x16x16xf32>
    %c83 = arith.constant 83 : index
    %418 = memref.load %arg1[%c83] : memref<108xf32, #tpu.memory_space<smem>>
    %419 = vector.broadcast %418 : f32 to vector<2x16x16xf32>
    %420 = arith.mulf %419, %9 : vector<2x16x16xf32>
    %421 = arith.addf %417, %420 : vector<2x16x16xf32>
    %c84 = arith.constant 84 : index
    %422 = memref.load %arg1[%c84] : memref<108xf32, #tpu.memory_space<smem>>
    %423 = vector.broadcast %422 : f32 to vector<2x16x16xf32>
    %424 = arith.mulf %423, %11 : vector<2x16x16xf32>
    %425 = arith.addf %421, %424 : vector<2x16x16xf32>
    %c85 = arith.constant 85 : index
    %426 = memref.load %arg1[%c85] : memref<108xf32, #tpu.memory_space<smem>>
    %427 = vector.broadcast %426 : f32 to vector<2x16x16xf32>
    %428 = arith.mulf %427, %13 : vector<2x16x16xf32>
    %429 = arith.addf %425, %428 : vector<2x16x16xf32>
    %c86 = arith.constant 86 : index
    %430 = memref.load %arg1[%c86] : memref<108xf32, #tpu.memory_space<smem>>
    %431 = vector.broadcast %430 : f32 to vector<2x16x16xf32>
    %432 = arith.mulf %431, %15 : vector<2x16x16xf32>
    %433 = arith.addf %429, %432 : vector<2x16x16xf32>
    %c87 = arith.constant 87 : index
    %434 = memref.load %arg1[%c87] : memref<108xf32, #tpu.memory_space<smem>>
    %435 = vector.broadcast %434 : f32 to vector<2x16x16xf32>
    %436 = arith.mulf %435, %17 : vector<2x16x16xf32>
    %437 = arith.addf %433, %436 : vector<2x16x16xf32>
    %c88 = arith.constant 88 : index
    %438 = memref.load %arg1[%c88] : memref<108xf32, #tpu.memory_space<smem>>
    %439 = vector.broadcast %438 : f32 to vector<2x16x16xf32>
    %440 = arith.mulf %439, %19 : vector<2x16x16xf32>
    %441 = arith.addf %437, %440 : vector<2x16x16xf32>
    %c89 = arith.constant 89 : index
    %442 = memref.load %arg1[%c89] : memref<108xf32, #tpu.memory_space<smem>>
    %443 = vector.broadcast %442 : f32 to vector<2x16x16xf32>
    %444 = arith.mulf %443, %21 : vector<2x16x16xf32>
    %445 = arith.addf %441, %444 : vector<2x16x16xf32>
    %c90 = arith.constant 90 : index
    %446 = memref.load %arg1[%c90] : memref<108xf32, #tpu.memory_space<smem>>
    %447 = vector.broadcast %446 : f32 to vector<2x16x16xf32>
    %448 = arith.mulf %447, %23 : vector<2x16x16xf32>
    %449 = arith.addf %445, %448 : vector<2x16x16xf32>
    %c91 = arith.constant 91 : index
    %450 = memref.load %arg1[%c91] : memref<108xf32, #tpu.memory_space<smem>>
    %451 = vector.broadcast %450 : f32 to vector<2x16x16xf32>
    %452 = arith.mulf %451, %25 : vector<2x16x16xf32>
    %453 = arith.addf %449, %452 : vector<2x16x16xf32>
    %c92 = arith.constant 92 : index
    %454 = memref.load %arg1[%c92] : memref<108xf32, #tpu.memory_space<smem>>
    %455 = vector.broadcast %454 : f32 to vector<2x16x16xf32>
    %456 = arith.mulf %455, %27 : vector<2x16x16xf32>
    %457 = arith.addf %453, %456 : vector<2x16x16xf32>
    %c93 = arith.constant 93 : index
    %458 = memref.load %arg1[%c93] : memref<108xf32, #tpu.memory_space<smem>>
    %459 = vector.broadcast %458 : f32 to vector<2x16x16xf32>
    %460 = arith.mulf %459, %29 : vector<2x16x16xf32>
    %461 = arith.addf %457, %460 : vector<2x16x16xf32>
    %c94 = arith.constant 94 : index
    %462 = memref.load %arg1[%c94] : memref<108xf32, #tpu.memory_space<smem>>
    %463 = vector.broadcast %462 : f32 to vector<2x16x16xf32>
    %464 = arith.mulf %463, %31 : vector<2x16x16xf32>
    %465 = arith.addf %461, %464 : vector<2x16x16xf32>
    %c95 = arith.constant 95 : index
    %466 = memref.load %arg1[%c95] : memref<108xf32, #tpu.memory_space<smem>>
    %467 = vector.broadcast %466 : f32 to vector<2x16x16xf32>
    %468 = arith.mulf %467, %33 : vector<2x16x16xf32>
    %469 = arith.addf %465, %468 : vector<2x16x16xf32>
    %c96 = arith.constant 96 : index
    %470 = memref.load %arg1[%c96] : memref<108xf32, #tpu.memory_space<smem>>
    %471 = vector.broadcast %470 : f32 to vector<2x16x16xf32>
    %472 = arith.mulf %471, %35 : vector<2x16x16xf32>
    %473 = arith.addf %469, %472 : vector<2x16x16xf32>
    %c97 = arith.constant 97 : index
    %474 = memref.load %arg1[%c97] : memref<108xf32, #tpu.memory_space<smem>>
    %475 = vector.broadcast %474 : f32 to vector<2x16x16xf32>
    %476 = arith.mulf %475, %37 : vector<2x16x16xf32>
    %477 = arith.addf %473, %476 : vector<2x16x16xf32>
    %c98 = arith.constant 98 : index
    %478 = memref.load %arg1[%c98] : memref<108xf32, #tpu.memory_space<smem>>
    %479 = vector.broadcast %478 : f32 to vector<2x16x16xf32>
    %480 = arith.mulf %479, %39 : vector<2x16x16xf32>
    %481 = arith.addf %477, %480 : vector<2x16x16xf32>
    %c99 = arith.constant 99 : index
    %482 = memref.load %arg1[%c99] : memref<108xf32, #tpu.memory_space<smem>>
    %483 = vector.broadcast %482 : f32 to vector<2x16x16xf32>
    %484 = arith.mulf %483, %41 : vector<2x16x16xf32>
    %485 = arith.addf %481, %484 : vector<2x16x16xf32>
    %c100 = arith.constant 100 : index
    %486 = memref.load %arg1[%c100] : memref<108xf32, #tpu.memory_space<smem>>
    %487 = vector.broadcast %486 : f32 to vector<2x16x16xf32>
    %488 = arith.mulf %487, %43 : vector<2x16x16xf32>
    %489 = arith.addf %485, %488 : vector<2x16x16xf32>
    %c101 = arith.constant 101 : index
    %490 = memref.load %arg1[%c101] : memref<108xf32, #tpu.memory_space<smem>>
    %491 = vector.broadcast %490 : f32 to vector<2x16x16xf32>
    %492 = arith.mulf %491, %45 : vector<2x16x16xf32>
    %493 = arith.addf %489, %492 : vector<2x16x16xf32>
    %c102 = arith.constant 102 : index
    %494 = memref.load %arg1[%c102] : memref<108xf32, #tpu.memory_space<smem>>
    %495 = vector.broadcast %494 : f32 to vector<2x16x16xf32>
    %496 = arith.mulf %495, %47 : vector<2x16x16xf32>
    %497 = arith.addf %493, %496 : vector<2x16x16xf32>
    %c103 = arith.constant 103 : index
    %498 = memref.load %arg1[%c103] : memref<108xf32, #tpu.memory_space<smem>>
    %499 = vector.broadcast %498 : f32 to vector<2x16x16xf32>
    %500 = arith.mulf %499, %49 : vector<2x16x16xf32>
    %501 = arith.addf %497, %500 : vector<2x16x16xf32>
    %c104 = arith.constant 104 : index
    %502 = memref.load %arg1[%c104] : memref<108xf32, #tpu.memory_space<smem>>
    %503 = vector.broadcast %502 : f32 to vector<2x16x16xf32>
    %504 = arith.mulf %503, %51 : vector<2x16x16xf32>
    %505 = arith.addf %501, %504 : vector<2x16x16xf32>
    %c105 = arith.constant 105 : index
    %506 = memref.load %arg1[%c105] : memref<108xf32, #tpu.memory_space<smem>>
    %507 = vector.broadcast %506 : f32 to vector<2x16x16xf32>
    %508 = arith.mulf %507, %53 : vector<2x16x16xf32>
    %509 = arith.addf %505, %508 : vector<2x16x16xf32>
    %c106 = arith.constant 106 : index
    %510 = memref.load %arg1[%c106] : memref<108xf32, #tpu.memory_space<smem>>
    %511 = vector.broadcast %510 : f32 to vector<2x16x16xf32>
    %512 = arith.mulf %511, %55 : vector<2x16x16xf32>
    %513 = arith.addf %509, %512 : vector<2x16x16xf32>
    %c107 = arith.constant 107 : index
    %514 = memref.load %arg1[%c107] : memref<108xf32, #tpu.memory_space<smem>>
    %515 = vector.broadcast %514 : f32 to vector<2x16x16xf32>
    %516 = arith.mulf %515, %57 : vector<2x16x16xf32>
    %517 = arith.addf %513, %516 : vector<2x16x16xf32>
    %c3_142 = arith.constant 3 : index
    %518 = memref.load %arg2[%c3_142] : memref<4xf32, #tpu.memory_space<smem>>
    %519 = vector.broadcast %518 : f32 to vector<2x16x16xf32>
    %520 = arith.addf %517, %519 : vector<2x16x16xf32>
    %cst_143 = arith.constant 0.000000e+00 : f32
    %521 = vector.broadcast %cst_143 : f32 to vector<2x16x16xf32>
    %522 = arith.maximumf %520, %521 : vector<2x16x16xf32>
    %c0_144 = arith.constant 0 : index
    %c3_145 = arith.constant 3 : index
    %c0_146 = arith.constant 0 : index
    %c0_147 = arith.constant 0 : index
    %523 = vector.load %arg3[%c0_144, %c3_145, %c0_146, %c0_147] : memref<2x4x16x16xf32, #tpu.memory_space<vmem>>, vector<2x1x16x16xf32>
    %524 = vector.shape_cast %523 : vector<2x1x16x16xf32> to vector<2x16x16xf32>
    %525 = vector.shape_cast %522 : vector<2x16x16xf32> to vector<2x1x16x16xf32>
    tpu.vector_store %arg3[%c0_144, %c3_145, %c0_146, %c0_147], %525 {strides = array<i32>} : memref<2x4x16x16xf32, #tpu.memory_space<vmem>>, vector<2x1x16x16xf32>,
    return
  }
}

</mosaic_0001>

<bundles_post_ra>
// kernel: tpu_custom_call.1
= control target key start
LH: loop header
LB: loop body
LE: loop exit
PB: predicated region body
PF: predicated region fallthrough
CT: control target
= control target key end

     0   :  { %8 = vsyncpa [#allocation4], 0  ;;  %s4258_s0 = inlined_call_operand.hbm [shape: f32[2,3,16,16], index: 0, kind: input, shape index: {}]   ;;  %s4259_s1 = inlined_call_operand.hbm [shape: f32[108], index: 1, kind: input, shape index: {}]   ;;  %s4260_s2 = inlined_call_operand.vmem [shape: f32[4], index: 2, kind: input, shape index: {}]   ;;  %s4261_s3 = inlined_call_operand.hbm [shape: f32[2,4,16,16], index: 3, kind: output, shape index: {}]  }
   0x1   :  { %9 = vsyncpa [#allocation6], 0 }
   0x2   :  { %10 = vsyncpa [#allocation7], 0 }
   0x3   :  { %11 = vsyncpa [#allocation5], 0  ;;  %s16_s14 = sshll.u32 %s4258_s0, 4  ;;  %s2772_s15 = smov [#allocation3]   ;;  %s17_s14 = int_to_ptr.hbm [resolvable:$true] %s16_s14 }
   0x4   :  { %s18_s16 = sshll.u32 %s2772_s15, 4  ;;  %s30_s19 = sshll.u32 %s4259_s1, 4  ;;  %s19_s16 = int_to_ptr.vmem [resolvable:$true] %s18_s16  ;;  %s31_s19 = int_to_ptr.hbm [resolvable:$true] %s30_s19 }
   0x5   :  { %s2773_s20 = smov 128   ;;  %s2774_s21 = smov 8  }
   0x6   :  { %24 = dma.hbm_to_vmem [thread:$0]  %s17_s14, 1536, %s19_s16, [#allocation4], %s2773_s20, %s2773_s20, %s2774_s21  }
   0x7   :  { %s2775_s22 = smov [#allocation8]   ;;  %s39_s0 = sshll.u32 %s4260_s2, 4  ;;  %s40_s0 = int_to_ptr.vmem [resolvable:$true] %s39_s0 }
   0x8   :  { %33 = dma.hbm_to_smem %s31_s19, 16, %s2775_s22, [#allocation6]  }
   0x9   :  { %s2776_s25 = smov [#allocation9]  }
   0xa   :  { %42 = dma.vmem_to_smem %s40_s0, 16, %s2776_s25, [#allocation7]  }
   0xb   :  { %2764 = dma.done.wait [#allocation4], 1536  }
   0xc   :  { %2765 = vsyncadd [#allocation4], 4294965760 }
   0xd   :  { %2766 = dma.done.wait [#allocation6], 16  }
   0xe   :  { %2767 = vsyncadd [#allocation6], 4294967280 }
   0xf   :  { %2768 = dma.done.wait [#allocation7], 16  }
  0x10   :  { %2769 = vsyncadd [#allocation7], 4294967280 }
  0x11   :  { %55 = sfence }
  0x12   :  { %v78_v0 = vld [vmem:[#allocation3 + $0x10] sm:$0xff]  ;;  %v76_v1 = vld [vmem:[#allocation3] sm:$0xff]  ;;  %s2777_s1 = smov 1   ;;  %v79_v3 = vld [vmem:[#allocation3 + $0x18] sm:$0xff]  ;;  %vm56_vm0 = vcmask 146432   ;;  %v2778_v10 = vmov 0.0  }
  0x13   :  { %104 = vrot.lane.b32.xlu1 %v78_v0, %s2777_s1  ;;  %100 = vrot.lane.b32.xlu0 %v76_v1, %s2777_s1  ;;  %v80_v2 = vld [vmem:[#allocation3 + $0x20] sm:$0xff]  ;;  %v77_v4 = vld [vmem:[#allocation3 + $0x8] sm:$0xff]  ;;  %v83_v6 = vld [vmem:[#allocation3 + $0x38] sm:$0xff]  ;;  %61 = vst.msk [vmem:[#allocation2 + $0x18] sm:$0xff] %vm56_vm0, %v2778_v10  ;;  %vm59_vm1 = vcmask 140288   ;;  %vm136_vm2 = vcmask 138248  }
  0x14   :  { %108 = vrot.lane.b32.xlu2 %v80_v2, %s2777_s1  ;;  %v81_v5 = vld [vmem:[#allocation3 + $0x28] sm:$0xff]  ;;  %v82_v7 = vld [vmem:[#allocation3 + $0x30] sm:$0xff]  ;;  %v84_v8 = vld [vmem:[#allocation3 + $0x40] sm:$0xff]  ;;  %62 = vst.msk [vmem:[#allocation2 + $0x20] sm:$0xff] %vm56_vm0, %v2778_v10  ;;  %s2500_s2 = sld [smem:[#allocation8 + $0x1]]  ;;  %s2779_s26 = smov 127  }
  0x15   :  { %v85_v9 = vld [vmem:[#allocation3 + $0x48] sm:$0xff]  ;;  %57 = vst.msk [vmem:[#allocation2] sm:$0xff] %vm56_vm0, %v2778_v10  ;;  %v86_v11 = vld [vmem:[#allocation3 + $0x50] sm:$0xff]  ;;  %v87_v12 = vld [vmem:[#allocation3 + $0x58] sm:$0xff]  ;;  %s2501_s27 = sld [smem:[#allocation8 + $0x2]]  ;;  %s2780_s28 = smov 126  }
  0x16   :  { %58 = vst.msk [vmem:[#allocation2 + $0x8] sm:$0xff] %vm56_vm0, %v2778_v10  ;;  %s2503_s29 = sld [smem:[#allocation8 + $0x4]]  ;;  %vm755_vm3 = vcmask 130048  }
  0x17   :  { %64 = vst.msk [vmem:[#allocation2 + $0x30] sm:$0xff] %vm56_vm0, %v2778_v10  ;;  %s2504_s30 = sld [smem:[#allocation8 + $0x5]] }
  0x18   :  { %65 = vst.msk [vmem:[#allocation2 + $0x38] sm:$0xff] %vm56_vm0, %v2778_v10  ;;  %s2506_s4 = sld [smem:[#allocation8 + $0x7]] }
  0x19   :  { %67 = vst.msk [vmem:[#allocation2 + $0x48] sm:$0xff] %vm56_vm0, %v2778_v10  ;;  %s2507_s5 = sld [smem:[#allocation8 + $0x8]] }
  0x1a   :  { %68 = vst.msk [vmem:[#allocation2 + $0x50] sm:$0xff] %vm56_vm0, %v2778_v10  ;;  %v198_v15 = vstv %s2500_s2  ;;  %s2509_s6 = sld [smem:[#allocation8 + $0xa]] }
  0x1b   :  { %106 = vrot.lane.b32.xlu1 %v79_v3, %s2777_s1  ;;  %102 = vrot.lane.b32.xlu0 %v77_v4, %s2777_s1  ;;  %70 = vst.msk [vmem:[#allocation2 + $0x60] sm:$0xff] %vm56_vm0, %v2778_v10  ;;  %v224_v25 = vstv %s2501_s27  ;;  %s2510_s7 = sld [smem:[#allocation8 + $0xb]] }
  0x1c   :  { %110 = vrot.lane.b32.xlu2 %v81_v5, %s2777_s1  ;;  %71 = vst.msk [vmem:[#allocation2 + $0x68] sm:$0xff] %vm56_vm0, %v2778_v10  ;;  %v260_v37 = vstv %s2503_s29  ;;  %s2512_s8 = sld [smem:[#allocation8 + $0xd]] }
  0x1d   :  { %73 = vst.msk [vmem:[#allocation2 + $0x78] sm:$0xff] %vm56_vm0, %v2778_v10  ;;  %v286_v45 = vstv %s2504_s30  ;;  %s2513_s9 = sld [smem:[#allocation8 + $0xe]] }
  0x1e   :  { %74 = vst.msk [vmem:[#allocation2 + $0x80] sm:$0xff] %vm56_vm0, %v2778_v10  ;;  %v322_v50 = vstv %s2506_s4  ;;  %s2515_s10 = sld [smem:[#allocation8 + $0x10]] }
  0x1f   :  { %63 = vst.msk [vmem:[#allocation2 + $0x28] sm:$0x3] %vm59_vm1, %v2778_v10  ;;  %v348_v60 = vstv %s2507_s5  ;;  %s2516_s11 = sld [smem:[#allocation8 + $0x11]] }
  0x20   :  { %60 = vst.msk [vmem:[#allocation2 + $0x10] sm:$0x3] %vm59_vm1, %v2778_v10  ;;  %v384_v3 = vstv %s2509_s6  ;;  %s2518_s12 = sld [smem:[#allocation8 + $0x13]] }
  0x21   :  { %66 = vst.msk [vmem:[#allocation2 + $0x40] sm:$0x3] %vm59_vm1, %v2778_v10  ;;  %s2519_s13 = sld [smem:[#allocation8 + $0x14]] }
  0x22   :  { %69 = vst.msk [vmem:[#allocation2 + $0x58] sm:$0x3] %vm59_vm1, %v2778_v10  ;;  %s2521_s14 = sld [smem:[#allocation8 + $0x16]] }
  0x23   :  { %114 = vrot.lane.b32.xlu1 %v83_v6, %s2777_s1  ;;  %112 = vrot.lane.b32.xlu0 %v82_v7, %s2777_s1  ;;  %72 = vst.msk [vmem:[#allocation2 + $0x70] sm:$0x3] %vm59_vm1, %v2778_v10  ;;  %s2522_s15 = sld [smem:[#allocation8 + $0x17]] }
  0x24   :  { %116 = vrot.lane.b32.xlu2 %v84_v8, %s2777_s1  ;;  %75 = vst.msk [vmem:[#allocation2 + $0x88] sm:$0x3] %vm59_vm1, %v2778_v10  ;;  %s2524_s16 = sld [smem:[#allocation8 + $0x19]] }
  0x25   :  { %s2525_s17 = sld [smem:[#allocation8 + $0x1a]] }
  0x26   :  { %s2527_s18 = sld [smem:[#allocation8 + $0x1c]] }
  0x27   :  { %s2528_s19 = sld [smem:[#allocation8 + $0x1d]] }
  0x28   :  { %s187_s22 = sld [smem:[#allocation8]] }
  0x29   :  { %s2502_s23 = sld [smem:[#allocation8 + $0x3]] }
  0x2a   :  { %s2530_s24 = sld [smem:[#allocation8 + $0x1f]] }
  0x2b   :  { %118 = vrot.lane.b32.xlu0 %v85_v9, %s2777_s1  ;;  %120 = vrot.lane.b32.xlu1 %v86_v11, %s2777_s1  ;;  %v410_v9 = vstv %s2510_s7  ;;  %s2505_s0 = sld [smem:[#allocation8 + $0x6]] }
  0x2c   :  { %122 = vrot.lane.b32.xlu2 %v87_v12, %s2777_s1  ;;  %s2531_s25 = sld [smem:[#allocation8 + $0x20]] }
  0x2d   :  { %s2533_s1 = sld [smem:[#allocation8 + $0x22]] }
  0x2e   :  { %s2508_s2 = sld [smem:[#allocation8 + $0x9]] }
  0x2f   :  { %s2511_s27 = sld [smem:[#allocation8 + $0xc]] }
  0x30   :  { %s2534_s29 = sld [smem:[#allocation8 + $0x23]] }
  0x31   :  { %s2514_s30 = sld [smem:[#allocation8 + $0xf]] }
  0x32   :  { %s2536_s4 = sld [smem:[#allocation8 + $0x25]] }
  0x33   :  { %s2517_s5 = sld [smem:[#allocation8 + $0x12]] }
  0x34   :  { %s2537_s6 = sld [smem:[#allocation8 + $0x26]] }
  0x35   :  { %s2520_s7 = sld [smem:[#allocation8 + $0x15]] }
  0x6e   :  { %v109_v24 = vpop.permute.xlu2 %108 }
  0x6f   :  { %141 = vst.msk [vmem:[#allocation2 + $0x31] sm:$0xff] %vm136_vm2, %v109_v24 }
  0x76   :  { %v111_v31 = vpop.permute.xlu2 %110 }
  0x77   :  { %142 = vst.msk [vmem:[#allocation2 + $0x39] sm:$0xff] %vm136_vm2, %v111_v31 }
  0x7e   :  { %v117_v42 = vpop.permute.xlu2 %116 }
  0x7f   :  { %145 = vst.msk [vmem:[#allocation2 + $0x61] sm:$0xff] %vm136_vm2, %v117_v42 }
  0x85   :  { %v105_v13 = vpop.permute.xlu1 %104  ;;  %v101_v14 = vpop.permute.xlu0 %100 }
  0x86   :  { %139 = vst.msk [vmem:[#allocation2 + $0x19] sm:$0xff] %vm136_vm2, %v105_v13  ;;  %v123_v1 = vpop.permute.xlu2 %122  ;;  %v2916_v7 = vld [vmem:[#allocation2 + $0x60] sm:$0xff] }
  0x87   :  { %137 = vst.msk [vmem:[#allocation2 + $0x1] sm:$0xff] %vm136_vm2, %v101_v14  ;;  %v387_v10 = vmul.f32 %v384_v3, %v2916_v7 }
  0x88   :  { %148 = vst.msk [vmem:[#allocation2 + $0x81] sm:$0xff] %vm136_vm2, %v123_v1 }
  0x8d   :  { %v107_v16 = vpop.permute.xlu1 %106  ;;  %v103_v17 = vpop.permute.xlu0 %102  ;;  %v2908_v2 = vld [vmem:[#allocation2 + $0x18] sm:$0xff] }
  0x8e   :  { %v2828_v18 = vld [vmem:[#allocation2] sm:$0xff]  ;;  %140 = vst.msk [vmem:[#allocation2 + $0x21] sm:$0xff] %vm136_vm2, %v107_v16  ;;  %v385_v6 = vmul.f32 %v384_v3, %v2908_v2  ;;  %v411_v12 = vmul.f32 %v410_v9, %v2908_v2  ;;  %v413_v16 = vmul.f32 %v410_v9, %v2916_v7 }
  0x8f   :  { %138 = vst.msk [vmem:[#allocation2 + $0x9] sm:$0xff] %vm136_vm2, %v103_v17  ;;  %v199_v19 = vmul.f32 %v198_v15, %v2828_v18  ;;  %v225_v29 = vmul.f32 %v224_v25, %v2828_v18  ;;  %v2858_v35 = vld [vmem:[#allocation2 + $0x1] sm:$0xff]  ;;  %v2934_v17 = vld [vmem:[#allocation2 + $0x19] sm:$0xff] }
  0x90   :  { %v261_v39 = vmul.f32 %v260_v37, %v2858_v35  ;;  %v287_v48 = vmul.f32 %v286_v45, %v2858_v35 }
  0x91   :  { %207 = vrot.lane.b32.xlu0 %v199_v19, %s2779_s26  ;;  %v2936_v19 = vld [vmem:[#allocation2 + $0x61] sm:$0xff] }
  0x92   :  { %4298 = vst [vmem:[#allocation15_spill] sm:$0xff] %v2936_v19 }
  0x95   :  { %v115_v20 = vpop.permute.xlu1 %114  ;;  %v113_v21 = vpop.permute.xlu0 %112  ;;  %v2906_v0 = vld [vmem:[#allocation2 + $0x20] sm:$0xff] }
  0x96   :  { %v2834_v22 = vld [vmem:[#allocation2 + $0x8] sm:$0xff]  ;;  %144 = vst.msk [vmem:[#allocation2 + $0x51] sm:$0xff] %vm136_vm2, %v115_v20  ;;  %v386_v5 = vmul.f32 %v384_v3, %v2906_v0  ;;  %v412_v14 = vmul.f32 %v410_v9, %v2906_v0  ;;  %v446_v20 = vstv %s2512_s8  ;;  %s2539_s8 = sld [smem:[#allocation8 + $0x28]] }
  0x97   :  { %143 = vst.msk [vmem:[#allocation2 + $0x49] sm:$0xff] %vm136_vm2, %v113_v21  ;;  %v200_v23 = vmul.f32 %v198_v15, %v2834_v22  ;;  %v226_v32 = vmul.f32 %v224_v25, %v2834_v22  ;;  %v2862_v38 = vld [vmem:[#allocation2 + $0x9] sm:$0xff]  ;;  %v2938_v21 = vld [vmem:[#allocation2 + $0x21] sm:$0xff]  ;;  %v449_v24 = vmul.f32 %v446_v20, %v2936_v19 }
  0x98   :  { %v262_v41 = vmul.f32 %v260_v37, %v2862_v38  ;;  %v288_v47 = vmul.f32 %v286_v45, %v2862_v38  ;;  %v2880_v49 = vld [vmem:[#allocation2 + $0x2] sm:$0xff]  ;;  %v2888_v54 = vld [vmem:[#allocation2 + $0xa] sm:$0xff]  ;;  %4299 = vst [vmem:[#allocation16_spill] sm:$0xff] %v2938_v21 }
  0x99   :  { %209 = vrot.lane.b32.xlu1 %v200_v23, %s2779_s26  ;;  %v323_v52 = vmul.f32 %v322_v50, %v2880_v49  ;;  %v324_v57 = vmul.f32 %v322_v50, %v2888_v54  ;;  %v349_v61 = vmul.f32 %v348_v60, %v2880_v49  ;;  %v350_v63 = vmul.f32 %v348_v60, %v2888_v54 }
  0x9a   :  { %v447_v23 = vmul.f32 %v446_v20, %v2934_v17 }
  0x9d   :  { %v119_v43 = vpop.permute.xlu0 %118  ;;  %v2871_v44 = vld [vmem:[#allocation2 + $0x51] sm:$0xff]  ;;  %v121_v13 = vpop.permute.xlu1 %120 }
  0x9e   :  { %v2841_v26 = vld [vmem:[#allocation2 + $0x48] sm:$0xff]  ;;  %v2843_v27 = vld [vmem:[#allocation2 + $0x50] sm:$0xff]  ;;  %146 = vst.msk [vmem:[#allocation2 + $0x69] sm:$0xff] %vm136_vm2, %v119_v43  ;;  %v264_v46 = vmul.f32 %v260_v37, %v2871_v44  ;;  %v290_v53 = vmul.f32 %v286_v45, %v2871_v44 }
  0x9f   :  { %v201_v28 = vmul.f32 %v198_v15, %v2841_v26  ;;  %v202_v30 = vmul.f32 %v198_v15, %v2843_v27  ;;  %v228_v33 = vmul.f32 %v224_v25, %v2843_v27  ;;  %v227_v34 = vmul.f32 %v224_v25, %v2841_v26  ;;  %v2860_v36 = vld [vmem:[#allocation2 + $0x49] sm:$0xff]  ;;  %v2890_v55 = vld [vmem:[#allocation2 + $0x52] sm:$0xff]  ;;  %147 = vst.msk [vmem:[#allocation2 + $0x79] sm:$0xff] %vm136_vm2, %v121_v13 }
  0xa0   :  { %v263_v40 = vmul.f32 %v260_v37, %v2860_v36  ;;  %v289_v51 = vmul.f32 %v286_v45, %v2860_v36  ;;  %v2892_v56 = vld [vmem:[#allocation2 + $0x4a] sm:$0xff]  ;;  %v326_v58 = vmul.f32 %v322_v50, %v2890_v55  ;;  %v352_v4 = vmul.f32 %v348_v60, %v2890_v55  ;;  %v2966_v43 = vld [vmem:[#allocation2 + $0x22] sm:$0xff] }
  0xa1   :  { %211 = vrot.lane.b32.xlu2 %v201_v28, %s2779_s26  ;;  %233 = vrot.lane.b32.xlu1 %v225_v29, %s2780_s28  ;;  %v325_v59 = vmul.f32 %v322_v50, %v2892_v56  ;;  %v351_v62 = vmul.f32 %v348_v60, %v2892_v56  ;;  %v448_v25 = vmul.f32 %v446_v20, %v2938_v21  ;;  %v472_v29 = vstv %s2513_s9  ;;  %s2523_s9 = sld [smem:[#allocation8 + $0x18]] }
  0xa2   :  { %213 = vrot.lane.b32.xlu0 %v202_v30, %s2779_s26  ;;  %v474_v31 = vmul.f32 %v472_v29, %v2938_v21  ;;  %v508_v37 = vstv %s2515_s10  ;;  %4300 = vst [vmem:[#allocation17_spill] sm:$0xff] %v2966_v43  ;;  %s2540_s10 = sld [smem:[#allocation8 + $0x29]] }
  0xa5   :  { %v2919_v8 = vld [vmem:[#allocation2 + $0x68] sm:$0xff] }
  0xa6   :  { %v388_v11 = vmul.f32 %v384_v3, %v2919_v8  ;;  %v414_v15 = vmul.f32 %v410_v9, %v2919_v8  ;;  %v2946_v28 = vld [vmem:[#allocation2 + $0x69] sm:$0xff]  ;;  %v570_v3 = vstv %s2518_s12  ;;  %s2542_s12 = sld [smem:[#allocation8 + $0x2b]] }
  0xa7   :  { %v450_v30 = vmul.f32 %v446_v20, %v2946_v28  ;;  %v2968_v45 = vld [vmem:[#allocation2 + $0x6a] sm:$0xff] }
  0xa8   :  { %4301 = vst [vmem:[#allocation18_spill] sm:$0xff] %v2968_v45 }
  0xa9   :  { %235 = vrot.lane.b32.xlu2 %v226_v32, %s2780_s28  ;;  %239 = vrot.lane.b32.xlu1 %v228_v33, %s2780_s28  ;;  %v473_v32 = vmul.f32 %v472_v29, %v2934_v17 }
  0xaa   :  { %237 = vrot.lane.b32.xlu0 %v227_v34, %s2780_s28  ;;  %v2956_v34 = vld [vmem:[#allocation2 + $0x1a] sm:$0xff] }
  0xb1   :  { %269 = vrot.lane.b32.xlu2 %v261_v39, %s2779_s26  ;;  %273 = vrot.lane.b32.xlu1 %v263_v40, %s2779_s26  ;;  %v475_v39 = vmul.f32 %v472_v29, %v2936_v19  ;;  %v509_v40 = vmul.f32 %v508_v37, %v2956_v34 }
  0xb2   :  { %271 = vrot.lane.b32.xlu0 %v262_v41, %s2779_s26  ;;  %v476_v41 = vmul.f32 %v472_v29, %v2946_v28 }
  0xb9   :  { %275 = vrot.lane.b32.xlu2 %v264_v46, %s2779_s26  ;;  %297 = vrot.lane.b32.xlu1 %v288_v47, %s2780_s28  ;;  %v2970_v46 = vld [vmem:[#allocation2 + $0x62] sm:$0xff]  ;;  %v510_v47 = vmul.f32 %v508_v37, %v2966_v43 }
  0xba   :  { %295 = vrot.lane.b32.xlu0 %v287_v48, %s2780_s28  ;;  %4302 = vst [vmem:[#allocation19_spill] sm:$0xff] %v2970_v46  ;;  %v512_v48 = vmul.f32 %v508_v37, %v2968_v45  ;;  %v511_v50 = vmul.f32 %v508_v37, %v2970_v46 }
  0xc1   :  { %299 = vrot.lane.b32.xlu2 %v289_v51, %s2780_s28  ;;  %331 = vrot.lane.b32.xlu1 %v323_v52, %s2779_s26 }
  0xc2   :  { %301 = vrot.lane.b32.xlu0 %v290_v53, %s2780_s28 }
  0xc9   :  { %333 = vrot.lane.b32.xlu2 %v324_v57, %s2779_s26  ;;  %337 = vrot.lane.b32.xlu1 %v326_v58, %s2779_s26  ;;  %v534_v57 = vstv %s2516_s11  ;;  %s745_s11 = sld [smem:[#allocation9]] }
  0xca   :  { %335 = vrot.lane.b32.xlu0 %v325_v59, %s2779_s26  ;;  %v535_v58 = vmul.f32 %v534_v57, %v2956_v34  ;;  %v537_v59 = vmul.f32 %v534_v57, %v2970_v46  ;;  %v536_v60 = vmul.f32 %v534_v57, %v2966_v43  ;;  %v771_v43 = vstv %s2527_s18  ;;  %s2551_s18 = sld [smem:[#allocation8 + $0x34]] }
  0xd1   :  { %357 = vrot.lane.b32.xlu2 %v349_v61, %s2780_s28  ;;  %361 = vrot.lane.b32.xlu1 %v351_v62, %s2780_s28 }
  0xd2   :  { %359 = vrot.lane.b32.xlu0 %v350_v63, %s2780_s28  ;;  %v2994_v63 = vld [vmem:[#allocation2 + $0x38] sm:$0xff] }
  0xd3   :  { %4303 = vst [vmem:[#allocation20_spill] sm:$0xff] %v2994_v63 }
  0xd9   :  { %363 = vrot.lane.b32.xlu2 %v352_v4, %s2780_s28  ;;  %395 = vrot.lane.b32.xlu1 %v386_v5, %s2779_s26  ;;  %v2998_v4 = vld [vmem:[#allocation2 + $0x30] sm:$0xff]  ;;  %v538_v5 = vmul.f32 %v534_v57, %v2968_v45  ;;  %v775_v45 = vmul.f32 %v771_v43, %v2843_v27 }
  0xda   :  { %393 = vrot.lane.b32.xlu0 %v385_v6, %s2779_s26  ;;  %4304 = vst [vmem:[#allocation21_spill] sm:$0xff] %v2998_v4  ;;  %v572_v6 = vmul.f32 %v570_v3, %v2994_v63  ;;  %v571_v9 = vmul.f32 %v570_v3, %v2998_v4 }
  0xe1   :  { %397 = vrot.lane.b32.xlu2 %v387_v10, %s2779_s26  ;;  %419 = vrot.lane.b32.xlu1 %v411_v12, %s2780_s28  ;;  %v3010_v12 = vld [vmem:[#allocation2 + $0x78] sm:$0xff] }
  0xe2   :  { %399 = vrot.lane.b32.xlu0 %v388_v11, %s2779_s26  ;;  %4305 = vst [vmem:[#allocation22_spill] sm:$0xff] %v3010_v12 }
  0xe9   :  { %421 = vrot.lane.b32.xlu2 %v412_v14, %s2780_s28  ;;  %425 = vrot.lane.b32.xlu1 %v414_v15, %s2780_s28  ;;  %v596_v14 = vstv %s2519_s13  ;;  %v3014_v15 = vld [vmem:[#allocation2 + $0x80] sm:$0xff]  ;;  %s2543_s13 = sld [smem:[#allocation8 + $0x2c]] }
  0xea   :  { %423 = vrot.lane.b32.xlu0 %v413_v16, %s2780_s28  ;;  %4306 = vst [vmem:[#allocation23_spill] sm:$0xff] %v3014_v15  ;;  %v573_v16 = vmul.f32 %v570_v3, %v3010_v12  ;;  %v597_v20 = vmul.f32 %v596_v14, %v2998_v4  ;;  %v797_v4 = vstv %s2528_s19  ;;  %s2552_s19 = sld [smem:[#allocation8 + $0x35]] }
  0xeb   :  { %v799_v21 = vmul.f32 %v797_v4, %v2834_v22 }
  0xf1   :  { %455 = vrot.lane.b32.xlu2 %v447_v23, %s2779_s26  ;;  %459 = vrot.lane.b32.xlu1 %v449_v24, %s2779_s26  ;;  %v574_v23 = vmul.f32 %v570_v3, %v3014_v15 }
  0xf2   :  { %457 = vrot.lane.b32.xlu0 %v448_v25, %s2779_s26 }
  0xf9   :  { %461 = vrot.lane.b32.xlu2 %v450_v30, %s2779_s26  ;;  %483 = vrot.lane.b32.xlu1 %v474_v31, %s2780_s28  ;;  %v598_v30 = vmul.f32 %v596_v14, %v2994_v63  ;;  %v600_v31 = vmul.f32 %v596_v14, %v3014_v15  ;;  %v720_v15 = vstv %s2525_s17  ;;  %s2549_s17 = sld [smem:[#allocation8 + $0x32]] }
  0xfa   :  { %481 = vrot.lane.b32.xlu0 %v473_v32, %s2780_s28  ;;  %v599_v32 = vmul.f32 %v596_v14, %v3010_v12 }
  0xfb   :  { %v2954_v33 = vpop.permute.xlu2 %211 }
 0x101   :  { %485 = vrot.lane.b32.xlu2 %v475_v39, %s2780_s28  ;;  %517 = vrot.lane.b32.xlu1 %v509_v40, %s2779_s26  ;;  %v3038_v40 = vld [vmem:[#allocation2 + $0x31] sm:$0xff] }
 0x102   :  { %487 = vrot.lane.b32.xlu0 %v476_v41, %s2780_s28  ;;  %4307 = vst [vmem:[#allocation24_spill] sm:$0xff] %v3038_v40  ;;  %v3040_v41 = vld [vmem:[#allocation2 + $0x79] sm:$0xff] }
 0x103   :  { %v2964_v42 = vpop.permute.xlu2 %235  ;;  %v2982_v53 = vpop.permute.xlu0 %207  ;;  %4308 = vst [vmem:[#allocation25_spill] sm:$0xff] %v3040_v41 }
 0x109   :  { %519 = vrot.lane.b32.xlu2 %v510_v47, %s2779_s26  ;;  %523 = vrot.lane.b32.xlu1 %v512_v48, %s2779_s26  ;;  %v632_v48 = vstv %s2521_s14  ;;  %s2545_s14 = sld [smem:[#allocation8 + $0x2e]] }
 0x10a   :  { %521 = vrot.lane.b32.xlu0 %v511_v50, %s2779_s26  ;;  %v3044_v50 = vld [vmem:[#allocation2 + $0x39] sm:$0xff]  ;;  %v633_v57 = vmul.f32 %v632_v48, %v3038_v40 }
 0x10b   :  { %v2978_v51 = vpop.permute.xlu2 %269  ;;  %v2980_v52 = vpop.permute.xlu1 %209  ;;  %4309 = vst [vmem:[#allocation26_spill] sm:$0xff] %v3044_v50 }
 0x111   :  { %543 = vrot.lane.b32.xlu2 %v535_v58, %s2780_s28  ;;  %547 = vrot.lane.b32.xlu1 %v537_v59, %s2780_s28  ;;  %v635_v58 = vmul.f32 %v632_v48, %v3040_v41  ;;  %v634_v59 = vmul.f32 %v632_v48, %v3044_v50 }
 0x112   :  { %545 = vrot.lane.b32.xlu0 %v536_v60, %s2780_s28 }
 0x113   :  { %v2990_v61 = vpop.permute.xlu2 %275  ;;  %v2992_v62 = vpop.permute.xlu1 %233 }
 0x114   :  { %v2996_v1 = vpop.permute.xlu0 %213 }
 0x119   :  { %549 = vrot.lane.b32.xlu2 %v538_v5, %s2780_s28  ;;  %581 = vrot.lane.b32.xlu1 %v572_v6, %s2779_s26  ;;  %v3056_v5 = vld [vmem:[#allocation2 + $0x81] sm:$0xff] }
 0x11a   :  { %579 = vrot.lane.b32.xlu0 %v571_v9, %s2779_s26  ;;  %4310 = vst [vmem:[#allocation27_spill] sm:$0xff] %v3056_v5  ;;  %v658_v9 = vstv %s2522_s15  ;;  %v636_v14 = vmul.f32 %v632_v48, %v3056_v5  ;;  %s2546_s15 = sld [smem:[#allocation8 + $0x2f]] }
 0x11b   :  { %v3006_v10 = vpop.permute.xlu2 %299  ;;  %v3008_v11 = vpop.permute.xlu1 %239  ;;  %v661_v48 = vmul.f32 %v658_v9, %v3040_v41  ;;  %v3090_v41 = vld [vmem:[#allocation2 + $0x7a] sm:$0xff] }
 0x11c   :  { %v3012_v13 = vpop.permute.xlu0 %237  ;;  %4315 = vst [vmem:[#allocation32_spill] sm:$0xff] %v3090_v41  ;;  %v723_v46 = vmul.f32 %v720_v15, %v3090_v41 }
 0x121   :  { %583 = vrot.lane.b32.xlu2 %v573_v16, %s2779_s26  ;;  %605 = vrot.lane.b32.xlu1 %v597_v20, %s2780_s28  ;;  %v660_v16 = vmul.f32 %v658_v9, %v3044_v50  ;;  %v659_v20 = vmul.f32 %v658_v9, %v3038_v40  ;;  %v3086_v50 = vld [vmem:[#allocation2 + $0x82] sm:$0xff] }
 0x122   :  { %585 = vrot.lane.b32.xlu0 %v574_v23, %s2779_s26  ;;  %4314 = vst [vmem:[#allocation31_spill] sm:$0xff] %v3086_v50 }
 0x123   :  { %v3022_v24 = vpop.permute.xlu2 %333  ;;  %v3024_v25 = vpop.permute.xlu1 %273 }
 0x124   :  { %v3026_v29 = vpop.permute.xlu0 %271 }
 0x129   :  { %607 = vrot.lane.b32.xlu2 %v598_v30, %s2780_s28  ;;  %611 = vrot.lane.b32.xlu1 %v600_v31, %s2780_s28  ;;  %v3070_v31 = vld [vmem:[#allocation2 + $0x32] sm:$0xff] }
 0x12a   :  { %609 = vrot.lane.b32.xlu0 %v599_v32, %s2780_s28  ;;  %4311 = vst [vmem:[#allocation28_spill] sm:$0xff] %v3070_v31  ;;  %v721_v40 = vmul.f32 %v720_v15, %v3070_v31 }
 0x12b   :  { %v3034_v37 = vpop.permute.xlu2 %357  ;;  %v3036_v39 = vpop.permute.xlu1 %297 }
 0x12c   :  { %v3042_v47 = vpop.permute.xlu0 %295 }
 0x131   :  { %641 = vrot.lane.b32.xlu2 %v633_v57, %s2779_s26  ;;  %645 = vrot.lane.b32.xlu1 %v635_v58, %s2779_s26  ;;  %v694_v57 = vstv %s2524_s16  ;;  %s2548_s16 = sld [smem:[#allocation8 + $0x31]] }
 0x132   :  { %643 = vrot.lane.b32.xlu0 %v634_v59, %s2779_s26  ;;  %v695_v58 = vmul.f32 %v694_v57, %v3070_v31  ;;  %v662_v59 = vmul.f32 %v658_v9, %v3056_v5  ;;  %v724_v31 = vmul.f32 %v720_v15, %v3086_v50 }
 0x133   :  { %v3052_v60 = vpop.permute.xlu2 %363  ;;  %v3054_v3 = vpop.permute.xlu1 %331 }
 0x134   :  { %v3058_v6 = vpop.permute.xlu0 %301 }
 0x139   :  { %647 = vrot.lane.b32.xlu2 %v636_v14, %s2779_s26  ;;  %669 = vrot.lane.b32.xlu1 %v660_v16, %s2780_s28 }
 0x13a   :  { %667 = vrot.lane.b32.xlu0 %v659_v20, %s2780_s28  ;;  %v3084_v20 = vld [vmem:[#allocation2 + $0x3a] sm:$0xff] }
 0x13b   :  { %v3066_v23 = vpop.permute.xlu2 %397  ;;  %v3068_v30 = vpop.permute.xlu1 %337  ;;  %4313 = vst [vmem:[#allocation30_spill] sm:$0xff] %v3084_v20  ;;  %v696_v9 = vmul.f32 %v694_v57, %v3084_v20 }
 0x13c   :  { %v3072_v32 = vpop.permute.xlu0 %335 }
 0x141   :  { %671 = vrot.lane.b32.xlu2 %v661_v48, %s2780_s28  ;;  %703 = vrot.lane.b32.xlu1 %v695_v58, %s2779_s26  ;;  %v698_v48 = vmul.f32 %v694_v57, %v3086_v50  ;;  %v697_v58 = vmul.f32 %v694_v57, %v3090_v41  ;;  %v722_v57 = vmul.f32 %v720_v15, %v3084_v20 }
 0x142   :  { %673 = vrot.lane.b32.xlu0 %v662_v59, %s2780_s28  ;;  %v773_v41 = vmul.f32 %v771_v43, %v2834_v22  ;;  %v772_v20 = vmul.f32 %v771_v43, %v2828_v18  ;;  %v774_v15 = vmul.f32 %v771_v43, %v2841_v26  ;;  %v798_v50 = vmul.f32 %v797_v4, %v2828_v18 }
 0x143   :  { %v3080_v14 = vpop.permute.xlu2 %421  ;;  %v3082_v16 = vpop.permute.xlu1 %361 }
 0x144   :  { %4312 = vst [vmem:[#allocation29_spill] sm:$0xff] %v3080_v14  ;;  %v3088_v63 = vpop.permute.xlu0 %359  ;;  %v859_v14 = vstv %s2531_s25  ;;  %s2558_s25 = sld [smem:[#allocation8 + $0x3a]] }
 0x149   :  { %705 = vrot.lane.b32.xlu2 %v696_v9, %s2779_s26  ;;  %709 = vrot.lane.b32.xlu1 %v698_v48, %s2779_s26 }
 0x14a   :  { %707 = vrot.lane.b32.xlu0 %v697_v58, %s2779_s26 }
 0x14b   :  { %v3098_v59 = vpop.permute.xlu2 %455  ;;  %v3100_v5 = vpop.permute.xlu1 %395 }
 0x14c   :  { %v3102_v12 = vpop.permute.xlu0 %393 }
 0x151   :  { %729 = vrot.lane.b32.xlu2 %v721_v40, %s2780_s28  ;;  %733 = vrot.lane.b32.xlu1 %v723_v46, %s2780_s28 }
 0x152   :  { %731 = vrot.lane.b32.xlu0 %v722_v57, %s2780_s28 }
 0x153   :  { %v3110_v9 = vpop.permute.xlu2 %461  ;;  %v3112_v48 = vpop.permute.xlu1 %419 }
 0x154   :  { %4316 = vst [vmem:[#allocation33_spill] sm:$0xff] %v3110_v9  ;;  %v3114_v58 = vpop.permute.xlu0 %399  ;;  %v801_v9 = vmul.f32 %v797_v4, %v2843_v27 }
 0x159   :  { %735 = vrot.lane.b32.xlu2 %v724_v31, %s2780_s28  ;;  %782 = vrot.lane.b32.xlu1 %v773_v41, %s2779_s26 }
 0x15a   :  { %780 = vrot.lane.b32.xlu0 %v772_v20, %s2779_s26 }
 0x15b   :  { %v3122_v46 = vpop.permute.xlu2 %485  ;;  %v3124_v40 = vpop.permute.xlu1 %425 }
 0x15c   :  { %4317 = vst [vmem:[#allocation34_spill] sm:$0xff] %v3122_v46  ;;  %v3126_v57 = vpop.permute.xlu0 %423  ;;  %v188_v46 = vstv %s187_s22  ;;  %s2555_s22 = sld [smem:[#allocation8 + $0x37]] }
 0x15d   :  { %v189_v43 = vmul.f32 %v188_v46, %v2828_v18  ;;  %v833_v18 = vstv %s2530_s24  ;;  %s2526_s24 = sld [smem:[#allocation8 + $0x1b]] }
 0x161   :  { %784 = vrot.lane.b32.xlu2 %v774_v15, %s2779_s26  ;;  %806 = vrot.lane.b32.xlu1 %v798_v50, %s2780_s28  ;;  %v800_v15 = vmul.f32 %v797_v4, %v2841_v26  ;;  %v250_v50 = vstv %s2502_s23  ;;  %v834_v4 = vmul.f32 %v833_v18, %v2858_v35  ;;  %s2556_s23 = sld [smem:[#allocation8 + $0x38]] }
 0x162   :  { %786 = vrot.lane.b32.xlu0 %v775_v45, %s2779_s26  ;;  %v219_v45 = vadd.f32 %v2982_v53, %v189_v43  ;;  %v836_v53 = vmul.f32 %v833_v18, %v2860_v36  ;;  %v192_v43 = vmul.f32 %v188_v46, %v2843_v27  ;;  %v190_v27 = vmul.f32 %v188_v46, %v2834_v22 }
 0x163   :  { %v3134_v41 = vpop.permute.xlu2 %519  ;;  %v3136_v31 = vpop.permute.xlu1 %459 }
 0x164   :  { %4318 = vst [vmem:[#allocation35_spill] sm:$0xff] %v3134_v41  ;;  %v3138_v20 = vpop.permute.xlu0 %457 }
 0x165   :  { %4319 = vst [vmem:[#allocation36_spill] sm:$0xff] %v3136_v31  ;;  %v245_v31 = vadd.f32 %v2992_v62, %v219_v45  ;;  %v222_v62 = vadd.f32 %v2996_v1, %v192_v43  ;;  %v254_v1 = vmul.f32 %v250_v50, %v2871_v44 }
 0x166   :  { %4320 = vst [vmem:[#allocation37_spill] sm:$0xff] %v3138_v20 }
 0x169   :  { %808 = vrot.lane.b32.xlu2 %v799_v21, %s2780_s28  ;;  %812 = vrot.lane.b32.xlu1 %v801_v9, %s2780_s28  ;;  %v251_v21 = vmul.f32 %v250_v50, %v2858_v35 }
 0x16a   :  { %810 = vrot.lane.b32.xlu0 %v800_v15, %s2780_s28  ;;  %v835_v15 = vmul.f32 %v833_v18, %v2862_v38 }
 0x16b   :  { %v3148_v41 = vpop.permute.xlu2 %543  ;;  %v3150_v20 = vpop.permute.xlu1 %483  ;;  %v255_v9 = vadd.f32 %v251_v21, %v245_v31 }
 0x16c   :  { %4321 = vst [vmem:[#allocation38_spill] sm:$0xff] %v3148_v41  ;;  %v3153_v19 = vpop.permute.xlu0 %481  ;;  %v248_v41 = vadd.f32 %v3008_v11, %v222_v62  ;;  %v837_v11 = vmul.f32 %v833_v18, %v2871_v44 }
 0x16d   :  { %4322 = vst [vmem:[#allocation39_spill] sm:$0xff] %v3150_v20  ;;  %v281_v31 = vadd.f32 %v2978_v51, %v255_v9  ;;  %v861_v51 = vmul.f32 %v859_v14, %v2862_v38 }
 0x16e   :  { %v258_v62 = vadd.f32 %v254_v1, %v248_v41 }
 0x16f   :  { %v307_v43 = vadd.f32 %v3042_v47, %v281_v31 }
 0x171   :  { %842 = vrot.lane.b32.xlu2 %v834_v4, %s2779_s26  ;;  %846 = vrot.lane.b32.xlu1 %v836_v53, %s2779_s26  ;;  %v312_v4 = vstv %s2505_s0  ;;  %v191_v53 = vmul.f32 %v188_v46, %v2841_v26  ;;  %s2529_s0 = sld [smem:[#allocation8 + $0x1e]] }
 0x172   :  { %844 = vrot.lane.b32.xlu0 %v835_v15, %s2779_s26  ;;  %v220_v15 = vadd.f32 %v2980_v52, %v190_v27  ;;  %v313_v22 = vmul.f32 %v312_v4, %v2880_v49  ;;  %v895_v27 = vstv %s2533_s1  ;;  %s2532_s1 = sld [smem:[#allocation8 + $0x21]] }
 0x173   :  { %v3164_v45 = vpop.permute.xlu2 %549  ;;  %v3166_v20 = vpop.permute.xlu1 %517  ;;  %v221_v9 = vadd.f32 %v2954_v33, %v191_v53  ;;  %v253_v33 = vmul.f32 %v250_v50, %v2860_v36 }
 0x174   :  { %4323 = vst [vmem:[#allocation40_spill] sm:$0xff] %v3164_v45  ;;  %v3170_v21 = vpop.permute.xlu0 %487  ;;  %v860_v45 = vmul.f32 %v859_v14, %v2858_v35  ;;  %v317_v47 = vadd.f32 %v313_v22, %v307_v43  ;;  %v246_v52 = vadd.f32 %v2964_v42, %v220_v15  ;;  %v284_v35 = vadd.f32 %v2990_v61, %v258_v62 }
 0x175   :  { %v247_v26 = vadd.f32 %v3012_v13, %v221_v9  ;;  %v252_v13 = vmul.f32 %v250_v50, %v2862_v38  ;;  %v374_v42 = vstv %s2508_s2  ;;  %v862_v43 = vmul.f32 %v859_v14, %v2860_v36  ;;  %s2559_s2 = sld [smem:[#allocation8 + $0x3b]] }
 0x176   :  { %v343_v41 = vadd.f32 %v3054_v3, %v317_v47  ;;  %v896_v15 = vmul.f32 %v895_v27, %v2880_v49  ;;  %v316_v61 = vmul.f32 %v312_v4, %v2890_v55  ;;  %v375_v50 = vmul.f32 %v374_v42, %v2908_v2 }
 0x177   :  { %v257_v53 = vadd.f32 %v253_v33, %v247_v26  ;;  %v256_v1 = vadd.f32 %v252_v13, %v246_v52  ;;  %v314_v62 = vmul.f32 %v312_v4, %v2888_v54  ;;  %v315_v22 = vmul.f32 %v312_v4, %v2892_v56 }
 0x178   :  { %v369_v3 = vadd.f32 %v3034_v37, %v343_v41  ;;  %v897_v52 = vmul.f32 %v895_v27, %v2888_v54  ;;  %v899_v33 = vmul.f32 %v895_v27, %v2890_v55  ;;  %v378_v13 = vmul.f32 %v374_v42, %v2919_v8 }
 0x179   :  { %848 = vrot.lane.b32.xlu2 %v837_v11, %s2779_s26  ;;  %870 = vrot.lane.b32.xlu1 %v861_v51, %s2780_s28  ;;  %v283_v11 = vadd.f32 %v3024_v25, %v257_v53  ;;  %v863_v51 = vmul.f32 %v859_v14, %v2871_v44  ;;  %v282_v38 = vadd.f32 %v3026_v29, %v256_v1 }
 0x17a   :  { %868 = vrot.lane.b32.xlu0 %v860_v45, %s2780_s28  ;;  %v310_v45 = vadd.f32 %v3058_v6, %v284_v35  ;;  %v379_v29 = vadd.f32 %v375_v50, %v369_v3  ;;  %v898_v35 = vmul.f32 %v895_v27, %v2892_v56 }
 0x17b   :  { %v3187_v46 = vpop.permute.xlu2 %583  ;;  %v3189_v18 = vpop.permute.xlu1 %523  ;;  %v308_v36 = vadd.f32 %v3036_v39, %v282_v38  ;;  %v309_v9 = vadd.f32 %v3006_v10, %v283_v11  ;;  %v436_v39 = vstv %s2511_s27  ;;  %v377_v11 = vmul.f32 %v374_v42, %v2916_v7  ;;  %s2561_s27 = sld [smem:[#allocation8 + $0x3d]] }
 0x17c   :  { %v3194_v31 = vpop.permute.xlu0 %521  ;;  %v320_v6 = vadd.f32 %v316_v61, %v310_v45  ;;  %v405_v26 = vadd.f32 %v3102_v12, %v379_v29  ;;  %v437_v4 = vmul.f32 %v436_v39, %v2934_v17  ;;  %v957_v29 = vstv %s2536_s4  ;;  %s2562_s4 = sld [smem:[#allocation8 + $0x3e]] }
 0x17d   :  { %v318_v47 = vadd.f32 %v314_v62, %v308_v36  ;;  %v319_v41 = vadd.f32 %v315_v22, %v309_v9  ;;  %v4324_v22 = vld [vmem:[#allocation29_spill] sm:$0xff] }
 0x17e   :  { %v346_v44 = vadd.f32 %v3068_v30, %v320_v6  ;;  %v431_v30 = vadd.f32 %v3112_v48, %v405_v26 }
 0x17f   :  { %v345_v12 = vadd.f32 %v3072_v32, %v319_v41 }
 0x180   :  { %v372_v10 = vadd.f32 %v3052_v60, %v346_v44  ;;  %v344_v60 = vadd.f32 %v3022_v24, %v318_v47  ;;  %v441_v45 = vadd.f32 %v437_v4, %v431_v30  ;;  %v376_v24 = vmul.f32 %v374_v42, %v2906_v0 }
 0x181   :  { %872 = vrot.lane.b32.xlu2 %v862_v43, %s2780_s28  ;;  %904 = vrot.lane.b32.xlu1 %v896_v15, %s2779_s26  ;;  %v371_v27 = vadd.f32 %v3082_v16, %v345_v12  ;;  %v921_v15 = vstv %s2534_s29  ;;  %v959_v47 = vmul.f32 %v957_v29, %v2906_v0  ;;  %v958_v30 = vmul.f32 %v957_v29, %v2908_v2  ;;  %s2535_s29 = sld [smem:[#allocation8 + $0x24]] }
 0x182   :  { %874 = vrot.lane.b32.xlu0 %v863_v51, %s2780_s28  ;;  %v382_v1 = vadd.f32 %v378_v13, %v372_v10  ;;  %v370_v32 = vadd.f32 %v3088_v63, %v344_v60  ;;  %v922_v61 = vmul.f32 %v921_v15, %v2880_v49  ;;  %v924_v51 = vmul.f32 %v921_v15, %v2892_v56 }
 0x183   :  { %v3210_v25 = vpop.permute.xlu2 %607  ;;  %v3212_v37 = vpop.permute.xlu1 %547  ;;  %v381_v38 = vadd.f32 %v377_v11, %v371_v27  ;;  %v467_v6 = vadd.f32 %v3098_v59, %v441_v45  ;;  %v923_v50 = vmul.f32 %v921_v15, %v2888_v54  ;;  %v498_v63 = vstv %s2514_s30  ;;  %v4328_v27 = vld [vmem:[#allocation36_spill] sm:$0xff]  ;;  %s2538_s30 = sld [smem:[#allocation8 + $0x27]] }
 0x184   :  { %v3216_v14 = vpop.permute.xlu0 %545  ;;  %v408_v3 = vadd.f32 %v3114_v58, %v382_v1  ;;  %v380_v36 = vadd.f32 %v376_v24, %v370_v32  ;;  %v440_v58 = vmul.f32 %v436_v39, %v2946_v28  ;;  %v499_v9 = vmul.f32 %v498_v63, %v2956_v34  ;;  %v4329_v1 = vld [vmem:[#allocation38_spill] sm:$0xff]  ;;  %v4331_v24 = vld [vmem:[#allocation37_spill] sm:$0xff] }
 0x185   :  { %v493_v42 = vadd.f32 %v3153_v19, %v467_v6  ;;  %v407_v54 = vadd.f32 %v3066_v23, %v381_v38  ;;  %v4326_v23 = vld [vmem:[#allocation33_spill] sm:$0xff]  ;;  %v560_v13 = vstv %s2517_s5  ;;  %s3618_s5 = sld [smem:[#allocation8 + $0x2a]] }
 0x186   :  { %v434_v16 = vadd.f32 %v3124_v40, %v408_v3  ;;  %v406_v49 = vadd.f32 %v3100_v5, %v380_v36  ;;  %v925_v5 = vmul.f32 %v921_v15, %v2890_v55  ;;  %v983_v3 = vstv %s2537_s6  ;;  %s2564_s6 = sld [smem:[#allocation8 + $0x40]] }
 0x187   :  { %v433_v62 = vadd.f32 %v3126_v57, %v407_v54  ;;  %v503_v19 = vadd.f32 %v499_v9, %v493_v42  ;;  %v984_v36 = vmul.f32 %v983_v3, %v2908_v2  ;;  %v961_v54 = vmul.f32 %v957_v29, %v2919_v8  ;;  %v4335_v9 = vld [vmem:[#allocation17_spill] sm:$0xff] }
 0x188   :  { %v444_v40 = vadd.f32 %v440_v58, %v434_v16  ;;  %v432_v26 = vadd.f32 %v4324_v22, %v406_v49  ;;  %v4333_v16 = vld [vmem:[#allocation39_spill] sm:$0xff]  ;;  %v4334_v58 = vld [vmem:[#allocation34_spill] sm:$0xff] }
 0x189   :  { %906 = vrot.lane.b32.xlu2 %v897_v52, %s2779_s26  ;;  %910 = vrot.lane.b32.xlu1 %v899_v33, %s2779_s26  ;;  %v4325_v52 = vld [vmem:[#allocation15_spill] sm:$0xff]  ;;  %v529_v10 = vadd.f32 %v3166_v20, %v503_v19 }
 0x18a   :  { %908 = vrot.lane.b32.xlu0 %v898_v35, %s2779_s26  ;;  %v439_v33 = vmul.f32 %v436_v39, %v4325_v52  ;;  %v470_v41 = vadd.f32 %v4326_v23, %v444_v40  ;;  %v4327_v35 = vld [vmem:[#allocation16_spill] sm:$0xff]  ;;  %v4336_v19 = vld [vmem:[#allocation19_spill] sm:$0xff] }
 0x18b   :  { %v3233_v53 = vpop.permute.xlu2 %641  ;;  %v3235_v48 = vpop.permute.xlu1 %581  ;;  %v438_v12 = vmul.f32 %v436_v39, %v4327_v35  ;;  %v555_v15 = vadd.f32 %v4329_v1, %v529_v10  ;;  %v4330_v39 = vld [vmem:[#allocation18_spill] sm:$0xff]  ;;  %v501_v22 = vmul.f32 %v498_v63, %v4336_v19 }
 0x18c   :  { %v3238_v43 = vpop.permute.xlu0 %579  ;;  %v443_v57 = vadd.f32 %v439_v33, %v433_v62  ;;  %v496_v4 = vadd.f32 %v3170_v21, %v470_v41  ;;  %v502_v32 = vmul.f32 %v498_v63, %v4330_v39  ;;  %v500_v62 = vmul.f32 %v498_v63, %v4335_v9  ;;  %v4337_v33 = vld [vmem:[#allocation40_spill] sm:$0xff] }
 0x18d   :  { %v442_v55 = vadd.f32 %v438_v12, %v432_v26  ;;  %v4339_v12 = vld [vmem:[#allocation23_spill] sm:$0xff] }
 0x18e   :  { %v469_v45 = vadd.f32 %v4328_v27, %v443_v57  ;;  %v506_v21 = vadd.f32 %v502_v32, %v496_v4  ;;  %v564_v57 = vmul.f32 %v560_v13, %v4339_v12  ;;  %v4340_v4 = vld [vmem:[#allocation35_spill] sm:$0xff]  ;;  %v985_v27 = vmul.f32 %v983_v3, %v2906_v0  ;;  %v4342_v0 = vld [vmem:[#allocation20_spill] sm:$0xff] }
 0x18f   :  { %v986_v32 = vmul.f32 %v983_v3, %v2916_v7 }
 0x190   :  { %v495_v42 = vadd.f32 %v4334_v58, %v469_v45  ;;  %v532_v49 = vadd.f32 %v3189_v18, %v506_v21  ;;  %v987_v45 = vmul.f32 %v983_v3, %v2919_v8  ;;  %v562_v8 = vmul.f32 %v560_v13, %v4342_v0  ;;  %v4343_v58 = vld [vmem:[#allocation27_spill] sm:$0xff] }
 0x191   :  { %930 = vrot.lane.b32.xlu2 %v922_v61, %s2780_s28  ;;  %934 = vrot.lane.b32.xlu1 %v924_v51, %s2780_s28  ;;  %v468_v61 = vadd.f32 %v4331_v24, %v442_v55  ;;  %v4332_v51 = vld [vmem:[#allocation21_spill] sm:$0xff] }
 0x192   :  { %932 = vrot.lane.b32.xlu0 %v923_v50, %s2780_s28  ;;  %v561_v38 = vmul.f32 %v560_v13, %v4332_v51  ;;  %v960_v50 = vmul.f32 %v957_v29, %v2916_v7  ;;  %v558_v29 = vadd.f32 %v4337_v33, %v532_v49  ;;  %v505_v10 = vadd.f32 %v501_v22, %v495_v42 }
 0x193   :  { %v3255_v56 = vpop.permute.xlu2 %647  ;;  %v606_v59 = vpop.permute.xlu1 %605  ;;  %v494_v6 = vadd.f32 %v4333_v16, %v468_v61 }
 0x194   :  { %v3259_v44 = vpop.permute.xlu0 %585  ;;  %v565_v40 = vadd.f32 %v561_v38, %v555_v15  ;;  %v531_v63 = vadd.f32 %v3194_v31, %v505_v10  ;;  %v4341_v31 = vld [vmem:[#allocation22_spill] sm:$0xff]  ;;  %v4345_v10 = vld [vmem:[#allocation25_spill] sm:$0xff] }
 0x195   :  { %v504_v2 = vadd.f32 %v500_v62, %v494_v6  ;;  %v563_v61 = vmul.f32 %v560_v13, %v4341_v31 }
 0x196   :  { %v591_v26 = vadd.f32 %v3238_v43, %v565_v40  ;;  %v557_v1 = vadd.f32 %v3212_v37, %v531_v63 }
 0x197   :  { %v530_v55 = vadd.f32 %v4340_v4, %v504_v2 }
 0x198   :  { %v617_v23 = vadd.f32 %v606_v59, %v591_v26  ;;  %v568_v59 = vadd.f32 %v564_v57, %v558_v29  ;;  %v567_v16 = vadd.f32 %v563_v61, %v557_v1  ;;  %v4346_v57 = vld [vmem:[#allocation26_spill] sm:$0xff] }
 0x199   :  { %936 = vrot.lane.b32.xlu2 %v925_v5, %s2780_s28  ;;  %968 = vrot.lane.b32.xlu1 %v959_v47, %s2779_s26  ;;  %v622_v5 = vstv %s2520_s7  ;;  %v556_v24 = vadd.f32 %v3216_v14, %v530_v55  ;;  %v1019_v14 = vstv %s2539_s8  ;;  %s2544_s7 = sld [smem:[#allocation8 + $0x2d]] }
 0x19a   :  { %966 = vrot.lane.b32.xlu0 %v958_v30, %s2779_s26  ;;  %v4338_v30 = vld [vmem:[#allocation24_spill] sm:$0xff]  ;;  %v594_v21 = vadd.f32 %v3259_v44, %v568_v59  ;;  %v626_v42 = vmul.f32 %v622_v5, %v4343_v58  ;;  %v1020_v40 = vmul.f32 %v1019_v14, %v2934_v17  ;;  %v1022_v13 = vmul.f32 %v1019_v14, %v4325_v52  ;;  %s2565_s8 = sld [smem:[#allocation8 + $0x41]] }
 0x19b   :  { %v3274_v60 = vpop.permute.xlu2 %671  ;;  %v612_v20 = vpop.permute.xlu1 %611  ;;  %v623_v43 = vmul.f32 %v622_v5, %v4338_v30  ;;  %v566_v3 = vadd.f32 %v562_v8, %v556_v24  ;;  %v1021_v62 = vmul.f32 %v1019_v14, %v4327_v35  ;;  %v624_v4 = vmul.f32 %v622_v5, %v4346_v57 }
 0x19c   :  { %v3279_v11 = vpop.permute.xlu0 %609  ;;  %v620_v6 = vadd.f32 %v612_v20, %v594_v21  ;;  %v593_v20 = vadd.f32 %v3187_v46, %v567_v16  ;;  %v746_v55 = vstv %s745_s11  ;;  %v1023_v59 = vmul.f32 %v1019_v14, %v2946_v28  ;;  %s3727_s11 = sld [smem:[#allocation8 + $0x33]] }
 0x19d   :  { %v627_v15 = vadd.f32 %v623_v43, %v617_v23  ;;  %v592_v44 = vadd.f32 %v3235_v48, %v566_v3  ;;  %v625_v23 = vmul.f32 %v622_v5, %v4345_v10 }
 0x19e   :  { %v619_v26 = vadd.f32 %v3279_v11, %v593_v20 }
 0x19f   :  { %v653_v7 = vadd.f32 %v3233_v53, %v627_v15  ;;  %v4344_v53 = vld [vmem:[#allocation28_spill] sm:$0xff]  ;;  %v618_v2 = vadd.f32 %v3210_v25, %v592_v44 }
 0x1a1   :  { %970 = vrot.lane.b32.xlu2 %v960_v50, %s2779_s26  ;;  %992 = vrot.lane.b32.xlu1 %v984_v36, %s2780_s28  ;;  %v684_v36 = vstv %s2523_s9  ;;  %v628_v15 = vadd.f32 %v624_v4, %v618_v2  ;;  %s2547_s9 = sld [smem:[#allocation8 + $0x30]] }
 0x1a2   :  { %972 = vrot.lane.b32.xlu0 %v961_v54, %s2779_s26  ;;  %v630_v54 = vadd.f32 %v626_v42, %v620_v6  ;;  %v685_v22 = vmul.f32 %v684_v36, %v4344_v53  ;;  %v4349_v42 = vld [vmem:[#allocation32_spill] sm:$0xff] }
 0x1a3   :  { %v3295_v47 = vpop.permute.xlu2 %705  ;;  %v3297_v18 = vpop.permute.xlu1 %645 }
 0x1a4   :  { %v3300_v41 = vpop.permute.xlu0 %643  ;;  %v656_v63 = vadd.f32 %v3255_v56, %v630_v54  ;;  %v4347_v56 = vld [vmem:[#allocation31_spill] sm:$0xff] }
 0x1a5   :  { %v688_v21 = vmul.f32 %v684_v36, %v4347_v56  ;;  %v654_v8 = vadd.f32 %v3300_v41, %v628_v15  ;;  %v1081_v41 = vstv %s2542_s12  ;;  %s3754_s12 = sld [smem:[#allocation8 + $0x44]] }
 0x1a9   :  { %994 = vrot.lane.b32.xlu2 %v985_v27, %s2780_s28  ;;  %998 = vrot.lane.b32.xlu1 %v987_v45, %s2780_s28  ;;  %v1045_v27 = vstv %s2540_s10  ;;  %v629_v45 = vadd.f32 %v625_v23, %v619_v26  ;;  %v1085_v23 = vmul.f32 %v1081_v41, %v4330_v39  ;;  %s2567_s10 = sld [smem:[#allocation8 + $0x43]] }
 0x1aa   :  { %996 = vrot.lane.b32.xlu0 %v986_v32, %s2780_s28  ;;  %v1047_v25 = vmul.f32 %v1045_v27, %v4327_v35  ;;  %v1046_v61 = vmul.f32 %v1045_v27, %v2934_v17  ;;  %v1049_v20 = vmul.f32 %v1045_v27, %v2946_v28 }
 0x1ab   :  { %v730_v38 = vpop.permute.xlu2 %729  ;;  %v670_v37 = vpop.permute.xlu1 %669  ;;  %v655_v32 = vadd.f32 %v3297_v18, %v629_v45 }
 0x1ac   :  { %v668_v50 = vpop.permute.xlu0 %667  ;;  %v680_v16 = vadd.f32 %v670_v37, %v654_v8  ;;  %v1082_v37 = vmul.f32 %v1081_v41, %v2956_v34  ;;  %v1169_v8 = vstv %s2546_s15  ;;  %s3784_s15 = sld [smem:[#allocation8 + $0x46]] }
 0x1ad   :  { %v679_v49 = vadd.f32 %v668_v50, %v653_v7  ;;  %v681_v6 = vadd.f32 %v3274_v60, %v655_v32  ;;  %v4348_v7 = vld [vmem:[#allocation30_spill] sm:$0xff]  ;;  %v1143_v32 = vstv %s2545_s14  ;;  %s3774_s14 = sld [smem:[#allocation8 + $0x36]] }
 0x1ae   :  { %v686_v14 = vmul.f32 %v684_v36, %v4348_v7 }
 0x1af   :  { %v689_v48 = vadd.f32 %v685_v22, %v679_v49  ;;  %v687_v49 = vmul.f32 %v684_v36, %v4349_v42 }
 0x1b0   :  { %v690_v44 = vadd.f32 %v686_v14, %v680_v16 }
 0x1b1   :  { %1028 = vrot.lane.b32.xlu2 %v1020_v40, %s2779_s26  ;;  %1032 = vrot.lane.b32.xlu1 %v1022_v13, %s2779_s26  ;;  %v1048_v40 = vmul.f32 %v1045_v27, %v4325_v52  ;;  %v691_v54 = vadd.f32 %v687_v49, %v681_v6  ;;  %v1107_v27 = vstv %s2543_s13  ;;  %v1205_v49 = vstv %s2548_s16  ;;  %s2553_s13 = sld [smem:[#allocation9 + $0x1]] }
 0x1b2   :  { %1030 = vrot.lane.b32.xlu0 %v1021_v62, %s2779_s26  ;;  %v716_v26 = vadd.f32 %v3295_v47, %v690_v44  ;;  %v1108_v45 = vmul.f32 %v1107_v27, %v2956_v34  ;;  %v1111_v34 = vmul.f32 %v1107_v27, %v4330_v39  ;;  %v1170_v39 = vmul.f32 %v1169_v8, %v4332_v51  ;;  %s2571_s16 = sld [smem:[#allocation8 + $0x47]] }
 0x1b3   :  { %v736_v33 = vpop.permute.xlu2 %735  ;;  %v704_v29 = vpop.permute.xlu1 %703 }
 0x1b4   :  { %v715_v46 = vadd.f32 %v704_v29, %v689_v48  ;;  %v674_v43 = vpop.permute.xlu0 %673  ;;  %v1083_v29 = vmul.f32 %v1081_v41, %v4335_v9 }
 0x1b5   :  { %v682_v1 = vadd.f32 %v674_v43, %v656_v63  ;;  %v1084_v63 = vmul.f32 %v1081_v41, %v4336_v19 }
 0x1b6   :  { %v741_v11 = vadd.f32 %v730_v38, %v715_v46 }
 0x1b7   :  { %v692_v38 = vadd.f32 %v688_v21, %v682_v1  ;;  %v1109_v1 = vmul.f32 %v1107_v27, %v4335_v9  ;;  %v1144_v9 = vmul.f32 %v1143_v32, %v4332_v51  ;;  %v1172_v51 = vmul.f32 %v1169_v8, %v4341_v31 }
 0x1b8   :  { %v747_v24 = vadd.f32 %v746_v55, %v741_v11  ;;  %v1110_v11 = vmul.f32 %v1107_v27, %v4336_v19  ;;  %v1145_v19 = vmul.f32 %v1143_v32, %v4342_v0 }
 0x1b9   :  { %1034 = vrot.lane.b32.xlu2 %v1023_v59, %s2779_s26  ;;  %1056 = vrot.lane.b32.xlu1 %v1047_v25, %s2780_s28 }
 0x1ba   :  { %v751_v5 = vmax.f32 %v747_v24, 0.0  ;;  %1054 = vrot.lane.b32.xlu0 %v1046_v61, %s2780_s28 }
 0x1bb   :  { %v3342_v35 = vpop.permute.xlu2 %784  ;;  %v710_v18 = vpop.permute.xlu1 %709 }
 0x1bc   :  { %756 = vst.msk [vmem:[#allocation10] sm:$0xff] %vm755_vm3, %v751_v5  ;;  %v718_v17 = vadd.f32 %v710_v18, %v692_v38  ;;  %v708_v50 = vpop.permute.xlu0 %707  ;;  %v1146_v5 = vmul.f32 %v1143_v32, %v4341_v31  ;;  %v1147_v38 = vmul.f32 %v1143_v32, %v4339_v12  ;;  %v1207_v31 = vmul.f32 %v1205_v49, %v4346_v57 }
 0x1bd   :  { %v717_v62 = vadd.f32 %v708_v50, %v691_v54  ;;  %v1173_v50 = vmul.f32 %v1169_v8, %v4339_v12  ;;  %v1208_v12 = vmul.f32 %v1205_v49, %v4345_v10  ;;  %v1209_v54 = vmul.f32 %v1205_v49, %v4343_v58 }
 0x1be   :  { %v744_v3 = vadd.f32 %v736_v33, %v718_v17  ;;  %v1171_v17 = vmul.f32 %v1169_v8, %v4342_v0  ;;  %v1206_v0 = vmul.f32 %v1205_v49, %v4338_v30  ;;  %v3500_v49 = vld [vmem:[#allocation2 + $0x50] sm:$0xff] }
 0x1bf   :  { %4350 = vst [vmem:[#allocation29_spill] sm:$0xff] %v3500_v49 }
 0x1c0   :  { %v750_v13 = vadd.f32 %v746_v55, %v744_v3 }
 0x1c1   :  { %1058 = vrot.lane.b32.xlu2 %v1048_v40, %s2780_s28  ;;  %1090 = vrot.lane.b32.xlu1 %v1082_v37, %s2779_s26 }
 0x1c2   :  { %v754_v60 = vmax.f32 %v750_v13, 0.0  ;;  %1060 = vrot.lane.b32.xlu0 %v1049_v20, %s2780_s28  ;;  %v1231_v13 = vstv %s2549_s17  ;;  %s2557_s17 = sld [smem:[#allocation8 + $0x39]] }
 0x1c3   :  { %v3354_v22 = vpop.permute.xlu2 %808  ;;  %v734_v36 = vpop.permute.xlu1 %733  ;;  %v1233_v20 = vmul.f32 %v1231_v13, %v4346_v57  ;;  %v1235_v57 = vmul.f32 %v1231_v13, %v4343_v58 }
 0x1c4   :  { %759 = vst.msk [vmem:[#allocation10 + $0x48] sm:$0xff] %vm755_vm3, %v754_v60  ;;  %v743_v52 = vadd.f32 %v734_v36, %v717_v62  ;;  %v732_v48 = vpop.permute.xlu0 %731  ;;  %v1232_v60 = vmul.f32 %v1231_v13, %v4338_v30 }
 0x1c5   :  { %v742_v2 = vadd.f32 %v732_v48, %v716_v26  ;;  %v1234_v48 = vmul.f32 %v1231_v13, %v4345_v10 }
 0x1c6   :  { %v749_v28 = vadd.f32 %v746_v55, %v743_v52  ;;  %v1267_v52 = vstv %s2551_s18  ;;  %s2573_s18 = sld [smem:[#allocation8 + $0x49]] }
 0x1c7   :  { %v748_v33 = vadd.f32 %v746_v55, %v742_v2  ;;  %v1268_v2 = vmul.f32 %v1267_v52, %v4344_v53  ;;  %v1271_v10 = vmul.f32 %v1267_v52, %v4347_v56 }
 0x1c8   :  { %v753_v46 = vmax.f32 %v749_v28, 0.0 }
 0x1c9   :  { %v752_v43 = vmax.f32 %v748_v33, 0.0  ;;  %1092 = vrot.lane.b32.xlu2 %v1083_v29, %s2779_s26  ;;  %1096 = vrot.lane.b32.xlu1 %v1085_v23, %s2779_s26  ;;  %v1269_v29 = vmul.f32 %v1267_v52, %v4348_v7  ;;  %v1270_v23 = vmul.f32 %v1267_v52, %v4349_v42 }
 0x1ca   :  { %758 = vst.msk [vmem:[#allocation10 + $0x40] sm:$0xff] %vm755_vm3, %v753_v46  ;;  %1094 = vrot.lane.b32.xlu0 %v1084_v63, %s2779_s26 }
 0x1cb   :  { %757 = vst.msk [vmem:[#allocation10 + $0x8] sm:$0xff] %vm755_vm3, %v752_v43  ;;  %v3366_v47 = vpop.permute.xlu2 %842  ;;  %v3368_v4 = vpop.permute.xlu1 %782  ;;  %v1293_v43 = vstv %s2552_s19  ;;  %s2574_s19 = sld [smem:[#allocation8 + $0x4a]] }
 0x1cc   :  { %v3370_v55 = vpop.permute.xlu0 %780  ;;  %v1294_v27 = vmul.f32 %v1293_v43, %v4344_v53  ;;  %v1297_v53 = vmul.f32 %v1293_v43, %v4347_v56  ;;  %v1370_v56 = vstv %s2556_s23  ;;  %s2576_s23 = sld [smem:[#allocation8 + $0x4c]] }
 0x1d1   :  { %1116 = vrot.lane.b32.xlu2 %v1108_v45, %s2780_s28  ;;  %1120 = vrot.lane.b32.xlu1 %v1110_v11, %s2780_s28  ;;  %v1296_v45 = vmul.f32 %v1293_v43, %v4349_v42  ;;  %v1295_v11 = vmul.f32 %v1293_v43, %v4348_v7  ;;  %v3484_v42 = vld [vmem:[#allocation2] sm:$0xff] }
 0x1d2   :  { %1118 = vrot.lane.b32.xlu0 %v1109_v1, %s2780_s28 }
 0x1d3   :  { %v3378_v15 = vpop.permute.xlu2 %848  ;;  %v3380_v59 = vpop.permute.xlu1 %806 }
 0x1d4   :  { %v3382_v25 = vpop.permute.xlu0 %786 }
 0x1d9   :  { %1122 = vrot.lane.b32.xlu2 %v1111_v34, %s2780_s28  ;;  %1154 = vrot.lane.b32.xlu1 %v1145_v19, %s2779_s26  ;;  %v1344_v19 = vstv %s2555_s22  ;;  %s2560_s22 = sld [smem:[#allocation8 + $0x3c]] }
 0x1da   :  { %1152 = vrot.lane.b32.xlu0 %v1144_v9, %s2779_s26  ;;  %v3481_v9 = vld [vmem:[#allocation2 + $0x8] sm:$0xff]  ;;  %v1345_v8 = vmul.f32 %v3484_v42, %v1344_v19 }
 0x1db   :  { %v3390_v24 = vpop.permute.xlu2 %872  ;;  %v3392_v61 = vpop.permute.xlu1 %812  ;;  %v1346_v7 = vmul.f32 %v3481_v9, %v1344_v19 }
 0x1dc   :  { %v3394_v21 = vpop.permute.xlu0 %810 }
 0x1e1   :  { %1156 = vrot.lane.b32.xlu2 %v1146_v5, %s2779_s26  ;;  %1178 = vrot.lane.b32.xlu1 %v1170_v39, %s2780_s28 }
 0x1e2   :  { %1158 = vrot.lane.b32.xlu0 %v1147_v38, %s2779_s26 }
 0x1e3   :  { %v3402_v16 = vpop.permute.xlu2 %906  ;;  %v3404_v18 = vpop.permute.xlu1 %846 }
 0x1e4   :  { %v3406_v6 = vpop.permute.xlu0 %844 }
 0x1e9   :  { %1180 = vrot.lane.b32.xlu2 %v1171_v17, %s2780_s28  ;;  %1184 = vrot.lane.b32.xlu1 %v1173_v50, %s2780_s28  ;;  %v3496_v17 = vld [vmem:[#allocation2 + $0x48] sm:$0xff] }
 0x1ea   :  { %1182 = vrot.lane.b32.xlu0 %v1172_v51, %s2780_s28  ;;  %v1347_v50 = vmul.f32 %v3496_v17, %v1344_v19  ;;  %v1371_v51 = vmul.f32 %v3484_v42, %v1370_v56 }
 0x1eb   :  { %v3414_v41 = vpop.permute.xlu2 %930  ;;  %v3416_v14 = vpop.permute.xlu1 %870 }
 0x1ec   :  { %v3418_v3 = vpop.permute.xlu0 %868 }
 0x1f1   :  { %1214 = vrot.lane.b32.xlu2 %v1206_v0, %s2779_s26  ;;  %1218 = vrot.lane.b32.xlu1 %v1208_v12, %s2779_s26  ;;  %v1348_v0 = vmul.f32 %v3500_v49, %v1344_v19  ;;  %v3531_v19 = vld [vmem:[#allocation2 + $0x49] sm:$0xff] }
 0x1f2   :  { %1216 = vrot.lane.b32.xlu0 %v1207_v31, %s2779_s26 }
 0x1f3   :  { %v3426_v44 = vpop.permute.xlu2 %936  ;;  %v3428_v40 = vpop.permute.xlu1 %904 }
 0x1f4   :  { %v3430_v37 = vpop.permute.xlu0 %874 }
 0x1f9   :  { %1220 = vrot.lane.b32.xlu2 %v1209_v54, %s2779_s26  ;;  %1242 = vrot.lane.b32.xlu1 %v1233_v20, %s2780_s28  ;;  %v761_v54 = vstv %s2526_s24  ;;  %v1372_v20 = vmul.f32 %v3481_v9, %v1370_v56  ;;  %s2577_s24 = sld [smem:[#allocation8 + $0x4d]] }
 0x1fa   :  { %1240 = vrot.lane.b32.xlu0 %v1232_v60, %s2780_s28  ;;  %v1374_v60 = vmul.f32 %v3500_v49, %v1370_v56  ;;  %v762_v52 = vmul.f32 %v3484_v42, %v761_v54 }
 0x1fb   :  { %v3438_v62 = vpop.permute.xlu2 %970  ;;  %v3440_v36 = vpop.permute.xlu1 %910 }
 0x1fc   :  { %v3442_v26 = vpop.permute.xlu0 %908 }
 0x201   :  { %1244 = vrot.lane.b32.xlu2 %v1234_v48, %s2780_s28  ;;  %1276 = vrot.lane.b32.xlu1 %v1268_v2, %s2779_s26  ;;  %v1373_v48 = vmul.f32 %v3496_v17, %v1370_v56  ;;  %v792_v2 = vadd.f32 %v3370_v55, %v762_v52  ;;  %v3535_v56 = vld [vmem:[#allocation2 + $0x9] sm:$0xff] }
 0x202   :  { %1246 = vrot.lane.b32.xlu0 %v1235_v57, %s2780_s28  ;;  %v823_v57 = vstv %s2529_s0  ;;  %s2579_s0 = sld [smem:[#allocation8 + $0x4f]] }
 0x203   :  { %v3450_v30 = vpop.permute.xlu2 %994  ;;  %v3452_v28 = vpop.permute.xlu1 %934 }
 0x204   :  { %v3454_v33 = vpop.permute.xlu0 %932 }
 0x209   :  { %1278 = vrot.lane.b32.xlu2 %v1269_v29, %s2779_s26  ;;  %1282 = vrot.lane.b32.xlu1 %v1271_v10, %s2779_s26 }
 0x20a   :  { %1280 = vrot.lane.b32.xlu0 %v1270_v23, %s2779_s26  ;;  %v818_v23 = vadd.f32 %v3380_v59, %v792_v2  ;;  %v885_v2 = vstv %s2532_s1  ;;  %s2580_s1 = sld [smem:[#allocation8 + $0x50]] }
 0x20b   :  { %v3462_v58 = vpop.permute.xlu2 %1028  ;;  %v3464_v46 = vpop.permute.xlu1 %968 }
 0x20c   :  { %v3466_v63 = vpop.permute.xlu0 %966 }
 0x211   :  { %1302 = vrot.lane.b32.xlu2 %v1294_v27, %s2780_s28  ;;  %1306 = vrot.lane.b32.xlu1 %v1296_v45, %s2780_s28  ;;  %v1406_v27 = vstv %s2558_s25  ;;  %v3527_v45 = vld [vmem:[#allocation2 + $0x1] sm:$0xff]  ;;  %s2563_s25 = sld [smem:[#allocation8 + $0x3f]] }
 0x212   :  { %1304 = vrot.lane.b32.xlu0 %v1295_v11, %s2780_s28  ;;  %v824_v11 = vmul.f32 %v3527_v45, %v823_v57  ;;  %v1407_v55 = vmul.f32 %v3527_v45, %v1406_v27  ;;  %v1408_v59 = vmul.f32 %v3535_v56, %v1406_v27 }
 0x213   :  { %v3474_v1 = vpop.permute.xlu2 %1034  ;;  %v3476_v32 = vpop.permute.xlu1 %992 }
 0x214   :  { %v3478_v34 = vpop.permute.xlu0 %972 }
 0x219   :  { %1308 = vrot.lane.b32.xlu2 %v1297_v53, %s2780_s28  ;;  %1355 = vrot.lane.b32.xlu1 %v1346_v7, %s2779_s26  ;;  %v1409_v53 = vmul.f32 %v3531_v19, %v1406_v27  ;;  %v828_v7 = vadd.f32 %v824_v11, %v818_v23  ;;  %v1432_v23 = vstv %s2559_s2  ;;  %v764_v11 = vmul.f32 %v3496_v17, %v761_v54  ;;  %s2566_s2 = sld [smem:[#allocation8 + $0x42]] }
 0x21a   :  { %1353 = vrot.lane.b32.xlu0 %v1345_v8, %s2779_s26  ;;  %v765_v8 = vmul.f32 %v3500_v49, %v761_v54  ;;  %v1433_v49 = vmul.f32 %v3527_v45, %v1432_v23 }
 0x21b   :  { %v3490_v5 = vpop.permute.xlu2 %1058  ;;  %v3492_v39 = vpop.permute.xlu1 %998 }
 0x21c   :  { %v3494_v38 = vpop.permute.xlu0 %996 }
 0x221   :  { %1357 = vrot.lane.b32.xlu2 %v1347_v50, %s2779_s26  ;;  %1379 = vrot.lane.b32.xlu1 %v1371_v51, %s2780_s28  ;;  %v795_v50 = vadd.f32 %v3382_v25, %v765_v8  ;;  %v3552_v25 = vld [vmem:[#allocation2 + $0x51] sm:$0xff] }
 0x222   :  { %1359 = vrot.lane.b32.xlu0 %v1348_v0, %s2779_s26 }
 0x223   :  { %v3506_v12 = vpop.permute.xlu2 %1092  ;;  %v3508_v31 = vpop.permute.xlu1 %1032 }
 0x224   :  { %v3510_v13 = vpop.permute.xlu0 %1030 }
 0x229   :  { %1381 = vrot.lane.b32.xlu2 %v1372_v20, %s2780_s28  ;;  %1385 = vrot.lane.b32.xlu1 %v1374_v60, %s2780_s28  ;;  %v821_v20 = vadd.f32 %v3392_v61, %v795_v50  ;;  %v854_v60 = vadd.f32 %v3366_v47, %v828_v7  ;;  %v1410_v47 = vmul.f32 %v3552_v25, %v1406_v27  ;;  %v3560_v50 = vld [vmem:[#allocation2 + $0x2] sm:$0xff] }
 0x22a   :  { %1383 = vrot.lane.b32.xlu0 %v1373_v48, %s2780_s28  ;;  %v763_v48 = vmul.f32 %v3481_v9, %v761_v54  ;;  %v1434_v61 = vmul.f32 %v3535_v56, %v1432_v23  ;;  %v794_v7 = vadd.f32 %v3342_v35, %v764_v11  ;;  %v886_v54 = vmul.f32 %v3560_v50, %v885_v2 }
 0x22b   :  { %v3520_v29 = vpop.permute.xlu2 %1116  ;;  %v3522_v10 = vpop.permute.xlu1 %1056 }
 0x22c   :  { %v3525_v43 = vpop.permute.xlu0 %1054  ;;  %v793_v8 = vadd.f32 %v3368_v4, %v763_v48  ;;  %v820_v4 = vadd.f32 %v3394_v21, %v794_v7  ;;  %v825_v21 = vmul.f32 %v3535_v56, %v823_v57 }
 0x22e   :  { %v819_v27 = vadd.f32 %v3354_v22, %v793_v8  ;;  %v947_v22 = vstv %s2535_s29  ;;  %v1435_v8 = vmul.f32 %v3531_v19, %v1432_v23  ;;  %s2584_s29 = sld [smem:[#allocation8 + $0x53]] }
 0x231   :  { %1415 = vrot.lane.b32.xlu2 %v1407_v55, %s2779_s26  ;;  %1419 = vrot.lane.b32.xlu1 %v1409_v53, %s2779_s26  ;;  %v827_v55 = vmul.f32 %v3552_v25, %v823_v57  ;;  %v880_v53 = vadd.f32 %v3418_v3, %v854_v60 }
 0x232   :  { %1417 = vrot.lane.b32.xlu0 %v1408_v59, %s2779_s26 }
 0x233   :  { %v3542_v51 = vpop.permute.xlu2 %1122  ;;  %v3544_v0 = vpop.permute.xlu1 %1090  ;;  %v831_v59 = vadd.f32 %v827_v55, %v821_v20  ;;  %v890_v3 = vadd.f32 %v886_v54, %v880_v53  ;;  %v826_v20 = vmul.f32 %v3531_v19, %v823_v57  ;;  %v1436_v57 = vmul.f32 %v3552_v25, %v1432_v23 }
 0x234   :  { %v3548_v52 = vpop.permute.xlu0 %1060 }
 0x235   :  { %v916_v48 = vadd.f32 %v3428_v40, %v890_v3  ;;  %v857_v11 = vadd.f32 %v3378_v15, %v831_v59  ;;  %v830_v53 = vadd.f32 %v826_v20, %v820_v4  ;;  %v3584_v15 = vld [vmem:[#allocation2 + $0x52] sm:$0xff] }
 0x236   :  { %v889_v59 = vmul.f32 %v3584_v15, %v885_v2  ;;  %v3591_v3 = vld [vmem:[#allocation2 + $0x18] sm:$0xff] }
 0x237   :  { %v856_v54 = vadd.f32 %v3404_v18, %v830_v53  ;;  %v942_v40 = vadd.f32 %v3414_v41, %v916_v48 }
 0x239   :  { %1421 = vrot.lane.b32.xlu2 %v1410_v47, %s2779_s26  ;;  %1443 = vrot.lane.b32.xlu1 %v1434_v61, %s2780_s28  ;;  %v1468_v47 = vstv %s2561_s27  ;;  %v829_v61 = vadd.f32 %v825_v21, %v819_v27  ;;  %v948_v27 = vmul.f32 %v3591_v3, %v947_v22  ;;  %v882_v23 = vadd.f32 %v3390_v24, %v856_v54  ;;  %v3604_v21 = vld [vmem:[#allocation2 + $0xa] sm:$0xff]  ;;  %s2583_s27 = sld [smem:[#allocation8 + $0x52]] }
 0x23a   :  { %1441 = vrot.lane.b32.xlu0 %v1433_v49, %s2780_s28  ;;  %v883_v49 = vadd.f32 %v3430_v37, %v857_v11  ;;  %v1469_v7 = vmul.f32 %v3560_v50, %v1468_v47  ;;  %v887_v53 = vmul.f32 %v3604_v21, %v885_v2  ;;  %v1470_v24 = vmul.f32 %v3604_v21, %v1468_v47 }
 0x23b   :  { %v3569_v60 = vpop.permute.xlu2 %1156  ;;  %v3571_v35 = vpop.permute.xlu1 %1096  ;;  %v855_v4 = vadd.f32 %v3406_v6, %v829_v61  ;;  %v952_v48 = vadd.f32 %v948_v27, %v942_v40 }
 0x23c   :  { %v3576_v55 = vpop.permute.xlu0 %1094  ;;  %v893_v37 = vadd.f32 %v889_v59, %v883_v49  ;;  %v3607_v49 = vld [vmem:[#allocation2 + $0x4a] sm:$0xff] }
 0x23d   :  { %v881_v18 = vadd.f32 %v3416_v14, %v855_v4  ;;  %v888_v14 = vmul.f32 %v3607_v49, %v885_v2  ;;  %v978_v61 = vadd.f32 %v3466_v63, %v952_v48  ;;  %v3623_v2 = vld [vmem:[#allocation2 + $0x19] sm:$0xff]  ;;  %v1494_v48 = vstv %s2562_s4  ;;  %s2586_s4 = sld [smem:[#allocation8 + $0x55]] }
 0x23e   :  { %v919_v6 = vadd.f32 %v3440_v36, %v893_v37  ;;  %v1472_v36 = vmul.f32 %v3584_v15, %v1468_v47  ;;  %v3627_v37 = vld [vmem:[#allocation2 + $0x68] sm:$0xff] }
 0x23f   :  { %v892_v40 = vadd.f32 %v888_v14, %v882_v23  ;;  %v1004_v59 = vadd.f32 %v3476_v32, %v978_v61  ;;  %v3640_v14 = vld [vmem:[#allocation2 + $0x60] sm:$0xff] }
 0x240   :  { %v945_v54 = vadd.f32 %v3426_v44, %v919_v6  ;;  %v951_v44 = vmul.f32 %v3627_v37, %v947_v22  ;;  %v950_v61 = vmul.f32 %v3640_v14, %v947_v22 }
 0x241   :  { %1445 = vrot.lane.b32.xlu2 %v1435_v8, %s2780_s28  ;;  %1477 = vrot.lane.b32.xlu1 %v1469_v7, %s2779_s26  ;;  %v891_v8 = vadd.f32 %v887_v53, %v881_v18  ;;  %v3611_v7 = vstv %s2538_s30  ;;  %v918_v63 = vadd.f32 %v3442_v26, %v892_v40  ;;  %s2569_s30 = sld [smem:[#allocation8 + $0x45]] }
 0x242   :  { %1447 = vrot.lane.b32.xlu0 %v1436_v57, %s2780_s28  ;;  %v1471_v57 = vmul.f32 %v3607_v49, %v1468_v47  ;;  %v1010_v4 = vmul.f32 %v3623_v2, %v3611_v7  ;;  %v955_v23 = vadd.f32 %v951_v44, %v945_v54 }
 0x243   :  { %v3596_v41 = vpop.permute.xlu2 %1180  ;;  %v3598_v20 = vpop.permute.xlu1 %1120  ;;  %v917_v32 = vadd.f32 %v3402_v16, %v891_v8  ;;  %v944_v18 = vadd.f32 %v3452_v28, %v918_v63  ;;  %v3644_v8 = vld [vmem:[#allocation2 + $0x20] sm:$0xff]  ;;  %v1495_v28 = vmul.f32 %v3560_v50, %v1494_v48  ;;  %v1071_v63 = vstv %s3618_s5  ;;  %s2587_s5 = sld [smem:[#allocation8 + $0x56]] }
 0x244   :  { %v3602_v11 = vpop.permute.xlu0 %1118  ;;  %v1014_v26 = vadd.f32 %v1010_v4, %v1004_v59  ;;  %v981_v16 = vadd.f32 %v3478_v34, %v955_v23  ;;  %v1496_v59 = vmul.f32 %v3604_v21, %v1494_v48  ;;  %v3655_v34 = vld [vmem:[#allocation2 + $0x69] sm:$0xff] }
 0x245   :  { %v943_v53 = vadd.f32 %v3454_v33, %v917_v32  ;;  %v954_v54 = vadd.f32 %v950_v61, %v944_v18  ;;  %v1530_v61 = vstv %s2564_s6  ;;  %s2589_s6 = sld [smem:[#allocation8 + $0x58]] }
 0x246   :  { %v1007_v40 = vadd.f32 %v3492_v39, %v981_v16  ;;  %v1040_v33 = vadd.f32 %v3462_v58, %v1014_v26  ;;  %v3665_v26 = vld [vmem:[#allocation2 + $0x1a] sm:$0xff] }
 0x247   :  { %v980_v18 = vadd.f32 %v3438_v62, %v954_v54  ;;  %v1072_v23 = vmul.f32 %v3665_v26, %v1071_v63 }
 0x248   :  { %v1066_v4 = vadd.f32 %v3525_v43, %v1040_v33  ;;  %v1531_v33 = vmul.f32 %v3591_v3, %v1530_v61 }
 0x249   :  { %1479 = vrot.lane.b32.xlu2 %v1470_v24, %s2779_s26  ;;  %1483 = vrot.lane.b32.xlu1 %v1472_v36, %s2779_s26  ;;  %v949_v24 = vmul.f32 %v3644_v8, %v947_v22  ;;  %v1497_v36 = vmul.f32 %v3607_v49, %v1494_v48  ;;  %v1013_v22 = vmul.f32 %v3655_v34, %v3611_v7 }
 0x24a   :  { %1481 = vrot.lane.b32.xlu0 %v1471_v57, %s2779_s26  ;;  %v1006_v43 = vadd.f32 %v3494_v38, %v980_v18  ;;  %v1076_v16 = vadd.f32 %v1072_v23, %v1066_v4  ;;  %v1556_v23 = vstv %s2565_s8  ;;  %s2592_s8 = sld [smem:[#allocation8 + $0x5b]] }
 0x24b   :  { %v3632_v47 = vpop.permute.xlu2 %1214  ;;  %v3634_v27 = vpop.permute.xlu1 %1154  ;;  %v953_v57 = vadd.f32 %v949_v24, %v943_v53  ;;  %v1017_v32 = vadd.f32 %v1013_v22, %v1007_v40  ;;  %v1498_v24 = vmul.f32 %v3584_v15, %v1494_v48 }
 0x24c   :  { %v3637_v6 = vpop.permute.xlu0 %1152  ;;  %v1102_v54 = vadd.f32 %v3544_v0, %v1076_v16  ;;  %v1133_v0 = vstv %s2544_s7  ;;  %v3699_v16 = vld [vmem:[#allocation2 + $0x30] sm:$0xff]  ;;  %s2590_s7 = sld [smem:[#allocation8 + $0x59]] }
 0x24d   :  { %v979_v39 = vadd.f32 %v3464_v46, %v953_v57  ;;  %v1043_v40 = vadd.f32 %v3474_v1, %v1017_v32 }
 0x24f   :  { %v1005_v46 = vadd.f32 %v3450_v30, %v979_v39  ;;  %v1069_v48 = vadd.f32 %v3548_v52, %v1043_v40  ;;  %v1128_v39 = vadd.f32 %v3520_v29, %v1102_v54  ;;  %v1557_v29 = vmul.f32 %v3591_v3, %v1556_v23 }
 0x250   :  { %v1534_v40 = vmul.f32 %v3627_v37, %v1530_v61 }
 0x251   :  { %1503 = vrot.lane.b32.xlu2 %v1495_v28, %s2780_s28  ;;  %1507 = vrot.lane.b32.xlu1 %v1497_v36, %s2780_s28  ;;  %v1532_v28 = vmul.f32 %v3644_v8, %v1530_v61  ;;  %v3674_v36 = vld [vmem:[#allocation2 + $0x61] sm:$0xff] }
 0x252   :  { %1505 = vrot.lane.b32.xlu0 %v1496_v59, %s2780_s28  ;;  %v1012_v62 = vmul.f32 %v3674_v36, %v3611_v7  ;;  %v3681_v59 = vld [vmem:[#allocation2 + $0x21] sm:$0xff] }
 0x253   :  { %v3662_v58 = vpop.permute.xlu2 %1220  ;;  %v1179_v44 = vpop.permute.xlu1 %1178  ;;  %v1011_v30 = vmul.f32 %v3681_v59, %v3611_v7  ;;  %v3693_v7 = vld [vmem:[#allocation2 + $0x6a] sm:$0xff] }
 0x254   :  { %v3668_v53 = vpop.permute.xlu0 %1158  ;;  %v1016_v38 = vadd.f32 %v1012_v62, %v1006_v43  ;;  %v1075_v32 = vmul.f32 %v3693_v7, %v1071_v63 }
 0x255   :  { %v1015_v57 = vadd.f32 %v1011_v30, %v1005_v46  ;;  %v1134_v46 = vmul.f32 %v3699_v16, %v1133_v0 }
 0x256   :  { %v1042_v4 = vadd.f32 %v3508_v31, %v1016_v38  ;;  %v1079_v43 = vadd.f32 %v1075_v32, %v1069_v48  ;;  %v1533_v31 = vmul.f32 %v3640_v14, %v1530_v61 }
 0x257   :  { %v1041_v52 = vadd.f32 %v3510_v13, %v1015_v57  ;;  %v1138_v54 = vadd.f32 %v1134_v46, %v1128_v39 }
 0x258   :  { %v1105_v62 = vadd.f32 %v3571_v35, %v1079_v43  ;;  %v3718_v35 = vstv %s2547_s9  ;;  %v3734_v43 = vld [vmem:[#allocation2 + $0x80] sm:$0xff]  ;;  %s2572_s9 = sld [smem:[#allocation8 + $0x48]] }
 0x259   :  { %1509 = vrot.lane.b32.xlu2 %v1498_v24, %s2780_s28  ;;  %1541 = vrot.lane.b32.xlu1 %v1532_v28, %s2779_s26  ;;  %v1067_v24 = vadd.f32 %v3522_v10, %v1041_v52  ;;  %v1068_v28 = vadd.f32 %v3490_v5, %v1042_v4  ;;  %v3713_v10 = vld [vmem:[#allocation2 + $0x62] sm:$0xff]  ;;  %v1164_v38 = vadd.f32 %v3637_v6, %v1138_v54  ;;  %v3745_v54 = vld [vmem:[#allocation2 + $0x78] sm:$0xff] }
 0x25a   :  { %1539 = vrot.lane.b32.xlu0 %v1531_v33, %s2779_s26  ;;  %v3708_v33 = vld [vmem:[#allocation2 + $0x22] sm:$0xff]  ;;  %v1074_v30 = vmul.f32 %v3713_v10, %v1071_v63  ;;  %v1131_v57 = vadd.f32 %v3542_v51, %v1105_v62  ;;  %v1137_v46 = vmul.f32 %v3734_v43, %v1133_v0 }
 0x25b   :  { %v3689_v1 = vpop.permute.xlu2 %1244  ;;  %v1185_v22 = vpop.permute.xlu1 %1184  ;;  %v1073_v13 = vmul.f32 %v3708_v33, %v1071_v63  ;;  %v1190_v39 = vadd.f32 %v1179_v44, %v1164_v38  ;;  %v3730_v63 = vld [vmem:[#allocation2 + $0x31] sm:$0xff]  ;;  %v1558_v44 = vmul.f32 %v3644_v8, %v1556_v23 }
 0x25c   :  { %v3696_v18 = vpop.permute.xlu0 %1182  ;;  %v1078_v4 = vadd.f32 %v1074_v30, %v1068_v28  ;;  %v1196_v52 = vmul.f32 %v3730_v63, %v3718_v35  ;;  %v1141_v28 = vadd.f32 %v1137_v46, %v1131_v57 }
 0x25d   :  { %v1077_v5 = vadd.f32 %v1073_v13, %v1067_v24  ;;  %v1560_v24 = vmul.f32 %v3627_v37, %v1556_v23 }
 0x25e   :  { %v1104_v6 = vadd.f32 %v3576_v55, %v1078_v4  ;;  %v1559_v55 = vmul.f32 %v3640_v14, %v1556_v23  ;;  %v1592_v4 = vstv %s2567_s10  ;;  %s2593_s10 = sld [smem:[#allocation8 + $0x5c]] }
 0x25f   :  { %v1103_v51 = vadd.f32 %v3506_v12, %v1077_v5  ;;  %v1136_v12 = vmul.f32 %v3745_v54, %v1133_v0 }
 0x261   :  { %1543 = vrot.lane.b32.xlu2 %v1533_v31, %s2779_s26  ;;  %1565 = vrot.lane.b32.xlu1 %v1557_v29, %s2780_s28  ;;  %v1130_v31 = vadd.f32 %v3598_v20, %v1104_v6  ;;  %v1200_v29 = vadd.f32 %v1196_v52, %v1190_v39  ;;  %v1129_v62 = vadd.f32 %v3602_v11, %v1103_v51  ;;  %v3750_v20 = vld [vmem:[#allocation2 + $0x38] sm:$0xff]  ;;  %v3757_v6 = vstv %s3727_s11  ;;  %s2575_s11 = sld [smem:[#allocation8 + $0x4b]] }
 0x262   :  { %1545 = vrot.lane.b32.xlu0 %v1534_v40, %s2779_s26  ;;  %v1167_v40 = vadd.f32 %v3668_v53, %v1141_v28  ;;  %v1135_v13 = vmul.f32 %v3750_v20, %v1133_v0  ;;  %v3759_v53 = vld [vmem:[#allocation2 + $0x81] sm:$0xff] }
 0x263   :  { %v3720_v61 = vpop.permute.xlu2 %1278  ;;  %v3722_v48 = vpop.permute.xlu1 %1218  ;;  %v1140_v11 = vadd.f32 %v1136_v12, %v1130_v31  ;;  %v1226_v5 = vadd.f32 %v3632_v47, %v1200_v29  ;;  %v1199_v52 = vmul.f32 %v3759_v53, %v3718_v35  ;;  %v1595_v47 = vmul.f32 %v3674_v36, %v1592_v4  ;;  %v3768_v31 = vld [vmem:[#allocation2 + $0x32] sm:$0xff] }
 0x264   :  { %v3725_v32 = vpop.permute.xlu0 %1216  ;;  %v1193_v38 = vadd.f32 %v1185_v22, %v1167_v40  ;;  %v1139_v39 = vadd.f32 %v1135_v13, %v1129_v62  ;;  %v1593_v22 = vmul.f32 %v3623_v2, %v1592_v4  ;;  %v1258_v29 = vmul.f32 %v3768_v31, %v3757_v6  ;;  %v3779_v12 = vld [vmem:[#allocation2 + $0x79] sm:$0xff] }
 0x265   :  { %v1198_v40 = vmul.f32 %v3779_v12, %v3718_v35 }
 0x266   :  { %v1165_v46 = vadd.f32 %v3634_v27, %v1139_v39  ;;  %v1203_v51 = vadd.f32 %v1199_v52, %v1193_v38 }
 0x269   :  { %1567 = vrot.lane.b32.xlu2 %v1558_v44, %s2780_s28  ;;  %1571 = vrot.lane.b32.xlu1 %v1560_v24, %s2780_s28  ;;  %v1166_v44 = vadd.f32 %v3569_v60, %v1140_v11  ;;  %v1594_v24 = vmul.f32 %v3681_v59, %v1592_v4  ;;  %v1191_v60 = vadd.f32 %v3596_v41, %v1165_v46  ;;  %v1618_v41 = vstv %s3754_s12  ;;  %s2595_s12 = sld [smem:[#allocation8 + $0x5e]] }
 0x26a   :  { %1569 = vrot.lane.b32.xlu0 %v1559_v55, %s2780_s28  ;;  %v1229_v11 = vadd.f32 %v3662_v58, %v1203_v51 }
 0x26b   :  { %v1303_v23 = vpop.permute.xlu2 %1302  ;;  %v1243_v30 = vpop.permute.xlu1 %1242  ;;  %v1192_v27 = vadd.f32 %v3696_v18, %v1166_v44  ;;  %v1619_v44 = vmul.f32 %v3623_v2, %v1618_v41 }
 0x26c   :  { %v1241_v57 = vpop.permute.xlu0 %1240 }
 0x26d   :  { %v1252_v0 = vadd.f32 %v1241_v57, %v1226_v5  ;;  %v3786_v5 = vld [vmem:[#allocation2 + $0x39] sm:$0xff]  ;;  %v1319_v57 = vstv %s2553_s13  ;;  %v1202_v39 = vadd.f32 %v1198_v40, %v1192_v27  ;;  %s2578_s13 = sld [smem:[#allocation8 + $0x4e]] }
 0x26e   :  { %v1197_v18 = vmul.f32 %v3786_v5, %v3718_v35 }
 0x26f   :  { %v1262_v28 = vadd.f32 %v1258_v29, %v1252_v0  ;;  %v1228_v58 = vadd.f32 %v3722_v48, %v1202_v39 }
 0x270   :  { %v1201_v46 = vadd.f32 %v1197_v18, %v1191_v60  ;;  %v3813_v18 = vld [vmem:[#allocation2 + $0x3a] sm:$0xff] }
 0x271   :  { %1601 = vrot.lane.b32.xlu2 %v1593_v22, %s2779_s26  ;;  %1605 = vrot.lane.b32.xlu1 %v1595_v47, %s2779_s26  ;;  %v1596_v22 = vmul.f32 %v3655_v34, %v1592_v4  ;;  %v1620_v47 = vmul.f32 %v3681_v59, %v1618_v41  ;;  %v1254_v40 = vadd.f32 %v3689_v1, %v1228_v58 }
 0x272   :  { %1603 = vrot.lane.b32.xlu0 %v1594_v24, %s2779_s26  ;;  %v3795_v24 = vld [vmem:[#allocation2 + $0x82] sm:$0xff]  ;;  %v1227_v29 = vadd.f32 %v3725_v32, %v1201_v46  ;;  %v1259_v39 = vmul.f32 %v3813_v18, %v3757_v6  ;;  %v3817_v46 = vld [vmem:[#allocation2 + $0x7a] sm:$0xff]  ;;  %v1621_v1 = vmul.f32 %v3674_v36, %v1618_v41 }
 0x273   :  { %v1309_v55 = vpop.permute.xlu2 %1308  ;;  %v1277_v62 = vpop.permute.xlu1 %1276  ;;  %v1261_v35 = vmul.f32 %v3795_v24, %v3757_v6 }
 0x274   :  { %v1288_v13 = vadd.f32 %v1277_v62, %v1262_v28  ;;  %v1247_v38 = vpop.permute.xlu0 %1246  ;;  %v1253_v28 = vadd.f32 %v1243_v30, %v1227_v29  ;;  %v1260_v30 = vmul.f32 %v3817_v46, %v3757_v6 }
 0x275   :  { %v1255_v0 = vadd.f32 %v1247_v38, %v1229_v11  ;;  %v1654_v38 = vstv %s3784_s15  ;;  %s2581_s15 = sld [smem:[#allocation9 + $0x2]] }
 0x276   :  { %v1314_v52 = vadd.f32 %v1303_v23, %v1288_v13  ;;  %v3803_v23 = vstv %s3774_s14  ;;  %v1264_v58 = vadd.f32 %v1260_v30, %v1254_v40  ;;  %s4061_s14 = sld [smem:[#allocation8 + $0x5f]] }
 0x277   :  { %v1337_v48 = vmul.f32 %v3496_v17, %v3803_v23  ;;  %v1265_v27 = vadd.f32 %v1261_v35, %v1255_v0  ;;  %v1263_v0 = vadd.f32 %v1259_v39, %v1253_v28 }
 0x278   :  { %v1320_v51 = vadd.f32 %v1319_v57, %v1314_v52 }
 0x279   :  { %1607 = vrot.lane.b32.xlu2 %v1596_v22, %s2779_s26  ;;  %1629 = vrot.lane.b32.xlu1 %v1620_v47, %s2780_s28  ;;  %v1655_v22 = vmul.f32 %v3665_v26, %v1654_v38  ;;  %v1289_v6 = vadd.f32 %v3720_v61, %v1263_v0  ;;  %v1336_v61 = vmul.f32 %v3481_v9, %v3803_v23 }
 0x27a   :  { %v1324_v4 = vmax.f32 %v1320_v51, 0.0  ;;  %1627 = vrot.lane.b32.xlu0 %v1619_v44, %s2780_s28  ;;  %v1622_v51 = vmul.f32 %v3655_v34, %v1618_v41 }
 0x27b   :  { %v1358_v60 = vpop.permute.xlu2 %1357  ;;  %v1283_v62 = vpop.permute.xlu1 %1282 }
 0x27c   :  { %1329 = vst.msk [vmem:[#allocation10 + $0x10] sm:$0xff] %vm755_vm3, %v1324_v4  ;;  %v3810_v32 = vadd.f32 %v1358_v60, %v1337_v48  ;;  %v1291_v13 = vadd.f32 %v1283_v62, %v1265_v27  ;;  %v1281_v11 = vpop.permute.xlu0 %1280  ;;  %v1656_v60 = vmul.f32 %v3708_v33, %v1654_v38  ;;  %v1658_v62 = vmul.f32 %v3693_v7, %v1654_v38 }
 0x27e   :  { %v1317_v52 = vadd.f32 %v1309_v55, %v1291_v13  ;;  %v1290_v55 = vadd.f32 %v1281_v11, %v1264_v58  ;;  %v1657_v13 = vmul.f32 %v3713_v10, %v1654_v38  ;;  %v1680_v38 = vstv %s2571_s16  ;;  %s4074_s16 = sld [smem:[#allocation8 + $0x51]] }
 0x27f   :  { %v1682_v58 = vmul.f32 %v3708_v33, %v1680_v38 }
 0x280   :  { %v1323_v47 = vadd.f32 %v1319_v57, %v1317_v52 }
 0x281   :  { %1631 = vrot.lane.b32.xlu2 %v1621_v1, %s2780_s28  ;;  %1663 = vrot.lane.b32.xlu1 %v1655_v22, %s2779_s26  ;;  %v1681_v1 = vmul.f32 %v3665_v26, %v1680_v38  ;;  %v1683_v22 = vmul.f32 %v3713_v10, %v1680_v38 }
 0x282   :  { %v1327_v44 = vmax.f32 %v1323_v47, 0.0  ;;  %1633 = vrot.lane.b32.xlu0 %v1622_v51, %s2780_s28  ;;  %v1335_v47 = vmul.f32 %v3484_v42, %v3803_v23  ;;  %v1396_v51 = vstv %s2557_s17  ;;  %s4081_s17 = sld [smem:[#allocation8 + $0x61]] }
 0x283   :  { %v1382_v35 = vpop.permute.xlu2 %1381  ;;  %v1307_v29 = vpop.permute.xlu1 %1306 }
 0x284   :  { %1332 = vst.msk [vmem:[#allocation10 + $0x58] sm:$0xff] %vm755_vm3, %v1327_v44  ;;  %v1316_v4 = vadd.f32 %v1307_v29, %v1290_v55  ;;  %v1305_v48 = vpop.permute.xlu0 %1304 }
 0x285   :  { %v1315_v27 = vadd.f32 %v1305_v48, %v1289_v6  ;;  %v1716_v48 = vstv %s2573_s18  ;;  %s2599_s18 = sld [smem:[#allocation8 + $0x62]] }
 0x286   :  { %v1322_v28 = vadd.f32 %v1319_v57, %v1316_v4 }
 0x287   :  { %v1321_v41 = vadd.f32 %v1319_v57, %v1315_v27 }
 0x288   :  { %v1326_v40 = vmax.f32 %v1322_v28, 0.0  ;;  %v1684_v28 = vmul.f32 %v3693_v7, %v1680_v38 }
 0x289   :  { %v1325_v11 = vmax.f32 %v1321_v41, 0.0  ;;  %1665 = vrot.lane.b32.xlu2 %v1656_v60, %s2779_s26  ;;  %1669 = vrot.lane.b32.xlu1 %v1658_v62, %s2779_s26  ;;  %v1718_v41 = vmul.f32 %v3750_v20, %v1716_v48  ;;  %v4351_v60 = vld [vmem:[#allocation29_spill] sm:$0xff] }
 0x28a   :  { %1331 = vst.msk [vmem:[#allocation10 + $0x50] sm:$0xff] %vm755_vm3, %v1326_v40  ;;  %1667 = vrot.lane.b32.xlu0 %v1657_v13, %s2779_s26  ;;  %v1338_v62 = vmul.f32 %v4351_v60, %v3803_v23  ;;  %v1717_v40 = vmul.f32 %v3699_v16, %v1716_v48 }
 0x28b   :  { %1330 = vst.msk [vmem:[#allocation10 + $0x18] sm:$0xff] %vm755_vm3, %v1325_v11  ;;  %v1416_v57 = vpop.permute.xlu2 %1415  ;;  %v1356_v39 = vpop.permute.xlu1 %1355 }
 0x28c   :  { %v1366_v52 = vadd.f32 %v1356_v39, %v1336_v61  ;;  %v1354_v30 = vpop.permute.xlu0 %1353 }
 0x28d   :  { %v1365_v44 = vadd.f32 %v1354_v30, %v1335_v47  ;;  %v1719_v47 = vmul.f32 %v3745_v54, %v1716_v48 }
 0x28e   :  { %v1392_v0 = vadd.f32 %v1382_v35, %v1366_v52  ;;  %v1397_v35 = vmul.f32 %v3527_v45, %v1396_v51  ;;  %v1400_v52 = vmul.f32 %v3552_v25, %v1396_v51 }
 0x291   :  { %1689 = vrot.lane.b32.xlu2 %v1681_v1, %s2780_s28  ;;  %1693 = vrot.lane.b32.xlu1 %v1683_v22, %s2780_s28  ;;  %v1742_v1 = vstv %s2574_s19  ;;  %s2585_s19 = sld [smem:[#allocation8 + $0x54]] }
 0x292   :  { %1691 = vrot.lane.b32.xlu0 %v1682_v58, %s2780_s28  ;;  %v1720_v58 = vmul.f32 %v3734_v43, %v1716_v48 }
 0x293   :  { %v1422_v55 = vpop.permute.xlu2 %1421  ;;  %v1380_v29 = vpop.permute.xlu1 %1379 }
 0x294   :  { %v1391_v6 = vadd.f32 %v1380_v29, %v1365_v44  ;;  %v1360_v4 = vpop.permute.xlu0 %1359  ;;  %v1399_v44 = vmul.f32 %v3531_v19, %v1396_v51 }
 0x295   :  { %v1368_v11 = vadd.f32 %v1360_v4, %v1338_v62 }
 0x296   :  { %v1401_v27 = vadd.f32 %v1397_v35, %v1391_v6  ;;  %v1398_v35 = vmul.f32 %v3535_v56, %v1396_v51  ;;  %v1458_v51 = vstv %s2560_s22  ;;  %s2601_s22 = sld [smem:[#allocation8 + $0x64]] }
 0x298   :  { %v1427_v13 = vadd.f32 %v1416_v57, %v1401_v27  ;;  %v1743_v57 = vmul.f32 %v3699_v16, %v1742_v1  ;;  %v1402_v27 = vadd.f32 %v1398_v35, %v1392_v0 }
 0x299   :  { %1695 = vrot.lane.b32.xlu2 %v1684_v28, %s2780_s28  ;;  %1727 = vrot.lane.b32.xlu1 %v1718_v41, %s2779_s26 }
 0x29a   :  { %1725 = vrot.lane.b32.xlu0 %v1717_v40, %s2779_s26  ;;  %v1746_v40 = vmul.f32 %v3734_v43, %v1742_v1 }
 0x29b   :  { %v1446_v61 = vpop.permute.xlu2 %1445  ;;  %v1386_v39 = vpop.permute.xlu1 %1385 }
 0x29c   :  { %v1394_v30 = vadd.f32 %v1386_v39, %v1368_v11  ;;  %v1384_v38 = vpop.permute.xlu0 %1383  ;;  %v1745_v11 = vmul.f32 %v3745_v54, %v1742_v1 }
 0x29d   :  { %v1393_v22 = vadd.f32 %v1384_v38, %v3810_v32 }
 0x29e   :  { %v1404_v23 = vadd.f32 %v1400_v52, %v1394_v30  ;;  %v1460_v52 = vmul.f32 %v3604_v21, %v1458_v51 }
 0x29f   :  { %v1403_v32 = vadd.f32 %v1399_v44, %v1393_v22 }
 0x2a0   :  { %v1430_v29 = vadd.f32 %v1422_v55, %v1404_v23  ;;  %v1744_v55 = vmul.f32 %v3750_v20, %v1742_v1 }
 0x2a1   :  { %1729 = vrot.lane.b32.xlu2 %v1719_v47, %s2779_s26  ;;  %1751 = vrot.lane.b32.xlu1 %v1743_v57, %s2780_s28 }
 0x2a2   :  { %1731 = vrot.lane.b32.xlu0 %v1720_v58, %s2779_s26  ;;  %v1459_v58 = vmul.f32 %v3560_v50, %v1458_v51 }
 0x2a3   :  { %v1480_v6 = vpop.permute.xlu2 %1479  ;;  %v1420_v4 = vpop.permute.xlu1 %1419 }
 0x2a4   :  { %v1429_v28 = vadd.f32 %v1420_v4, %v1403_v32  ;;  %v1418_v41 = vpop.permute.xlu0 %1417 }
 0x2a5   :  { %v1428_v48 = vadd.f32 %v1418_v41, %v1402_v27  ;;  %v1804_v41 = vstv %s2577_s24  ;;  %s2588_s24 = sld [smem:[#allocation8 + $0x57]] }
 0x2a6   :  { %v1455_v62 = vadd.f32 %v1446_v61, %v1429_v28  ;;  %v1778_v61 = vstv %s2576_s23  ;;  %s2602_s23 = sld [smem:[#allocation8 + $0x65]] }
 0x2a7   :  { %v1779_v47 = vmul.f32 %v3730_v63, %v1778_v61  ;;  %v1781_v1 = vmul.f32 %v3779_v12, %v1778_v61  ;;  %v1780_v57 = vmul.f32 %v3786_v5, %v1778_v61 }
 0x2a9   :  { %1753 = vrot.lane.b32.xlu2 %v1744_v55, %s2780_s28  ;;  %1757 = vrot.lane.b32.xlu1 %v1746_v40, %s2780_s28  ;;  %v1782_v55 = vmul.f32 %v3759_v53, %v1778_v61  ;;  %v1806_v40 = vmul.f32 %v3786_v5, %v1804_v41 }
 0x2aa   :  { %1755 = vrot.lane.b32.xlu0 %v1745_v11, %s2780_s28  ;;  %v1462_v11 = vmul.f32 %v3584_v15, %v1458_v51 }
 0x2ab   :  { %v1504_v39 = vpop.permute.xlu2 %1503  ;;  %v1444_v0 = vpop.permute.xlu1 %1443 }
 0x2ac   :  { %v1454_v30 = vadd.f32 %v1444_v0, %v1428_v48  ;;  %v1442_v38 = vpop.permute.xlu0 %1441  ;;  %v1461_v0 = vmul.f32 %v3607_v49, %v1458_v51 }
 0x2ad   :  { %v1453_v22 = vadd.f32 %v1442_v38, %v1427_v13 }
 0x2ae   :  { %v1464_v23 = vadd.f32 %v1460_v52, %v1454_v30 }
 0x2af   :  { %v1463_v35 = vadd.f32 %v1459_v58, %v1453_v22  ;;  %v1840_v22 = vstv %s2579_s0  ;;  %v1808_v58 = vmul.f32 %v3759_v53, %v1804_v41  ;;  %s2604_s0 = sld [smem:[#allocation8 + $0x67]] }
 0x2b0   :  { %v1490_v44 = vadd.f32 %v1480_v6, %v1464_v23  ;;  %v1805_v6 = vmul.f32 %v3730_v63, %v1804_v41 }
 0x2b1   :  { %1787 = vrot.lane.b32.xlu2 %v1779_v47, %s2779_s26  ;;  %1791 = vrot.lane.b32.xlu1 %v1781_v1, %s2779_s26  ;;  %v1807_v1 = vmul.f32 %v3779_v12, %v1804_v41  ;;  %v1844_v41 = vmul.f32 %v3795_v24, %v1840_v22 }
 0x2b2   :  { %1789 = vrot.lane.b32.xlu0 %v1780_v57, %s2779_s26  ;;  %v1841_v57 = vmul.f32 %v3768_v31, %v1840_v22 }
 0x2b3   :  { %v1510_v32 = vpop.permute.xlu2 %1509  ;;  %v1478_v13 = vpop.permute.xlu1 %1477 }
 0x2b4   :  { %v1489_v4 = vadd.f32 %v1478_v13, %v1463_v35  ;;  %v1448_v27 = vpop.permute.xlu0 %1447 }
 0x2b5   :  { %v1456_v28 = vadd.f32 %v1448_v27, %v1430_v29 }
 0x2b6   :  { %v1515_v48 = vadd.f32 %v1504_v39, %v1489_v4  ;;  %v1465_v39 = vadd.f32 %v1461_v0, %v1455_v62  ;;  %v1520_v62 = vstv %s2563_s25  ;;  %s2605_s25 = sld [smem:[#allocation8 + $0x68]] }
 0x2b7   :  { %v1466_v52 = vadd.f32 %v1462_v11, %v1456_v28  ;;  %v1523_v13 = vmul.f32 %v3640_v14, %v1520_v62  ;;  %v1521_v0 = vmul.f32 %v3591_v3, %v1520_v62 }
 0x2b9   :  { %1793 = vrot.lane.b32.xlu2 %v1782_v55, %s2779_s26  ;;  %1815 = vrot.lane.b32.xlu1 %v1806_v40, %s2780_s28  ;;  %v1842_v55 = vmul.f32 %v3813_v18, %v1840_v22  ;;  %v1843_v40 = vmul.f32 %v3817_v46, %v1840_v22 }
 0x2ba   :  { %1813 = vrot.lane.b32.xlu0 %v1805_v6, %s2780_s28  ;;  %v1522_v6 = vmul.f32 %v3644_v8, %v1520_v62 }
 0x2bb   :  { %v1544_v29 = vpop.permute.xlu2 %1543  ;;  %v1484_v30 = vpop.permute.xlu1 %1483 }
 0x2bc   :  { %v1492_v38 = vadd.f32 %v1484_v30, %v1466_v52  ;;  %v1482_v61 = vpop.permute.xlu0 %1481 }
 0x2bd   :  { %v1491_v23 = vadd.f32 %v1482_v61, %v1465_v39  ;;  %v1525_v39 = vadd.f32 %v1521_v0, %v1515_v48 }
 0x2be   :  { %v1518_v47 = vadd.f32 %v1510_v32, %v1492_v38 }
 0x2c1   :  { %1817 = vrot.lane.b32.xlu2 %v1807_v1, %s2780_s28  ;;  %1849 = vrot.lane.b32.xlu1 %v1841_v57, %s2779_s26 }
 0x2c2   :  { %1819 = vrot.lane.b32.xlu0 %v1808_v58, %s2780_s28 }
 0x2c3   :  { %v1568_v51 = vpop.permute.xlu2 %1567  ;;  %v1508_v35 = vpop.permute.xlu1 %1507 }
 0x2c4   :  { %v1517_v4 = vadd.f32 %v1508_v35, %v1491_v23  ;;  %v1506_v27 = vpop.permute.xlu0 %1505  ;;  %v1866_v23 = vstv %s2580_s1  ;;  %v1582_v35 = vstv %s2566_s2  ;;  %s2607_s1 = sld [smem:[#allocation8 + $0x6a]] }
 0x2c5   :  { %v1516_v32 = vadd.f32 %v1506_v27, %v1490_v44  ;;  %v1869_v57 = vmul.f32 %v3817_v46, %v1866_v23  ;;  %v1868_v58 = vmul.f32 %v3813_v18, %v1866_v23  ;;  %s2591_s2 = sld [smem:[#allocation8 + $0x5a]] }
 0x2c6   :  { %v1527_v28 = vadd.f32 %v1523_v13, %v1517_v4  ;;  %v1524_v13 = vmul.f32 %v3627_v37, %v1520_v62 }
 0x2c7   :  { %v1526_v44 = vadd.f32 %v1522_v6, %v1516_v32  ;;  %v1870_v6 = vmul.f32 %v3795_v24, %v1866_v23 }
 0x2c8   :  { %v1553_v11 = vadd.f32 %v1544_v29, %v1527_v28  ;;  %v1867_v29 = vmul.f32 %v3768_v31, %v1866_v23  ;;  %v1528_v27 = vadd.f32 %v1524_v13, %v1518_v47 }
 0x2c9   :  { %1851 = vrot.lane.b32.xlu2 %v1842_v55, %s2779_s26  ;;  %1855 = vrot.lane.b32.xlu1 %v1844_v41, %s2779_s26  ;;  %v1917_v41 = vstv %s2583_s27  ;;  %s2608_s27 = sld [smem:[#allocation8 + $0x6b]] }
 0x2ca   :  { %1853 = vrot.lane.b32.xlu0 %v1843_v40, %s2779_s26  ;;  %v1919_v0 = vmul.f32 %v3481_v9, %v1917_v41  ;;  %v1920_v9 = vmul.f32 %v3496_v17, %v1917_v41 }
 0x2cb   :  { %v1602_v52 = vpop.permute.xlu2 %1601  ;;  %v1542_v30 = vpop.permute.xlu1 %1541 }
 0x2cc   :  { %v1552_v38 = vadd.f32 %v1542_v30, %v1526_v44  ;;  %v1540_v61 = vpop.permute.xlu0 %1539  ;;  %v1918_v44 = vmul.f32 %v3484_v42, %v1917_v41  ;;  %v1586_v30 = vmul.f32 %v3655_v34, %v1582_v35  ;;  %v1584_v34 = vmul.f32 %v3681_v59, %v1582_v35 }
 0x2cd   :  { %v1551_v22 = vadd.f32 %v1540_v61, %v1525_v39  ;;  %v1943_v61 = vstv %s2584_s29  ;;  %s2594_s29 = sld [smem:[#allocation8 + $0x5d]] }
 0x2ce   :  { %v1578_v1 = vadd.f32 %v1568_v51, %v1552_v38  ;;  %v1583_v51 = vmul.f32 %v3623_v2, %v1582_v35 }
 0x2d1   :  { %1875 = vrot.lane.b32.xlu2 %v1867_v29, %s2780_s28  ;;  %1879 = vrot.lane.b32.xlu1 %v1869_v57, %s2780_s28  ;;  %v1921_v29 = vmul.f32 %v4351_v60, %v1917_v41  ;;  %v1585_v57 = vmul.f32 %v3674_v36, %v1582_v35 }
 0x2d2   :  { %1877 = vrot.lane.b32.xlu0 %v1868_v58, %s2780_s28 }
 0x2d3   :  { %v1608_v48 = vpop.permute.xlu2 %1607  ;;  %v1566_v4 = vpop.permute.xlu1 %1565 }
 0x2d4   :  { %v1577_v32 = vadd.f32 %v1566_v4, %v1551_v22  ;;  %v1546_v28 = vpop.permute.xlu0 %1545  ;;  %v1588_v4 = vadd.f32 %v1584_v34, %v1578_v1  ;;  %v3943_v1 = vstv %s2569_s30  ;;  %s2603_s30 = sld [smem:[#allocation8 + $0x66]] }
 0x2d5   :  { %v1554_v55 = vadd.f32 %v1546_v28, %v1528_v27  ;;  %v3935_v28 = vld [vmem:[#allocation2 + $0x50] sm:$0xff] }
 0x2d6   :  { %v1587_v40 = vadd.f32 %v1583_v51, %v1577_v32  ;;  %v1947_v35 = vmul.f32 %v3935_v28, %v1943_v61 }
 0x2d8   :  { %v3914_v62 = vadd.f32 %v1602_v52, %v1587_v40  ;;  %v1944_v52 = vmul.f32 %v3484_v42, %v1943_v61 }
 0x2d9   :  { %1881 = vrot.lane.b32.xlu2 %v1870_v6, %s2780_s28  ;;  %1928 = vrot.lane.b32.xlu1 %v1919_v0, %s2779_s26  ;;  %v1646_v0 = vmul.f32 %v3708_v33, %v3943_v1 }
 0x2da   :  { %1926 = vrot.lane.b32.xlu0 %v1918_v44, %s2779_s26 }
 0x2db   :  { %v1632_v2 = vpop.permute.xlu2 %1631  ;;  %v1572_v47 = vpop.permute.xlu1 %1571 }
 0x2dc   :  { %v1580_v39 = vadd.f32 %v1572_v47, %v1554_v55  ;;  %v1570_v38 = vpop.permute.xlu0 %1569  ;;  %v3938_v55 = vld [vmem:[#allocation2 + $0x48] sm:$0xff]  ;;  %v1979_v47 = vstv %s2586_s4  ;;  %s2606_s4 = sld [smem:[#allocation8 + $0x69]] }
 0x2dd   :  { %v1579_v23 = vadd.f32 %v1570_v38, %v1553_v11  ;;  %v1946_v41 = vmul.f32 %v3938_v55, %v1943_v61  ;;  %v1982_v38 = vmul.f32 %v3531_v19, %v1979_v47 }
 0x2de   :  { %v1590_v22 = vadd.f32 %v1586_v30, %v1580_v39  ;;  %v1980_v39 = vmul.f32 %v3527_v45, %v1979_v47  ;;  %v1983_v45 = vmul.f32 %v3552_v25, %v1979_v47 }
 0x2df   :  { %v1589_v11 = vadd.f32 %v1585_v57, %v1579_v23 }
 0x2e0   :  { %v3924_v58 = vadd.f32 %v1608_v48, %v1590_v22  ;;  %v3932_v48 = vld [vmem:[#allocation2 + $0x8] sm:$0xff] }
 0x2e1   :  { %1930 = vrot.lane.b32.xlu2 %v1920_v9, %s2779_s26  ;;  %1952 = vrot.lane.b32.xlu1 %v1944_v52, %s2780_s28  ;;  %v1945_v32 = vmul.f32 %v3932_v48, %v1943_v61  ;;  %v1981_v61 = vmul.f32 %v3535_v56, %v1979_v47  ;;  %v2005_v52 = vstv %s2587_s5  ;;  %v3964_v56 = vld [vmem:[#allocation2 + $0x1] sm:$0xff]  ;;  %s2609_s5 = sld [smem:[#allocation9 + $0x3]] }
 0x2e2   :  { %1932 = vrot.lane.b32.xlu0 %v1921_v29, %s2779_s26  ;;  %v3961_v29 = vld [vmem:[#allocation2 + $0x9] sm:$0xff]  ;;  %v2006_v57 = vmul.f32 %v3964_v56, %v2005_v52 }
 0x2e3   :  { %v1666_v13 = vpop.permute.xlu2 %1665  ;;  %v1606_v17 = vpop.permute.xlu1 %1605  ;;  %v2007_v19 = vmul.f32 %v3961_v29, %v2005_v52 }
 0x2e4   :  { %v1615_v42 = vadd.f32 %v1606_v17, %v1589_v11  ;;  %v1604_v27 = vpop.permute.xlu0 %1603  ;;  %v2041_v17 = vstv %s2589_s6  ;;  %s2781_s6 = smov [#allocation10]  }
 0x2e5   :  { %v1614_v60 = vadd.f32 %v1604_v27, %v1588_v4  ;;  %v3974_v4 = vld [vmem:[#allocation2 + $0x49] sm:$0xff]  ;;  %v2042_v27 = vmul.f32 %v3560_v50, %v2041_v17  ;;  %v2044_v50 = vmul.f32 %v3607_v49, %v2041_v17 }
 0x2e6   :  { %v3930_v51 = vadd.f32 %v1632_v2, %v1615_v42  ;;  %v2008_v42 = vmul.f32 %v3974_v4, %v2005_v52 }
 0x2e9   :  { %1954 = vrot.lane.b32.xlu2 %v1945_v32, %s2780_s28  ;;  %1958 = vrot.lane.b32.xlu1 %v1947_v35, %s2780_s28 }
 0x2ea   :  { %1956 = vrot.lane.b32.xlu0 %v1946_v41, %s2780_s28 }
 0x2eb   :  { %v3946_v40 = vpop.permute.xlu2 %1689  ;;  %v1630_v6 = vpop.permute.xlu1 %1629 }
 0x2ec   :  { %v1640_v44 = vadd.f32 %v1630_v6, %v1614_v60  ;;  %v1628_v2 = vpop.permute.xlu0 %1627  ;;  %v2009_v60 = vmul.f32 %v3552_v25, %v2005_v52  ;;  %v2043_v6 = vmul.f32 %v3604_v21, %v2041_v17 }
 0x2ee   :  { %v1650_v30 = vadd.f32 %v1646_v0, %v1640_v44  ;;  %v2045_v0 = vmul.f32 %v3584_v15, %v2041_v17  ;;  %v1645_v17 = vmul.f32 %v3665_v26, %v3943_v1  ;;  %v1706_v26 = vstv %s2572_s9 }
 0x2f0   :  { %v3953_v23 = vadd.f32 %v1666_v13, %v1650_v30  ;;  %v2067_v30 = vstv %s2590_s7  ;;  %s2483_s7 = sshll.u32 %s2781_s6, 4  ;;  %s2484_s7 = int_to_ptr.vmem [resolvable:$true] %s2483_s7 }
 0x2f1   :  { %1988 = vrot.lane.b32.xlu2 %v1980_v39, %s2779_s26  ;;  %1992 = vrot.lane.b32.xlu1 %v1982_v38, %s2779_s26  ;;  %v3998_v39 = vld [vmem:[#allocation2 + $0x2] sm:$0xff]  ;;  %v2069_v52 = vmul.f32 %v3604_v21, %v2067_v30  ;;  %v2071_v21 = vmul.f32 %v3584_v15, %v2067_v30 }
 0x2f2   :  { %1990 = vrot.lane.b32.xlu0 %v1981_v61, %s2779_s26  ;;  %v2068_v38 = vmul.f32 %v3998_v39, %v2067_v30  ;;  %v2070_v61 = vmul.f32 %v3607_v49, %v2067_v30  ;;  %v2103_v49 = vstv %s2592_s8 }
 0x2f3   :  { %v3958_v33 = vpop.permute.xlu2 %1695  ;;  %v1664_v22 = vpop.permute.xlu1 %1663 }
 0x2f4   :  { %v1634_v9 = vpop.permute.xlu0 %1633 }
 0x2f9   :  { %1994 = vrot.lane.b32.xlu2 %v1983_v45, %s2779_s26  ;;  %2016 = vrot.lane.b32.xlu1 %v2007_v19, %s2780_s28  ;;  %v1639_v45 = vadd.f32 %v1628_v2, %v3914_v62  ;;  %v2104_v62 = vmul.f32 %v3591_v3, %v2103_v49  ;;  %v1642_v2 = vadd.f32 %v1634_v9, %v3924_v58  ;;  %v2129_v3 = vstv %s2593_s10  ;;  %v4027_v9 = vld [vmem:[#allocation2 + $0x18] sm:$0xff]  ;;  %s2485_s10 = sshll.u32 %s4261_s3, 4  ;;  %s2486_s10 = int_to_ptr.hbm [resolvable:$true] %s2485_s10 }
 0x2fa   :  { %2014 = vrot.lane.b32.xlu0 %v2006_v57, %s2780_s28  ;;  %v2106_v58 = vmul.f32 %v3640_v14, %v2103_v49 }
 0x2fb   :  { %v3970_v34 = vpop.permute.xlu2 %1729  ;;  %v1670_v11 = vpop.permute.xlu1 %1669 }
 0x2fc   :  { %v3972_v13 = vpop.permute.xlu0 %1667 }
 0x301   :  { %2018 = vrot.lane.b32.xlu2 %v2008_v42, %s2780_s28  ;;  %2050 = vrot.lane.b32.xlu1 %v2042_v27, %s2779_s26  ;;  %v1649_v27 = vadd.f32 %v1645_v17, %v1639_v45 }
 0x302   :  { %2020 = vrot.lane.b32.xlu0 %v2009_v60, %s2780_s28  ;;  %v2105_v60 = vmul.f32 %v3644_v8, %v2103_v49 }
 0x303   :  { %v3982_v32 = vpop.permute.xlu2 %1753  ;;  %v3984_v35 = vpop.permute.xlu1 %1693 }
 0x304   :  { %v3986_v41 = vpop.permute.xlu0 %1691 }
 0x309   :  { %2052 = vrot.lane.b32.xlu2 %v2043_v6, %s2779_s26  ;;  %2056 = vrot.lane.b32.xlu1 %v2045_v0, %s2779_s26  ;;  %v1675_v6 = vadd.f32 %v1664_v22, %v1649_v27  ;;  %v1648_v22 = vmul.f32 %v3693_v7, %v3943_v1  ;;  %v2107_v27 = vmul.f32 %v3627_v37, %v2103_v49 }
 0x30a   :  { %2054 = vrot.lane.b32.xlu0 %v2044_v50, %s2779_s26  ;;  %v1647_v7 = vmul.f32 %v3713_v10, %v3943_v1  ;;  %v1710_v1 = vmul.f32 %v3734_v43, %v1706_v26  ;;  %v1708_v43 = vmul.f32 %v3750_v20, %v1706_v26 }
 0x30b   :  { %v3994_v25 = vpop.permute.xlu2 %1787  ;;  %v3996_v44 = vpop.permute.xlu1 %1727  ;;  %v1701_v15 = vadd.f32 %v3946_v40, %v1675_v6 }
 0x30c   :  { %v1726_v47 = vpop.permute.xlu0 %1725  ;;  %v1651_v6 = vadd.f32 %v1647_v7, %v3930_v51 }
 0x311   :  { %2076 = vrot.lane.b32.xlu2 %v2068_v38, %s2780_s28  ;;  %2080 = vrot.lane.b32.xlu1 %v2070_v61, %s2780_s28  ;;  %v1652_v38 = vadd.f32 %v1648_v22, %v1642_v2  ;;  %v1707_v61 = vmul.f32 %v3699_v16, %v1706_v26  ;;  %v1768_v16 = vstv %s2575_s11  ;;  %v4048_v2 = vld [vmem:[#allocation2 + $0x68] sm:$0xff]  ;;  %v2132_v22 = vmul.f32 %v3640_v14, %v2129_v3 }
 0x312   :  { %2078 = vrot.lane.b32.xlu0 %v2069_v52, %s2780_s28  ;;  %v2130_v52 = vmul.f32 %v4027_v9, %v2129_v3  ;;  %v1769_v10 = vmul.f32 %v3730_v63, %v1768_v16  ;;  %v1709_v63 = vmul.f32 %v3745_v54, %v1706_v26  ;;  %v1772_v54 = vmul.f32 %v3759_v53, %v1768_v16 }
 0x313   :  { %v4007_v19 = vpop.permute.xlu2 %1793  ;;  %v1752_v57 = vpop.permute.xlu1 %1751  ;;  %v1678_v45 = vadd.f32 %v1670_v11, %v1652_v38  ;;  %v1711_v17 = vadd.f32 %v1707_v61, %v1701_v15  ;;  %v2133_v15 = vmul.f32 %v4048_v2, %v2129_v3  ;;  %v1702_v38 = vadd.f32 %v3986_v41, %v3953_v23 }
 0x314   :  { %v1732_v42 = vpop.permute.xlu0 %1731  ;;  %v1830_v41 = vstv %s2578_s13 }
 0x315   :  { %v1737_v40 = vadd.f32 %v1726_v47, %v1711_v17  ;;  %v1704_v11 = vadd.f32 %v3958_v33, %v1678_v45  ;;  %v2131_v47 = vmul.f32 %v3644_v8, %v2129_v3  ;;  %v1712_v23 = vadd.f32 %v1708_v43, %v1702_v38  ;;  %v4065_v17 = vld [vmem:[#allocation2 + $0x19] sm:$0xff] }
 0x316   :  { %v1831_v7 = vmul.f32 %v3768_v31, %v1830_v41  ;;  %v4098_v38 = vstv %s4074_s16 }
 0x317   :  { %v1763_v37 = vadd.f32 %v1752_v57, %v1737_v40  ;;  %v1714_v57 = vadd.f32 %v1710_v1, %v1704_v11  ;;  %v1738_v45 = vadd.f32 %v3996_v44, %v1712_v23 }
 0x319   :  { %2082 = vrot.lane.b32.xlu2 %v2071_v21, %s2780_s28  ;;  %2114 = vrot.lane.b32.xlu1 %v2105_v60, %s2779_s26  ;;  %v1773_v51 = vadd.f32 %v1769_v10, %v1763_v37  ;;  %v1740_v8 = vadd.f32 %v1732_v42, %v1714_v57  ;;  %v1770_v37 = vmul.f32 %v3786_v5, %v1768_v16  ;;  %v2191_v10 = vstv %s4061_s14 }
 0x31a   :  { %2112 = vrot.lane.b32.xlu0 %v2104_v62, %s2779_s26  ;;  %v1677_v62 = vadd.f32 %v3972_v13, %v1651_v6  ;;  %v2192_v5 = vmul.f32 %v4065_v17, %v2191_v10 }
 0x31b   :  { %v4018_v0 = vpop.permute.xlu2 %1817  ;;  %v1758_v50 = vpop.permute.xlu1 %1757  ;;  %v1799_v14 = vadd.f32 %v3994_v25, %v1773_v51 }
 0x31c   :  { %v4023_v30 = vpop.permute.xlu0 %1755  ;;  %v1703_v33 = vadd.f32 %v3984_v35, %v1677_v62  ;;  %v1892_v62 = vstv %s2581_s15 }
 0x31e   :  { %v1713_v61 = vadd.f32 %v1709_v63, %v1703_v33 }
 0x320   :  { %v1739_v25 = vadd.f32 %v3970_v34, %v1713_v61 }
 0x321   :  { %2116 = vrot.lane.b32.xlu2 %v2106_v58, %s2779_s26  ;;  %2138 = vrot.lane.b32.xlu1 %v2130_v52, %s2780_s28  ;;  %v1766_v58 = vadd.f32 %v1758_v50, %v1740_v8  ;;  %v2165_v52 = vstv %s2595_s12 }
 0x322   :  { %2118 = vrot.lane.b32.xlu0 %v2107_v27, %s2779_s26  ;;  %v2166_v20 = vmul.f32 %v4065_v17, %v2165_v52  ;;  %v2168_v26 = vmul.f32 %v3674_v36, %v2165_v52  ;;  %v2167_v27 = vmul.f32 %v3681_v59, %v2165_v52  ;;  %v1765_v53 = vadd.f32 %v4023_v30, %v1739_v25 }
 0x323   :  { %v4036_v21 = vpop.permute.xlu2 %1851  ;;  %v4038_v60 = vpop.permute.xlu1 %1791  ;;  %v1776_v50 = vadd.f32 %v1772_v54, %v1766_v58  ;;  %v1764_v36 = vadd.f32 %v3982_v32, %v1738_v45  ;;  %v1771_v59 = vmul.f32 %v3779_v12, %v1768_v16  ;;  %v4085_v32 = vld [vmem:[#allocation2 + $0x69] sm:$0xff]  ;;  %v4088_v12 = vld [vmem:[#allocation2 + $0x21] sm:$0xff]  ;;  %v1834_v16 = vmul.f32 %v3795_v24, %v1830_v41 }
 0x324   :  { %v4042_v49 = vpop.permute.xlu0 %1789  ;;  %v2169_v33 = vmul.f32 %v4085_v32, %v2165_v52  ;;  %v1832_v52 = vmul.f32 %v3813_v18, %v1830_v41  ;;  %v1833_v54 = vmul.f32 %v3817_v46, %v1830_v41  ;;  %v4113_v45 = vld [vmem:[#allocation2 + $0x1a] sm:$0xff] }
 0x325   :  { %v1802_v31 = vadd.f32 %v4007_v19, %v1776_v50  ;;  %v1775_v30 = vadd.f32 %v1771_v59, %v1765_v53  ;;  %v2193_v19 = vmul.f32 %v4088_v12, %v2191_v10  ;;  %v2195_v50 = vmul.f32 %v4085_v32, %v2191_v10 }
 0x327   :  { %v1801_v51 = vadd.f32 %v4038_v60, %v1775_v30  ;;  %v1910_v60 = vmul.f32 %v3938_v55, %v4098_v38  ;;  %v4110_v55 = vld [vmem:[#allocation2 + $0x61] sm:$0xff] }
 0x329   :  { %2140 = vrot.lane.b32.xlu2 %v2131_v47, %s2780_s28  ;;  %2144 = vrot.lane.b32.xlu1 %v2133_v15, %s2780_s28  ;;  %v1774_v15 = vadd.f32 %v1770_v37, %v1764_v36  ;;  %v1827_v24 = vadd.f32 %v4018_v0, %v1801_v51  ;;  %v4128_v37 = vld [vmem:[#allocation2 + $0x62] sm:$0xff] }
 0x32a   :  { %2142 = vrot.lane.b32.xlu0 %v2132_v22, %s2780_s28 }
 0x32b   :  { %v1876_v13 = vpop.permute.xlu2 %1875  ;;  %v1816_v35 = vpop.permute.xlu1 %1815  ;;  %v1800_v22 = vadd.f32 %v4042_v49, %v1774_v15 }
 0x32c   :  { %v1814_v3 = vpop.permute.xlu0 %1813 }
 0x32d   :  { %v1825_v42 = vadd.f32 %v1814_v3, %v1799_v14  ;;  %v1826_v43 = vadd.f32 %v1816_v35, %v1800_v22  ;;  %v2227_v3 = vstv %s4081_s17  ;;  %v2194_v35 = vmul.f32 %v4110_v55, %v2191_v10 }
 0x32e   :  { %v2228_v0 = vmul.f32 %v4113_v45, %v2227_v3 }
 0x32f   :  { %v1835_v44 = vadd.f32 %v1831_v7, %v1825_v42  ;;  %v1836_v42 = vadd.f32 %v1832_v52, %v1826_v43 }
 0x331   :  { %2174 = vrot.lane.b32.xlu2 %v2166_v20, %s2779_s26  ;;  %2178 = vrot.lane.b32.xlu1 %v2168_v26, %s2779_s26  ;;  %v1837_v26 = vadd.f32 %v1833_v54, %v1827_v24  ;;  %v2289_v24 = vstv %s2601_s22  ;;  %v4152_v54 = vld [vmem:[#allocation2 + $0x30] sm:$0xff] }
 0x332   :  { %2176 = vrot.lane.b32.xlu0 %v2167_v27, %s2779_s26  ;;  %v1862_v27 = vadd.f32 %v4036_v21, %v1836_v42  ;;  %v2230_v21 = vmul.f32 %v4128_v37, %v2227_v3  ;;  %v2290_v42 = vmul.f32 %v4152_v54, %v2289_v24 }
 0x333   :  { %v1882_v40 = vpop.permute.xlu2 %1881  ;;  %v1850_v34 = vpop.permute.xlu1 %1849 }
 0x334   :  { %v1861_v11 = vadd.f32 %v1850_v34, %v1835_v44  ;;  %v1820_v6 = vpop.permute.xlu0 %1819  ;;  %v4122_v34 = vld [vmem:[#allocation2 + $0x22] sm:$0xff] }
 0x335   :  { %v1828_v47 = vadd.f32 %v1820_v6, %v1802_v31  ;;  %v2229_v59 = vmul.f32 %v4122_v34, %v2227_v3 }
 0x336   :  { %v1887_v1 = vadd.f32 %v1876_v13, %v1861_v11  ;;  %v4125_v11 = vld [vmem:[#allocation2 + $0x6a] sm:$0xff] }
 0x337   :  { %v1838_v8 = vadd.f32 %v1834_v16, %v1828_v47  ;;  %v2231_v31 = vmul.f32 %v4125_v11, %v2227_v3  ;;  %v4147_v3 = vld [vmem:[#allocation2 + $0x38] sm:$0xff] }
 0x338   :  { %v1893_v57 = vadd.f32 %v1892_v62, %v1887_v1  ;;  %v2291_v52 = vmul.f32 %v4147_v3, %v2289_v24 }
 0x339   :  { %2180 = vrot.lane.b32.xlu2 %v2169_v33, %s2779_s26  ;;  %2202 = vrot.lane.b32.xlu1 %v2193_v19, %s2780_s28  ;;  %v2253_v33 = vstv %s2599_s18 }
 0x33a   :  { %v1897_v63 = vmax.f32 %v1893_v57, 0.0  ;;  %2200 = vrot.lane.b32.xlu0 %v2192_v5, %s2780_s28  ;;  %v2254_v51 = vmul.f32 %v4113_v45, %v2253_v33  ;;  %v2256_v57 = vmul.f32 %v4128_v37, %v2253_v33  ;;  %v2673_v5 = vld [vmem:[#allocation2] sm:$0xff]  ;;  %v2255_v22 = vmul.f32 %v4122_v34, %v2253_v33 }
 0x33b   :  { %v1931_v13 = vpop.permute.xlu2 %1930  ;;  %v1856_v61 = vpop.permute.xlu1 %1855  ;;  %v1908_v16 = vmul.f32 %v2673_v5, %v4098_v38 }
 0x33c   :  { %1902 = vst.msk [vmem:[#allocation10 + $0x20] sm:$0xff] %vm755_vm3, %v1897_v63  ;;  %v4105_v49 = vadd.f32 %v1931_v13, %v1910_v60  ;;  %v1864_v58 = vadd.f32 %v1856_v61, %v1838_v8  ;;  %v1854_v14 = vpop.permute.xlu0 %1853 }
 0x33d   :  { %v1863_v25 = vadd.f32 %v1854_v14, %v1837_v26  ;;  %v2257_v14 = vmul.f32 %v4125_v11, %v2253_v33  ;;  %v2676_v26 = vld [vmem:[#allocation2 + $0x51] sm:$0xff] }
 0x33e   :  { %v1890_v23 = vadd.f32 %v1882_v40, %v1864_v58 }
 0x340   :  { %v1896_v20 = vadd.f32 %v1892_v62, %v1890_v23  ;;  %v1911_v23 = vmul.f32 %v3935_v28, %v4098_v38 }
 0x341   :  { %2204 = vrot.lane.b32.xlu2 %v2194_v35, %s2780_s28  ;;  %2236 = vrot.lane.b32.xlu1 %v2228_v0, %s2779_s26 }
 0x342   :  { %v1900_v18 = vmax.f32 %v1896_v20, 0.0  ;;  %2206 = vrot.lane.b32.xlu0 %v2195_v50, %s2780_s28 }
 0x343   :  { %v1955_v46 = vpop.permute.xlu2 %1954  ;;  %v1880_v41 = vpop.permute.xlu1 %1879 }
 0x344   :  { %1905 = vst.msk [vmem:[#allocation10 + $0x68] sm:$0xff] %vm755_vm3, %v1900_v18  ;;  %v1889_v7 = vadd.f32 %v1880_v41, %v1863_v25  ;;  %v1878_v53 = vpop.permute.xlu0 %1877  ;;  %v4159_v41 = vld [vmem:[#allocation2 + $0x78] sm:$0xff] }
 0x345   :  { %v1888_v44 = vadd.f32 %v1878_v53, %v1862_v27  ;;  %v2292_v27 = vmul.f32 %v4159_v41, %v2289_v24  ;;  %v4163_v53 = vld [vmem:[#allocation2 + $0x80] sm:$0xff] }
 0x346   :  { %v1895_v36 = vadd.f32 %v1892_v62, %v1889_v7 }
 0x347   :  { %v1894_v40 = vadd.f32 %v1892_v62, %v1888_v44  ;;  %v1909_v62 = vmul.f32 %v3932_v48, %v4098_v38  ;;  %v1969_v48 = vstv %s2585_s19  ;;  %v2293_v44 = vmul.f32 %v4163_v53, %v2289_v24 }
 0x348   :  { %v1899_v6 = vmax.f32 %v1895_v36, 0.0  ;;  %v1970_v43 = vmul.f32 %v3964_v56, %v1969_v48  ;;  %v1973_v50 = vmul.f32 %v2676_v26, %v1969_v48  ;;  %v1972_v36 = vmul.f32 %v3974_v4, %v1969_v48 }
 0x349   :  { %v1898_v10 = vmax.f32 %v1894_v40, 0.0  ;;  %2238 = vrot.lane.b32.xlu2 %v2229_v59, %s2779_s26  ;;  %2242 = vrot.lane.b32.xlu1 %v2231_v31, %s2779_s26 }
 0x34a   :  { %1904 = vst.msk [vmem:[#allocation10 + $0x60] sm:$0xff] %vm755_vm3, %v1899_v6  ;;  %2240 = vrot.lane.b32.xlu0 %v2230_v21, %s2779_s26 }
 0x34b   :  { %1903 = vst.msk [vmem:[#allocation10 + $0x28] sm:$0xff] %vm755_vm3, %v1898_v10  ;;  %v1989_v30 = vpop.permute.xlu2 %1988  ;;  %v1929_v1 = vpop.permute.xlu1 %1928 }
 0x34c   :  { %v1939_v47 = vadd.f32 %v1929_v1, %v1909_v62  ;;  %v1927_v15 = vpop.permute.xlu0 %1926 }
 0x34d   :  { %v1938_v63 = vadd.f32 %v1927_v15, %v1908_v16 }
 0x34e   :  { %v1965_v19 = vadd.f32 %v1955_v46, %v1939_v47  ;;  %v2315_v46 = vstv %s2602_s23 }
 0x34f   :  { %v2316_v7 = vmul.f32 %v4152_v54, %v2315_v46  ;;  %v2317_v4 = vmul.f32 %v4147_v3, %v2315_v46  ;;  %v2319_v47 = vmul.f32 %v4163_v53, %v2315_v46  ;;  %v2318_v15 = vmul.f32 %v4159_v41, %v2315_v46  ;;  %v2684_v46 = vld [vmem:[#allocation2 + $0x52] sm:$0xff] }
 0x351   :  { %2262 = vrot.lane.b32.xlu2 %v2254_v51, %s2780_s28  ;;  %2266 = vrot.lane.b32.xlu1 %v2256_v57, %s2780_s28  ;;  %v2679_v51 = vld [vmem:[#allocation2 + $0xa] sm:$0xff] }
 0x352   :  { %2264 = vrot.lane.b32.xlu0 %v2255_v22, %s2780_s28  ;;  %v2351_v22 = vstv %s2604_s0 }
 0x353   :  { %v1995_v60 = vpop.permute.xlu2 %1994  ;;  %v1953_v8 = vpop.permute.xlu1 %1952 }
 0x354   :  { %v1964_v13 = vadd.f32 %v1953_v8, %v1938_v63  ;;  %v1933_v61 = vpop.permute.xlu0 %1932 }
 0x355   :  { %v1941_v56 = vadd.f32 %v1933_v61, %v1911_v23  ;;  %v4183_v61 = vld [vmem:[#allocation2 + $0x39] sm:$0xff] }
 0x356   :  { %v1974_v58 = vadd.f32 %v1970_v43, %v1964_v13  ;;  %v4180_v43 = vld [vmem:[#allocation2 + $0x79] sm:$0xff]  ;;  %v2353_v24 = vmul.f32 %v4183_v61, %v2351_v22 }
 0x357   :  { %v2354_v13 = vmul.f32 %v4180_v43, %v2351_v22 }
 0x358   :  { %v2000_v35 = vadd.f32 %v1989_v30, %v1974_v58 }
 0x359   :  { %2268 = vrot.lane.b32.xlu2 %v2257_v14, %s2780_s28  ;;  %2300 = vrot.lane.b32.xlu1 %v2291_v52, %s2779_s26 }
 0x35a   :  { %2298 = vrot.lane.b32.xlu0 %v2290_v42, %s2779_s26 }
 0x35b   :  { %v2019_v0 = vpop.permute.xlu2 %2018  ;;  %v1959_v20 = vpop.permute.xlu1 %1958 }
 0x35c   :  { %v1967_v18 = vadd.f32 %v1959_v20, %v1941_v56  ;;  %v1957_v25 = vpop.permute.xlu0 %1956  ;;  %v2377_v20 = vstv %s2605_s25 }
 0x35d   :  { %v1966_v28 = vadd.f32 %v1957_v25, %v4105_v49  ;;  %v1971_v49 = vmul.f32 %v3961_v29, %v1969_v48  ;;  %v2031_v29 = vstv %s2588_s24 }
 0x35e   :  { %v1977_v38 = vadd.f32 %v1973_v50, %v1967_v18  ;;  %v2033_v57 = vmul.f32 %v2679_v51, %v2031_v29  ;;  %v2032_v58 = vmul.f32 %v3998_v39, %v2031_v29  ;;  %v4190_v50 = vld [vmem:[#allocation2 + $0x81] sm:$0xff]  ;;  %v2379_v18 = vmul.f32 %v4183_v61, %v2377_v20 }
 0x35f   :  { %v1976_v59 = vadd.f32 %v1972_v36, %v1966_v28  ;;  %v1975_v21 = vadd.f32 %v1971_v49, %v1965_v19  ;;  %v2355_v39 = vmul.f32 %v4190_v50, %v2351_v22  ;;  %v2035_v28 = vmul.f32 %v2684_v46, %v2031_v29 }
 0x360   :  { %v2003_v40 = vadd.f32 %v1995_v60, %v1977_v38  ;;  %v4177_v60 = vld [vmem:[#allocation2 + $0x31] sm:$0xff] }
 0x361   :  { %2302 = vrot.lane.b32.xlu2 %v2292_v27, %s2779_s26  ;;  %2324 = vrot.lane.b32.xlu1 %v2316_v7, %s2780_s28  ;;  %v2352_v8 = vmul.f32 %v4177_v60, %v2351_v22  ;;  %v2378_v25 = vmul.f32 %v4177_v60, %v2377_v20  ;;  %v2685_v38 = vld [vmem:[#allocation2 + $0x4a] sm:$0xff] }
 0x362   :  { %2304 = vrot.lane.b32.xlu0 %v2293_v44, %s2779_s26  ;;  %v2034_v27 = vmul.f32 %v2685_v38, %v2031_v29  ;;  %v2687_v29 = vld [vmem:[#allocation2 + $0x60] sm:$0xff] }
 0x363   :  { %v2053_v31 = vpop.permute.xlu2 %2052  ;;  %v1993_v6 = vpop.permute.xlu1 %1992 }
 0x364   :  { %v2002_v10 = vadd.f32 %v1993_v6, %v1976_v59  ;;  %v1991_v62 = vpop.permute.xlu0 %1990 }
 0x365   :  { %v2001_v30 = vadd.f32 %v1991_v62, %v1975_v21  ;;  %v4199_v62 = vld [vmem:[#allocation2 + $0x32] sm:$0xff] }
 0x366   :  { %v2028_v1 = vadd.f32 %v2019_v0, %v2002_v10  ;;  %v2380_v10 = vmul.f32 %v4180_v43, %v2377_v20 }
 0x369   :  { %2326 = vrot.lane.b32.xlu2 %v2317_v4, %s2780_s28  ;;  %2330 = vrot.lane.b32.xlu1 %v2319_v47, %s2780_s28  ;;  %v2381_v4 = vmul.f32 %v4190_v50, %v2377_v20  ;;  %v2093_v47 = vstv %s2591_s2 }
 0x36a   :  { %2328 = vrot.lane.b32.xlu0 %v2318_v15, %s2780_s28 }
 0x36b   :  { %v2077_v33 = vpop.permute.xlu2 %2076  ;;  %v2017_v19 = vpop.permute.xlu1 %2016 }
 0x36c   :  { %v2027_v5 = vadd.f32 %v2017_v19, %v2001_v30  ;;  %v2015_v16 = vpop.permute.xlu0 %2014 }
 0x36d   :  { %v2026_v48 = vadd.f32 %v2015_v16, %v2000_v35  ;;  %v4206_v16 = vld [vmem:[#allocation2 + $0x3a] sm:$0xff] }
 0x36e   :  { %v2037_v63 = vadd.f32 %v2033_v57, %v2027_v5 }
 0x36f   :  { %v2036_v52 = vadd.f32 %v2032_v58, %v2026_v48  ;;  %v4209_v48 = vld [vmem:[#allocation2 + $0x82] sm:$0xff] }
 0x370   :  { %v2063_v14 = vadd.f32 %v2053_v31, %v2037_v63  ;;  %v2413_v31 = vstv %s2607_s1 }
 0x371   :  { %2360 = vrot.lane.b32.xlu2 %v2352_v8, %s2779_s26  ;;  %2364 = vrot.lane.b32.xlu1 %v2354_v13, %s2779_s26  ;;  %v2414_v30 = vmul.f32 %v4199_v62, %v2413_v31  ;;  %v2415_v22 = vmul.f32 %v4206_v16, %v2413_v31  ;;  %v2417_v63 = vmul.f32 %v4209_v48, %v2413_v31  ;;  %v4212_v8 = vld [vmem:[#allocation2 + $0x7a] sm:$0xff] }
 0x372   :  { %2362 = vrot.lane.b32.xlu0 %v2353_v24, %s2779_s26  ;;  %v2416_v13 = vmul.f32 %v4212_v8, %v2413_v31  ;;  %v2691_v24 = vld [vmem:[#allocation2 + $0x20] sm:$0xff] }
 0x373   :  { %v2083_v23 = vpop.permute.xlu2 %2082  ;;  %v2051_v42 = vpop.permute.xlu1 %2050  ;;  %v2095_v58 = vmul.f32 %v2691_v24, %v2093_v47 }
 0x374   :  { %v2062_v35 = vadd.f32 %v2051_v42, %v2036_v52  ;;  %v2021_v56 = vpop.permute.xlu0 %2020 }
 0x375   :  { %v2029_v0 = vadd.f32 %v2021_v56, %v2003_v40  ;;  %v2038_v40 = vadd.f32 %v2034_v27, %v2028_v1  ;;  %v2097_v27 = vmul.f32 %v4048_v2, %v2093_v47 }
 0x376   :  { %v2088_v26 = vadd.f32 %v2077_v33, %v2062_v35  ;;  %v2096_v33 = vmul.f32 %v2687_v29, %v2093_v47 }
 0x377   :  { %v2039_v7 = vadd.f32 %v2035_v28, %v2029_v0 }
 0x379   :  { %2366 = vrot.lane.b32.xlu2 %v2355_v39, %s2779_s26  ;;  %2388 = vrot.lane.b32.xlu1 %v2379_v18, %s2780_s28  ;;  %v2439_v39 = vstv %s2608_s27 }
 0x37a   :  { %2386 = vrot.lane.b32.xlu0 %v2378_v25, %s2780_s28  ;;  %v2440_v46 = vmul.f32 %v4199_v62, %v2439_v39  ;;  %v2442_v28 = vmul.f32 %v4212_v8, %v2439_v39  ;;  %v2441_v38 = vmul.f32 %v4206_v16, %v2439_v39 }
 0x37b   :  { %v2117_v44 = vpop.permute.xlu2 %2116  ;;  %v2057_v36 = vpop.permute.xlu1 %2056 }
 0x37c   :  { %v2065_v49 = vadd.f32 %v2057_v36, %v2039_v7  ;;  %v2055_v59 = vpop.permute.xlu0 %2054 }
 0x37d   :  { %v2064_v6 = vadd.f32 %v2055_v59, %v2038_v40 }
 0x37e   :  { %v2091_v21 = vadd.f32 %v2083_v23, %v2065_v49 }
 0x381   :  { %2390 = vrot.lane.b32.xlu2 %v2380_v10, %s2780_s28  ;;  %2422 = vrot.lane.b32.xlu1 %v2414_v30, %s2779_s26 }
 0x382   :  { %2392 = vrot.lane.b32.xlu0 %v2381_v4, %s2780_s28 }
 0x383   :  { %v2141_v1 = vpop.permute.xlu2 %2140  ;;  %v2081_v15 = vpop.permute.xlu1 %2080 }
 0x384   :  { %v2090_v19 = vadd.f32 %v2081_v15, %v2064_v6  ;;  %v2079_v51 = vpop.permute.xlu0 %2078  ;;  %v2443_v6 = vmul.f32 %v4209_v48, %v2439_v39 }
 0x385   :  { %v2089_v57 = vadd.f32 %v2079_v51, %v2063_v14  ;;  %v2094_v14 = vmul.f32 %v4027_v9, %v2093_v47  ;;  %v2155_v9 = vstv %s2594_s29 }
 0x386   :  { %v2100_v5 = vadd.f32 %v2096_v33, %v2090_v19  ;;  %v2156_v36 = vmul.f32 %v4065_v17, %v2155_v9  ;;  %v2159_v2 = vmul.f32 %v4085_v32, %v2155_v9  ;;  %v2157_v33 = vmul.f32 %v4088_v12, %v2155_v9 }
 0x387   :  { %v2099_v23 = vadd.f32 %v2095_v58, %v2089_v57  ;;  %v2098_v56 = vadd.f32 %v2094_v14, %v2088_v26 }
 0x388   :  { %v2126_v52 = vadd.f32 %v2117_v44, %v2100_v5  ;;  %v2101_v44 = vadd.f32 %v2097_v27, %v2091_v21  ;;  %v2158_v21 = vmul.f32 %v4110_v55, %v2155_v9 }
 0x389   :  { %2424 = vrot.lane.b32.xlu2 %v2415_v22, %s2779_s26  ;;  %2428 = vrot.lane.b32.xlu1 %v2417_v63, %s2779_s26 }
 0x38a   :  { %2426 = vrot.lane.b32.xlu0 %v2416_v13, %s2779_s26  ;;  %s2597_s26 = sld [smem:[#allocation8 + $0x60]] }
 0x38b   :  { %v2175_v42 = vpop.permute.xlu2 %2174  ;;  %v2115_v35 = vpop.permute.xlu1 %2114 }
 0x38c   :  { %v2125_v0 = vadd.f32 %v2115_v35, %v2099_v23  ;;  %v2113_v20 = vpop.permute.xlu0 %2112 }
 0x38d   :  { %v2124_v18 = vadd.f32 %v2113_v20, %v2098_v56 }
 0x38e   :  { %v2151_v25 = vadd.f32 %v2141_v1, %v2125_v0 }
 0x390   :  { %v2161_v5 = vadd.f32 %v2157_v33, %v2151_v25  ;;  %v2217_v58 = vstv %s2597_s26  ;;  %v2341_v33 = vstv %s2603_s30 }
 0x391   :  { %2448 = vrot.lane.b32.xlu2 %v2440_v46, %s2780_s28  ;;  %2452 = vrot.lane.b32.xlu1 %v2442_v28, %s2780_s28 }
 0x392   :  { %2450 = vrot.lane.b32.xlu0 %v2441_v38, %s2780_s28 }
 0x393   :  { %v2181_v26 = vpop.permute.xlu2 %2180  ;;  %v2139_v7 = vpop.permute.xlu1 %2138 }
 0x394   :  { %v2150_v40 = vadd.f32 %v2139_v7, %v2124_v18  ;;  %v2119_v49 = vpop.permute.xlu0 %2118 }
 0x395   :  { %v2127_v59 = vadd.f32 %v2119_v49, %v2101_v44 }
 0x396   :  { %v2160_v31 = vadd.f32 %v2156_v36, %v2150_v40 }
 0x398   :  { %v2186_v10 = vadd.f32 %v2175_v42, %v2160_v31 }
 0x399   :  { %2454 = vrot.lane.b32.xlu2 %v2443_v6, %s2780_s28  ;;  %s2600_s28 = sld [smem:[#allocation8 + $0x63]] }
 0x39b   :  { %v2205_v30 = vpop.permute.xlu2 %2204  ;;  %v2145_v4 = vpop.permute.xlu1 %2144 }
 0x39c   :  { %v2153_v1 = vadd.f32 %v2145_v4, %v2127_v59  ;;  %v2143_v47 = vpop.permute.xlu0 %2142  ;;  %v2221_v4 = vmul.f32 %v4125_v11, %v2217_v58  ;;  %v2342_v11 = vmul.f32 %v4177_v60, %v2341_v33 }
 0x39d   :  { %v2152_v15 = vadd.f32 %v2143_v47, %v2126_v52  ;;  %v2219_v52 = vmul.f32 %v4122_v34, %v2217_v58  ;;  %v2218_v34 = vmul.f32 %v4113_v45, %v2217_v58  ;;  %v2220_v45 = vmul.f32 %v4128_v37, %v2217_v58 }
 0x39e   :  { %v2163_v29 = vadd.f32 %v2159_v2, %v2153_v1 }
 0x39f   :  { %v2162_v19 = vadd.f32 %v2158_v21, %v2152_v15  ;;  %v2279_v31 = vstv %s2600_s28 }
 0x3a0   :  { %v2189_v17 = vadd.f32 %v2181_v26, %v2163_v29  ;;  %v2280_v47 = vmul.f32 %v4152_v54, %v2279_v31  ;;  %v2282_v37 = vmul.f32 %v4159_v41, %v2279_v31 }
 0x3a3   :  { %v2239_v51 = vpop.permute.xlu2 %2238  ;;  %v2179_v57 = vpop.permute.xlu1 %2178 }
 0x3a4   :  { %v2188_v22 = vadd.f32 %v2179_v57, %v2162_v19  ;;  %v2177_v63 = vpop.permute.xlu0 %2176 }
 0x3a5   :  { %v2187_v13 = vadd.f32 %v2177_v63, %v2161_v5  ;;  %v2283_v63 = vmul.f32 %v4163_v53, %v2279_v31  ;;  %v2345_v53 = vmul.f32 %v4190_v50, %v2341_v33 }
 0x3a6   :  { %v2214_v24 = vadd.f32 %v2205_v30, %v2188_v22 }
 0x3ab   :  { %v2263_v32 = vpop.permute.xlu2 %2262  ;;  %v2203_v14 = vpop.permute.xlu1 %2202 }
 0x3ac   :  { %v2213_v23 = vadd.f32 %v2203_v14, %v2187_v13  ;;  %v2201_v42 = vpop.permute.xlu0 %2200 }
 0x3ad   :  { %v2212_v26 = vadd.f32 %v2201_v42, %v2186_v10 }
 0x3ae   :  { %v2223_v55 = vadd.f32 %v2219_v52, %v2213_v23  ;;  %v2281_v23 = vmul.f32 %v4147_v3, %v2279_v31 }
 0x3af   :  { %v2222_v40 = vadd.f32 %v2218_v34, %v2212_v26  ;;  %v2344_v34 = vmul.f32 %v4180_v43, %v2341_v33 }
 0x3b0   :  { %v2249_v35 = vadd.f32 %v2239_v51, %v2223_v55 }
 0x3b3   :  { %v2269_v56 = vpop.permute.xlu2 %2268  ;;  %v2237_v12 = vpop.permute.xlu1 %2236 }
 0x3b4   :  { %v2207_v0 = vpop.permute.xlu0 %2206  ;;  %v2248_v49 = vadd.f32 %v2237_v12, %v2222_v40 }
 0x3b5   :  { %v2215_v59 = vadd.f32 %v2207_v0, %v2189_v17  ;;  %v2224_v17 = vadd.f32 %v2220_v45, %v2214_v24 }
 0x3b6   :  { %v2274_v30 = vadd.f32 %v2263_v32, %v2248_v49  ;;  %v2343_v49 = vmul.f32 %v4183_v61, %v2341_v33 }
 0x3b7   :  { %v2225_v1 = vadd.f32 %v2221_v4, %v2215_v59  ;;  %v2465_v59 = vstv %s2609_s5 }
 0x3b8   :  { %v2284_v29 = vadd.f32 %v2280_v47, %v2274_v30 }
 0x3bb   :  { %v2303_v20 = vpop.permute.xlu2 %2302  ;;  %v2243_v39 = vpop.permute.xlu1 %2242 }
 0x3bc   :  { %v2241_v18 = vpop.permute.xlu0 %2240  ;;  %v2251_v15 = vadd.f32 %v2243_v39, %v2225_v1  ;;  %v2403_v39 = vstv %s2606_s4 }
 0x3bd   :  { %v2250_v22 = vadd.f32 %v2241_v18, %v2224_v17  ;;  %v2405_v61 = vmul.f32 %v4206_v16, %v2403_v39 }
 0x3be   :  { %v2277_v51 = vadd.f32 %v2269_v56, %v2251_v15 }
 0x3c0   :  { %v2287_v32 = vadd.f32 %v2283_v63, %v2277_v51 }
 0x3c3   :  { %v2327_v25 = vpop.permute.xlu2 %2326  ;;  %v2267_v46 = vpop.permute.xlu1 %2266 }
 0x3c4   :  { %v2265_v28 = vpop.permute.xlu0 %2264  ;;  %v2276_v13 = vadd.f32 %v2267_v46, %v2250_v22 }
 0x3c5   :  { %v2275_v14 = vadd.f32 %v2265_v28, %v2249_v35  ;;  %v2404_v28 = vmul.f32 %v4199_v62, %v2403_v39  ;;  %v2407_v62 = vmul.f32 %v4209_v48, %v2403_v39 }
 0x3c6   :  { %v2286_v24 = vadd.f32 %v2282_v37, %v2276_v13 }
 0x3c7   :  { %v2285_v0 = vadd.f32 %v2281_v23, %v2275_v14 }
 0x3c8   :  { %v2312_v35 = vadd.f32 %v2303_v20, %v2286_v24 }
 0x3cb   :  { %v2361_v38 = vpop.permute.xlu2 %2360  ;;  %v2301_v9 = vpop.permute.xlu1 %2300 }
 0x3cc   :  { %v2299_v27 = vpop.permute.xlu0 %2298  ;;  %v2311_v18 = vadd.f32 %v2301_v9, %v2285_v0 }
 0x3cd   :  { %v2310_v21 = vadd.f32 %v2299_v27, %v2284_v29 }
 0x3ce   :  { %v2337_v26 = vadd.f32 %v2327_v25, %v2311_v18 }
 0x3d3   :  { %v2325_v7 = vpop.permute.xlu1 %2324  ;;  %v2367_v36 = vpop.permute.xlu2 %2366 }
 0x3d4   :  { %v2305_v44 = vpop.permute.xlu0 %2304  ;;  %v2336_v57 = vadd.f32 %v2325_v7, %v2310_v21  ;;  %v2406_v21 = vmul.f32 %v4212_v8, %v2403_v39 }
 0x3d5   :  { %v2313_v58 = vadd.f32 %v2305_v44, %v2287_v32 }
 0x3d6   :  { %v2346_v54 = vadd.f32 %v2342_v11, %v2336_v57 }
 0x3d8   :  { %v2372_v56 = vadd.f32 %v2361_v38, %v2346_v54 }
 0x3db   :  { %v2331_v6 = vpop.permute.xlu1 %2330  ;;  %v2391_v10 = vpop.permute.xlu2 %2390 }
 0x3dc   :  { %v2329_v2 = vpop.permute.xlu0 %2328  ;;  %v2339_v55 = vadd.f32 %v2331_v6, %v2313_v58  ;;  %v2347_v6 = vadd.f32 %v2343_v49, %v2337_v26 }
 0x3dd   :  { %v2338_v41 = vadd.f32 %v2329_v2, %v2312_v35 }
 0x3de   :  { %v2349_v46 = vadd.f32 %v2345_v53, %v2339_v55 }
 0x3df   :  { %v2348_v50 = vadd.f32 %v2344_v34, %v2338_v41 }
 0x3e0   :  { %v2375_v44 = vadd.f32 %v2367_v36, %v2349_v46 }
 0x3e3   :  { %v2365_v19 = vpop.permute.xlu1 %2364  ;;  %v2425_v52 = vpop.permute.xlu2 %2424 }
 0x3e4   :  { %v2363_v5 = vpop.permute.xlu0 %2362  ;;  %v2374_v20 = vadd.f32 %v2365_v19, %v2348_v50 }
 0x3e5   :  { %v2373_v4 = vadd.f32 %v2363_v5, %v2347_v6 }
 0x3e6   :  { %v2400_v43 = vadd.f32 %v2391_v10, %v2374_v20 }
 0x3e8   :  { %v2410_v51 = vadd.f32 %v2406_v21, %v2400_v43 }
 0x3eb   :  { %v2389_v42 = vpop.permute.xlu1 %2388  ;;  %v2449_v3 = vpop.permute.xlu2 %2448 }
 0x3ec   :  { %v2387_v12 = vpop.permute.xlu0 %2386  ;;  %v2399_v1 = vadd.f32 %v2389_v42, %v2373_v4 }
 0x3ed   :  { %v2398_v60 = vadd.f32 %v2387_v12, %v2372_v56 }
 0x3ee   :  { %v2409_v33 = vadd.f32 %v2405_v61, %v2399_v1 }
 0x3ef   :  { %v2408_v27 = vadd.f32 %v2404_v28, %v2398_v60 }
 0x3f0   :  { %v2435_v5 = vadd.f32 %v2425_v52, %v2409_v33 }
 0x3f3   :  { %v2423_v7 = vpop.permute.xlu1 %2422  ;;  %v2455_v29 = vpop.permute.xlu2 %2454 }
 0x3f4   :  { %v2434_v38 = vadd.f32 %v2423_v7, %v2408_v27  ;;  %v2393_v40 = vpop.permute.xlu0 %2392 }
 0x3f5   :  { %v2401_v9 = vadd.f32 %v2393_v40, %v2375_v44 }
 0x3f6   :  { %v2460_v31 = vadd.f32 %v2449_v3, %v2434_v38 }
 0x3f7   :  { %v2411_v2 = vadd.f32 %v2407_v62, %v2401_v9 }
 0x3f8   :  { %v2466_v30 = vadd.f32 %v2465_v59, %v2460_v31 }
 0x3fa   :  { %v2470_v25 = vmax.f32 %v2466_v30, 0.0 }
 0x3fb   :  { %v2429_v47 = vpop.permute.xlu1 %2428 }
 0x3fc   :  { %2475 = vst.msk [vmem:[#allocation10 + $0x30] sm:$0xff] %vm755_vm3, %v2470_v25  ;;  %v2437_v36 = vadd.f32 %v2429_v47, %v2411_v2  ;;  %v2427_v15 = vpop.permute.xlu0 %2426 }
 0x3fd   :  { %v2436_v17 = vadd.f32 %v2427_v15, %v2410_v51 }
 0x3fe   :  { %v2463_v45 = vadd.f32 %v2455_v29, %v2437_v36 }
 0x400   :  { %v2469_v19 = vadd.f32 %v2465_v59, %v2463_v45 }
 0x402   :  { %v2473_v48 = vmax.f32 %v2469_v19, 0.0 }
 0x403   :  { %v2453_v57 = vpop.permute.xlu1 %2452 }
 0x404   :  { %2478 = vst.msk [vmem:[#allocation10 + $0x78] sm:$0xff] %vm755_vm3, %v2473_v48  ;;  %v2462_v10 = vadd.f32 %v2453_v57, %v2436_v17  ;;  %v2451_v22 = vpop.permute.xlu0 %2450 }
 0x405   :  { %v2461_v11 = vadd.f32 %v2451_v22, %v2435_v5 }
 0x406   :  { %v2468_v63 = vadd.f32 %v2465_v59, %v2462_v10 }
 0x407   :  { %v2467_v16 = vadd.f32 %v2465_v59, %v2461_v11 }
 0x408   :  { %v2472_v8 = vmax.f32 %v2468_v63, 0.0 }
 0x409   :  { %v2471_v13 = vmax.f32 %v2467_v16, 0.0 }
 0x40a   :  { %2477 = vst.msk [vmem:[#allocation10 + $0x70] sm:$0xff] %vm755_vm3, %v2472_v8 }
 0x40b   :  { %2476 = vst.msk [vmem:[#allocation10 + $0x38] sm:$0xff] %vm755_vm3, %v2471_v13 }
 0x40c   :  { %2491 = dma.vmem_to_hbm [thread:$0]  %s2484_s7, 2048, %s2486_s10, [#allocation5], %s2773_s20, %s2773_s20, %s2774_s21  }
 0x40d   :  { %2770 = dma.done.wait [#allocation5], 2048  }
 0x40e   :  { %2771 = vsyncadd [#allocation5], 4294965248 }
 0x40f   :  { %2496 = vsyncpa [#allocation4], 1 }
 0x410   :  { %2497 = vsyncpa [#allocation5], 1 }
 0x411   :  { %2498 = vsyncpa [#allocation6], 1 }
 0x412   :  { %2499 = vsyncpa [#allocation7], 1 }

</bundles_post_ra>
